<compile_context>
chip_gen: v7x
topology: tpu7x:2x2x1
jax: 0.10.0
libtpu: 0.0.40
codegen_flags: <defaults>
</compile_context>

<pallas_src>
import jax
import jax.numpy as jnp
from jax import lax
from jax.experimental import pallas as pl
from jax.experimental.pallas import tpu as pltpu

# ----- small, structure-consistent config (real: D=1024, H=16, M=4096, S=577) -----
B = 2          # batch
S = 8          # sequence (num patches)
D = 128        # image_emb_dim
H = 4          # image_num_heads
HD = D // H    # head_dim
M = 256        # image_mlp_dim
EPS = 1e-5     # image_norm_eps


def _round_up(a, b):
    return (a + b - 1) // b * b


# ----- derived tiling -----
TQ = 128 if S >= 128 else _round_up(S, 8)   # query-tile rows (128 at real S=577)
SP = _round_up(S, TQ)                       # padded KV length (640 at real S=577)
GW = min(D, 128)                            # head-group width in lanes (2 heads at HD=64)
HG = GW // HD                               # heads per 128-lane group
NG = D // GW                                # number of head groups
MLP_CHUNK = min(M, 512)                     # 512 at real M=4096 (256-wide-MXU friendly)
NC = M // MLP_CHUNK
HEAD_UNROLL = min(2, NG)
MLP_UNROLL = min(2, NC)
SCALE = HD ** (-0.5)

assert D % H == 0 and GW % HD == 0 and D % GW == 0 and M % MLP_CHUNK == 0


def _layernorm(x, gamma, beta, eps):
    # fp32 throughout (v5e has no bf16 VPU/EUP).
    mean = jnp.mean(x, axis=-1, keepdims=True)
    xc = x - mean
    var = jnp.mean(xc * xc, axis=-1, keepdims=True)
    return xc * lax.rsqrt(var + eps) * gamma + beta


def residual_attention_block_kernel(
    x_ref,
    ln1_g_ref, ln1_b_ref,
    wq_ref, bq_ref, wk_ref, bk_ref, wv_ref, bv_ref, wo_ref, bo_ref,
    ln2_g_ref, ln2_b_ref,
    w1_ref, b1_ref, w2_ref, b2_ref,
    out_ref,
    h1_scr, k_scr, v_scr, q_scr, attn_scr,
):
    qi = pl.program_id(1)

    # ---- per-batch-element cache: LN1(x), K and V computed exactly once ----
    @pl.when(qi == 0)
    def _():
        x_full = x_ref[0]                                            # (SP, D) fp32
        h1 = _layernorm(x_full, ln1_g_ref[...], ln1_b_ref[...], EPS)
        h1_scr[...] = h1                                             # fp32 cache
        h1_bf = h1.astype(jnp.bfloat16)
        # TODO(synk): at very large S, chunk these two projections over rows.
        k_scr[...] = (jnp.dot(h1_bf, wk_ref[...],
                              preferred_element_type=jnp.float32)
                      + bk_ref[...]).astype(jnp.bfloat16)
        v_scr[...] = (jnp.dot(h1_bf, wv_ref[...],
                              preferred_element_type=jnp.float32)
                      + bv_ref[...]).astype(jnp.bfloat16)

    # ---- this tile's query rows ----
    row0 = pl.multiple_of(qi * TQ, TQ)
    xq = x_ref[0, pl.ds(row0, TQ), :]                                # (TQ, D) fp32 residual
    h1q = h1_scr[pl.ds(row0, TQ), :].astype(jnp.bfloat16)            # (TQ, D) bf16

    # fold 1/sqrt(hd) into q (cheaper than scaling the (TQ, SP) score tiles)
    q = (jnp.dot(h1q, wq_ref[...], preferred_element_type=jnp.float32)
         + bq_ref[...]) * SCALE
    q_scr[...] = q.astype(jnp.bfloat16)

    # key mask for padded key rows (only materialized if we actually padded);
    # hoisted out of the head loop (broadcasts are not CSE'd inside loops).
    if SP != S:
        key_ids = lax.broadcasted_iota(jnp.int32, (1, SP), 1)
        key_mask = jnp.where(key_ids < S, 0.0, -1e30).astype(jnp.float32)
    else:
        key_mask = None

    dn_qk = (((1,), (1,)), ((), ()))   # contract head_dim of q and k: no K transpose

    # ---- attention: heads processed in 128-lane groups (pairs at HD=64) ----
    def head_group(g, carry):
        off = pl.multiple_of(g * GW, GW)                 # 128-lane aligned offset
        qg = q_scr[:, pl.ds(off, GW)]                    # (TQ, GW) bf16
        kg = k_scr[:, pl.ds(off, GW)]                    # (SP, GW) bf16
        vg = v_scr[:, pl.ds(off, GW)]                    # (SP, GW) bf16
        outs = []
        for h in range(HG):                              # HG == 2 at real HD=64
            lo = h * HD
            s = lax.dot_general(qg[:, lo:lo + HD], kg[:, lo:lo + HD], dn_qk,
                                preferred_element_type=jnp.float32)   # (TQ, SP)
            if key_mask is not None:
                s = s + key_mask                          # mask padded keys
            s = s - jnp.max(s, axis=-1, keepdims=True)
            e = jnp.exp(s)
            p = e * pl.reciprocal(jnp.sum(e, axis=-1, keepdims=True), approx=True)
            outs.append(jnp.dot(p.astype(jnp.bfloat16), vg[:, lo:lo + HD],
                                preferred_element_type=jnp.float32))  # (TQ, HD)
        og = outs[0] if HG == 1 else jnp.concatenate(outs, axis=-1)   # (TQ, GW)
        attn_scr[:, pl.ds(off, GW)] = og.astype(jnp.bfloat16)         # full-width store
        return carry

    lax.fori_loop(0, NG, head_group, 0, unroll=HEAD_UNROLL)

    attn_out = (jnp.dot(attn_scr[...], wo_ref[...],
                        preferred_element_type=jnp.float32) + bo_ref[...])
    res1 = xq + attn_out                                 # residual 1 (fp32)

    # ---- MLP branch (fused along M, chunked) ----
    h2_bf = _layernorm(res1, ln2_g_ref[...], ln2_b_ref[...], EPS).astype(jnp.bfloat16)

    def mlp_chunk(c, acc):
        off = pl.multiple_of(c * MLP_CHUNK, MLP_CHUNK)
        u = (jnp.dot(h2_bf, w1_ref[:, pl.ds(off, MLP_CHUNK)],
                     preferred_element_type=jnp.float32)
             + b1_ref[:, pl.ds(off, MLP_CHUNK)])
        u = u * jax.nn.sigmoid(1.702 * u)                # QuickGELU, fp32
        return acc + jnp.dot(u.astype(jnp.bfloat16),
                             w2_ref[pl.ds(off, MLP_CHUNK), :],
                             preferred_element_type=jnp.float32)

    y = lax.fori_loop(0, NC, mlp_chunk, jnp.zeros((TQ, D), jnp.float32),
                      unroll=MLP_UNROLL)

    out_ref[0] = (res1 + y + b2_ref[...]).astype(out_ref.dtype)


def _vmem_limit_bytes():
    # ~75% of physical VMEM, capped at 96 MiB: -> ~48 MiB on v7x (64 MiB/TC),
    # 96 MiB on v5e/v6e (128 MiB/TC).  Leaves headroom for compiler scratch.
    try:
        cap = pltpu.get_tpu_info().vmem_capacity_bytes
    except Exception:
        cap = 64 * 1024 * 1024
    return int(min(96 * 1024 * 1024, cap * 3 // 4))


def _make_block_call(single_buffer_weights):
    # Grid-invariant operands (weights/biases/LN params): index_map never
    # changes, so single-buffer them to halve their VMEM footprint.
    pm = {"pipeline_mode": pl.Buffered(1)} if single_buffer_weights else {}
    inv = lambda shape: pl.BlockSpec(shape, lambda b, qi: (0,) * len(shape), **pm)

    in_specs = [
        pl.BlockSpec((1, SP, D), lambda b, qi: (b, 0, 0)),   # x: full padded seq per b
        inv((1, D)), inv((1, D)),                            # ln1 gamma, beta
        inv((D, D)), inv((1, D)),                            # wq, bq
        inv((D, D)), inv((1, D)),                            # wk, bk
        inv((D, D)), inv((1, D)),                            # wv, bv
        inv((D, D)), inv((1, D)),                            # wo, bo
        inv((1, D)), inv((1, D)),                            # ln2 gamma, beta
        inv((D, M)), inv((1, M)),                            # w1, b1
        inv((M, D)), inv((1, D)),                            # w2, b2
    ]
    out_spec = pl.BlockSpec((1, TQ, D), lambda b, qi: (b, qi, 0))

    return pl.pallas_call(
        residual_attention_block_kernel,
        out_shape=jax.ShapeDtypeStruct((B, SP, D), jnp.float32),
        grid_spec=pltpu.PrefetchScalarGridSpec(
            num_scalar_prefetch=0,
            grid=(B, SP // TQ),          # b outer (megacore), qi inner (sequential)
            in_specs=in_specs,
            out_specs=out_spec,
            scratch_shapes=[
                pltpu.VMEM((SP, D), jnp.float32),    # h1_scr: LN1(x) cache, per b
                pltpu.VMEM((SP, D), jnp.bfloat16),   # k_scr : K cache, per b
                pltpu.VMEM((SP, D), jnp.bfloat16),   # v_scr : V cache, per b
                pltpu.VMEM((TQ, D), jnp.bfloat16),   # q_scr : this tile's Q
                pltpu.VMEM((TQ, D), jnp.bfloat16),   # attn_scr: per-head outputs (bf16)
            ],
        ),
        compiler_params=pltpu.CompilerParams(
            # qi must be "arbitrary": the K/V scratch written at qi==0 carries
            # across qi steps; b stays "parallel" for v7x megacore sharding.
            dimension_semantics=("parallel", "arbitrary"),
            vmem_limit_bytes=_vmem_limit_bytes(),
        ),
    )


def residual_attention_block(x, params):
    """x: (B, S, D) float32; params: dict from init_params (bf16 matmul weights)."""
    x_in = jnp.pad(x, ((0, 0), (0, SP - S), (0, 0))) if SP != S else x
    args = (
        x_in,
        params["ln1_g"], params["ln1_b"],
        params["wq"], params["bq"], params["wk"], params["bk"],
        params["wv"], params["bv"], params["wo"], params["bo"],
        params["ln2_g"], params["ln2_b"],
        params["w1"], params["b1"], params["w2"], params["b2"],
    )
    try:
        out = jax.block_until_ready(_make_block_call(True)(*args))
    except Exception:
        # TODO(synk): drop this fallback once pl.Buffered(1) single-buffering is
        # confirmed on the deployed JAX version.
        out = jax.block_until_ready(_make_block_call(False)(*args))
    return out[:, :S] if SP != S else out


def init_params(key):
    # Matmul weights are stored in bf16 ONCE here (no per-forward cast);
    # biases / LayerNorm params stay fp32.
    ks = jax.random.split(key, 10)
    sc = 0.02
    f32, bf = jnp.float32, jnp.bfloat16
    return {
        "ln1_g": jnp.ones((1, D), f32),
        "ln1_b": jnp.zeros((1, D), f32),
        "wq": (sc * jax.random.normal(ks[0], (D, D), f32)).astype(bf),
        "bq": sc * jax.random.normal(ks[1], (1, D), f32),
        "wk": (sc * jax.random.normal(ks[2], (D, D), f32)).astype(bf),
        "bk": sc * jax.random.normal(ks[3], (1, D), f32),
        "wv": (sc * jax.random.normal(ks[4], (D, D), f32)).astype(bf),
        "bv": sc * jax.random.normal(ks[5], (1, D), f32),
        "wo": (sc * jax.random.normal(ks[6], (D, D), f32)).astype(bf),
        "bo": jnp.zeros((1, D), f32),
        "ln2_g": jnp.ones((1, D), f32),
        "ln2_b": jnp.zeros((1, D), f32),
        "w1": (sc * jax.random.normal(ks[7], (D, M), f32)).astype(bf),
        "b1": sc * jax.random.normal(ks[8], (1, M), f32),
        "w2": (sc * jax.random.normal(ks[9], (M, D), f32)).astype(bf),
        "b2": jnp.zeros((1, D), f32),
    }


def reference(x, p):
    """Pure-JAX fp32 reference of the PyTorch forward pass."""
    f = lambda w: w.astype(jnp.float32)

    def ln(z, g, b):
        mu = jnp.mean(z, -1, keepdims=True)
        zc = z - mu
        var = jnp.mean(zc * zc, -1, keepdims=True)
        return zc / jnp.sqrt(var + EPS) * g[0] + b[0]

    h = ln(x, p["ln1_g"], p["ln1_b"])
    q = h @ f(p["wq"]) + p["bq"][0]
    k = h @ f(p["wk"]) + p["bk"][0]
    v = h @ f(p["wv"]) + p["bv"][0]
    q = q.reshape(B, S, H, HD).transpose(0, 2, 1, 3)
    k = k.reshape(B, S, H, HD).transpose(0, 2, 1, 3)
    v = v.reshape(B, S, H, HD).transpose(0, 2, 1, 3)
    s = jnp.einsum("bhqd,bhkd->bhqk", q, k) * (HD ** -0.5)
    pattn = jax.nn.softmax(s, axis=-1)
    o = jnp.einsum("bhqk,bhkd->bhqd", pattn, v).transpose(0, 2, 1, 3).reshape(B, S, D)
    o = o @ f(p["wo"]) + p["bo"][0]
    x = x + o
    h2 = ln(x, p["ln2_g"], p["ln2_b"])
    u = h2 @ f(p["w1"]) + p["b1"][0]
    u = u * jax.nn.sigmoid(1.702 * u)
    y = u @ f(p["w2"]) + p["b2"][0]
    return x + y


if __name__ == "__main__":
    key = jax.random.PRNGKey(0)
    kx, kp = jax.random.split(key)
    x = jax.random.normal(kx, (B, S, D), jnp.float32)
    params = init_params(kp)

    out = residual_attention_block(x, params)
    out = jax.block_until_ready(out)

    ref = reference(x, params)
    assert out.shape == (B, S, D)
    # bf16 matmul operands (fp32 accumulation) + approx reciprocal => loosened
    # tolerance vs. the fp32 reference.
    err = float(jnp.max(jnp.abs(out - ref)))
    assert jnp.allclose(out, ref, atol=2e-2, rtol=2e-2), err

    print("KERNEL_OK")
</pallas_src>

<mosaic_0001>
module attributes {stable_mosaic.version = 11 : i64} {
  func.func @residual_attention_block_kernel(%arg0: i32, %arg1: i32, %arg2: memref<1x8x128xf32, #tpu.memory_space<vmem>>, %arg3: memref<1x128xf32, #tpu.memory_space<vmem>>, %arg4: memref<1x128xf32, #tpu.memory_space<vmem>>, %arg5: memref<128x128xbf16, #tpu.memory_space<vmem>>, %arg6: memref<1x128xf32, #tpu.memory_space<vmem>>, %arg7: memref<128x128xbf16, #tpu.memory_space<vmem>>, %arg8: memref<1x128xf32, #tpu.memory_space<vmem>>, %arg9: memref<128x128xbf16, #tpu.memory_space<vmem>>, %arg10: memref<1x128xf32, #tpu.memory_space<vmem>>, %arg11: memref<128x128xbf16, #tpu.memory_space<vmem>>, %arg12: memref<1x128xf32, #tpu.memory_space<vmem>>, %arg13: memref<1x128xf32, #tpu.memory_space<vmem>>, %arg14: memref<1x128xf32, #tpu.memory_space<vmem>>, %arg15: memref<128x256xbf16, #tpu.memory_space<vmem>>, %arg16: memref<1x256xf32, #tpu.memory_space<vmem>>, %arg17: memref<256x128xbf16, #tpu.memory_space<vmem>>, %arg18: memref<1x128xf32, #tpu.memory_space<vmem>>, %arg19: memref<1x8x128xf32, #tpu.memory_space<vmem>>, %arg20: memref<8x128xf32, #tpu.memory_space<vmem>>, %arg21: memref<8x128xbf16, #tpu.memory_space<vmem>>, %arg22: memref<8x128xbf16, #tpu.memory_space<vmem>>, %arg23: memref<8x128xbf16, #tpu.memory_space<vmem>>, %arg24: memref<8x128xbf16, #tpu.memory_space<vmem>>) attributes {dimension_semantics = [#tpu.dimension_semantics<parallel>, #tpu.dimension_semantics<arbitrary>], iteration_bounds = array<i64: 2, 1>, scalar_prefetch = 0 : i64, scratch_operands = 5 : i64, tpu.core_type = #tpu.core_type<tc>, window_params = [{transform_indices = @transform_0, window_bounds = array<i64: 1, 8, 128>}, {pipeline_mode = #tpu.pipeline_mode<synchronous>, transform_indices = @transform_1, window_bounds = array<i64: 1, 128>}, {pipeline_mode = #tpu.pipeline_mode<synchronous>, transform_indices = @transform_2, window_bounds = array<i64: 1, 128>}, {pipeline_mode = #tpu.pipeline_mode<synchronous>, transform_indices = @transform_3, window_bounds = array<i64: 128, 128>}, {pipeline_mode = #tpu.pipeline_mode<synchronous>, transform_indices = @transform_4, window_bounds = array<i64: 1, 128>}, {pipeline_mode = #tpu.pipeline_mode<synchronous>, transform_indices = @transform_5, window_bounds = array<i64: 128, 128>}, {pipeline_mode = #tpu.pipeline_mode<synchronous>, transform_indices = @transform_6, window_bounds = array<i64: 1, 128>}, {pipeline_mode = #tpu.pipeline_mode<synchronous>, transform_indices = @transform_7, window_bounds = array<i64: 128, 128>}, {pipeline_mode = #tpu.pipeline_mode<synchronous>, transform_indices = @transform_8, window_bounds = array<i64: 1, 128>}, {pipeline_mode = #tpu.pipeline_mode<synchronous>, transform_indices = @transform_9, window_bounds = array<i64: 128, 128>}, {pipeline_mode = #tpu.pipeline_mode<synchronous>, transform_indices = @transform_10, window_bounds = array<i64: 1, 128>}, {pipeline_mode = #tpu.pipeline_mode<synchronous>, transform_indices = @transform_11, window_bounds = array<i64: 1, 128>}, {pipeline_mode = #tpu.pipeline_mode<synchronous>, transform_indices = @transform_12, window_bounds = array<i64: 1, 128>}, {pipeline_mode = #tpu.pipeline_mode<synchronous>, transform_indices = @transform_13, window_bounds = array<i64: 128, 256>}, {pipeline_mode = #tpu.pipeline_mode<synchronous>, transform_indices = @transform_14, window_bounds = array<i64: 1, 256>}, {pipeline_mode = #tpu.pipeline_mode<synchronous>, transform_indices = @transform_15, window_bounds = array<i64: 256, 128>}, {pipeline_mode = #tpu.pipeline_mode<synchronous>, transform_indices = @transform_16, window_bounds = array<i64: 1, 128>}, {transform_indices = @transform_17, window_bounds = array<i64: 1, 8, 128>}]} {
    %c0_i32 = arith.constant 0 : i32
    %0 = arith.cmpi eq, %arg1, %c0_i32 : i32
    %1 = arith.extui %0 : i1 to i32
    %c0_i32_0 = arith.constant 0 : i32
    %2 = arith.cmpi ne, %1, %c0_i32_0 : i32
    scf.if %2 {
      %c0_62 = arith.constant 0 : index
      %c0_63 = arith.constant 0 : index
      %c0_64 = arith.constant 0 : index
      %156 = vector.load %arg2[%c0_62, %c0_63, %c0_64] : memref<1x8x128xf32, #tpu.memory_space<vmem>>, vector<1x8x128xf32>
      %157 = vector.shape_cast %156 : vector<1x8x128xf32> to vector<8x128xf32>
      %c0_65 = arith.constant 0 : index
      %c0_66 = arith.constant 0 : index
      %158 = vector.load %arg3[%c0_65, %c0_66] : memref<1x128xf32, #tpu.memory_space<vmem>>, vector<1x128xf32>
      %c0_67 = arith.constant 0 : index
      %c0_68 = arith.constant 0 : index
      %159 = vector.load %arg4[%c0_67, %c0_68] : memref<1x128xf32, #tpu.memory_space<vmem>>, vector<1x128xf32>
      %cst_69 = arith.constant dense<0.000000e+00> : vector<8xf32>
      %160 = vector.multi_reduction <add>, %157, %cst_69 [1] : vector<8x128xf32> to vector<8xf32>
      %161 = vector.shape_cast %160 : vector<8xf32> to vector<8x1xf32>
      %cst_70 = arith.constant 1.280000e+02 : f32
      %162 = vector.broadcast %cst_70 : f32 to vector<8x1xf32>
      %163 = arith.divf %161, %162 : vector<8x1xf32>
      %164 = vector.broadcast %163 : vector<8x1xf32> to vector<8x128xf32>
      %165 = arith.subf %157, %164 : vector<8x128xf32>
      %166 = arith.mulf %165, %165 : vector<8x128xf32>
      %cst_71 = arith.constant dense<0.000000e+00> : vector<8xf32>
      %167 = vector.multi_reduction <add>, %166, %cst_71 [1] : vector<8x128xf32> to vector<8xf32>
      %168 = vector.shape_cast %167 : vector<8xf32> to vector<8x1xf32>
      %cst_72 = arith.constant 1.280000e+02 : f32
      %169 = vector.broadcast %cst_72 : f32 to vector<8x1xf32>
      %170 = arith.divf %168, %169 : vector<8x1xf32>
      %cst_73 = arith.constant 9.99999974E-6 : f32
      %171 = vector.broadcast %cst_73 : f32 to vector<8x1xf32>
      %172 = arith.addf %170, %171 : vector<8x1xf32>
      %173 = math.rsqrt %172 : vector<8x1xf32>
      %174 = vector.broadcast %173 : vector<8x1xf32> to vector<8x128xf32>
      %175 = arith.mulf %165, %174 : vector<8x128xf32>
      %176 = vector.broadcast %158 : vector<1x128xf32> to vector<8x128xf32>
      %177 = arith.mulf %175, %176 : vector<8x128xf32>
      %178 = vector.broadcast %159 : vector<1x128xf32> to vector<8x128xf32>
      %179 = arith.addf %177, %178 : vector<8x128xf32>
      %c0_74 = arith.constant 0 : index
      %c0_75 = arith.constant 0 : index
      %180 = vector.load %arg20[%c0_74, %c0_75] : memref<8x128xf32, #tpu.memory_space<vmem>>, vector<8x128xf32>
      tpu.vector_store %arg20[%c0_74, %c0_75], %179 {strides = array<i32>} : memref<8x128xf32, #tpu.memory_space<vmem>>, vector<8x128xf32>,
      %181 = arith.truncf %179 : vector<8x128xf32> to vector<8x128xbf16>
      %c0_76 = arith.constant 0 : index
      %c0_77 = arith.constant 0 : index
      %182 = vector.load %arg7[%c0_76, %c0_77] : memref<128x128xbf16, #tpu.memory_space<vmem>>, vector<128x128xbf16>
      %cst_78 = arith.constant dense<0.000000e+00> : vector<8x128xf32>
      %183 = tpu.matmul %181, %182, %cst_78 {dimension_numbers = #tpu.dot_dimension_numbers<[1], [0], [0], [1], [0, 0, 1, 1], [], []>} : vector<8x128xbf16>, vector<128x128xbf16>, vector<8x128xf32> -> vector<8x128xf32>
      %c0_79 = arith.constant 0 : index
      %c0_80 = arith.constant 0 : index
      %184 = vector.load %arg8[%c0_79, %c0_80] : memref<1x128xf32, #tpu.memory_space<vmem>>, vector<1x128xf32>
      %185 = vector.broadcast %184 : vector<1x128xf32> to vector<8x128xf32>
      %186 = arith.addf %183, %185 : vector<8x128xf32>
      %187 = arith.truncf %186 : vector<8x128xf32> to vector<8x128xbf16>
      %c0_81 = arith.constant 0 : index
      %c0_82 = arith.constant 0 : index
      %188 = vector.load %arg21[%c0_81, %c0_82] : memref<8x128xbf16, #tpu.memory_space<vmem>>, vector<8x128xbf16>
      tpu.vector_store %arg21[%c0_81, %c0_82], %187 {strides = array<i32>} : memref<8x128xbf16, #tpu.memory_space<vmem>>, vector<8x128xbf16>,
      %c0_83 = arith.constant 0 : index
      %c0_84 = arith.constant 0 : index
      %189 = vector.load %arg9[%c0_83, %c0_84] : memref<128x128xbf16, #tpu.memory_space<vmem>>, vector<128x128xbf16>
      %cst_85 = arith.constant dense<0.000000e+00> : vector<8x128xf32>
      %190 = tpu.matmul %181, %189, %cst_85 {dimension_numbers = #tpu.dot_dimension_numbers<[1], [0], [0], [1], [0, 0, 1, 1], [], []>} : vector<8x128xbf16>, vector<128x128xbf16>, vector<8x128xf32> -> vector<8x128xf32>
      %c0_86 = arith.constant 0 : index
      %c0_87 = arith.constant 0 : index
      %191 = vector.load %arg10[%c0_86, %c0_87] : memref<1x128xf32, #tpu.memory_space<vmem>>, vector<1x128xf32>
      %192 = vector.broadcast %191 : vector<1x128xf32> to vector<8x128xf32>
      %193 = arith.addf %190, %192 : vector<8x128xf32>
      %194 = arith.truncf %193 : vector<8x128xf32> to vector<8x128xbf16>
      %c0_88 = arith.constant 0 : index
      %c0_89 = arith.constant 0 : index
      %195 = vector.load %arg22[%c0_88, %c0_89] : memref<8x128xbf16, #tpu.memory_space<vmem>>, vector<8x128xbf16>
      tpu.vector_store %arg22[%c0_88, %c0_89], %194 {strides = array<i32>} : memref<8x128xbf16, #tpu.memory_space<vmem>>, vector<8x128xbf16>,
    } else {
    }
    %c8_i32 = arith.constant 8 : i32
    %3 = arith.muli %arg1, %c8_i32 : i32
    %4 = tpu.assume_multiple %3, 8 : i32
    %c0 = arith.constant 0 : index
    %5 = arith.index_cast %4 : i32 to index
    %c0_1 = arith.constant 0 : index
    %6 = vector.load %arg2[%c0, %5, %c0_1] : memref<1x8x128xf32, #tpu.memory_space<vmem>>, vector<1x8x128xf32>
    %7 = vector.shape_cast %6 : vector<1x8x128xf32> to vector<8x128xf32>
    %8 = arith.index_cast %4 : i32 to index
    %c0_2 = arith.constant 0 : index
    %9 = vector.load %arg20[%8, %c0_2] : memref<8x128xf32, #tpu.memory_space<vmem>>, vector<8x128xf32>
    %10 = arith.truncf %9 : vector<8x128xf32> to vector<8x128xbf16>
    %c0_3 = arith.constant 0 : index
    %c0_4 = arith.constant 0 : index
    %11 = vector.load %arg5[%c0_3, %c0_4] : memref<128x128xbf16, #tpu.memory_space<vmem>>, vector<128x128xbf16>
    %cst = arith.constant dense<0.000000e+00> : vector<8x128xf32>
    %12 = tpu.matmul %10, %11, %cst {dimension_numbers = #tpu.dot_dimension_numbers<[1], [0], [0], [1], [0, 0, 1, 1], [], []>} : vector<8x128xbf16>, vector<128x128xbf16>, vector<8x128xf32> -> vector<8x128xf32>
    %c0_5 = arith.constant 0 : index
    %c0_6 = arith.constant 0 : index
    %13 = vector.load %arg6[%c0_5, %c0_6] : memref<1x128xf32, #tpu.memory_space<vmem>>, vector<1x128xf32>
    %14 = vector.broadcast %13 : vector<1x128xf32> to vector<8x128xf32>
    %15 = arith.addf %12, %14 : vector<8x128xf32>
    %cst_7 = arith.constant 0.176776692 : f32
    %16 = vector.broadcast %cst_7 : f32 to vector<8x128xf32>
    %17 = arith.mulf %15, %16 : vector<8x128xf32>
    %18 = arith.truncf %17 : vector<8x128xf32> to vector<8x128xbf16>
    %c0_8 = arith.constant 0 : index
    %c0_9 = arith.constant 0 : index
    %19 = vector.load %arg23[%c0_8, %c0_9] : memref<8x128xbf16, #tpu.memory_space<vmem>>, vector<8x128xbf16>
    tpu.vector_store %arg23[%c0_8, %c0_9], %18 {strides = array<i32>} : memref<8x128xbf16, #tpu.memory_space<vmem>>, vector<8x128xbf16>,
    %c0_i32_10 = arith.constant 0 : i32
    %c128_i32 = arith.constant 128 : i32
    %20 = arith.muli %c0_i32_10, %c128_i32 : i32
    %21 = tpu.assume_multiple %20, 128 : i32
    %c0_11 = arith.constant 0 : index
    %22 = arith.index_cast %21 : i32 to index
    %23 = vector.load %arg23[%c0_11, %22] : memref<8x128xbf16, #tpu.memory_space<vmem>>, vector<8x128xbf16>
    %c0_12 = arith.constant 0 : index
    %24 = arith.index_cast %21 : i32 to index
    %25 = vector.load %arg21[%c0_12, %24] : memref<8x128xbf16, #tpu.memory_space<vmem>>, vector<8x128xbf16>
    %c0_13 = arith.constant 0 : index
    %26 = arith.index_cast %21 : i32 to index
    %27 = vector.load %arg22[%c0_13, %26] : memref<8x128xbf16, #tpu.memory_space<vmem>>, vector<8x128xbf16>
    %28 = vector.extract_strided_slice %23 {offsets = [0, 0], sizes = [8, 32], strides = [1, 1]} : vector<8x128xbf16> to vector<8x32xbf16>
    %29 = vector.extract_strided_slice %25 {offsets = [0, 0], sizes = [8, 32], strides = [1, 1]} : vector<8x128xbf16> to vector<8x32xbf16>
    %cst_14 = arith.constant dense<0.000000e+00> : vector<8x8xf32>
    %30 = tpu.matmul %28, %29, %cst_14 {dimension_numbers = #tpu.dot_dimension_numbers<[1], [1], [0], [0], [0, 0, 1, 0], [], []>} : vector<8x32xbf16>, vector<8x32xbf16>, vector<8x8xf32> -> vector<8x8xf32>
    %cst_15 = arith.constant dense<0xFF800000> : vector<8xf32>
    %31 = vector.multi_reduction <maximumf>, %30, %cst_15 [1] : vector<8x8xf32> to vector<8xf32>
    %32 = vector.shape_cast %31 : vector<8xf32> to vector<8x1xf32>
    %33 = vector.broadcast %32 : vector<8x1xf32> to vector<8x8xf32>
    %34 = arith.subf %30, %33 : vector<8x8xf32>
    %35 = math.exp %34 : vector<8x8xf32>
    %cst_16 = arith.constant dense<0.000000e+00> : vector<8xf32>
    %36 = vector.multi_reduction <add>, %35, %cst_16 [1] : vector<8x8xf32> to vector<8xf32>
    %37 = vector.shape_cast %36 : vector<8xf32> to vector<8x1xf32>
    %38 = tpu.reciprocal %37 {approx = true} : vector<8x1xf32> -> vector<8x1xf32>
    %39 = vector.broadcast %38 : vector<8x1xf32> to vector<8x8xf32>
    %40 = arith.mulf %35, %39 : vector<8x8xf32>
    %41 = arith.truncf %40 : vector<8x8xf32> to vector<8x8xbf16>
    %42 = vector.extract_strided_slice %27 {offsets = [0, 0], sizes = [8, 32], strides = [1, 1]} : vector<8x128xbf16> to vector<8x32xbf16>
    %cst_17 = arith.constant dense<0.000000e+00> : vector<8x32xf32>
    %43 = tpu.matmul %41, %42, %cst_17 {dimension_numbers = #tpu.dot_dimension_numbers<[1], [0], [0], [1], [0, 0, 1, 1], [], []>} : vector<8x8xbf16>, vector<8x32xbf16>, vector<8x32xf32> -> vector<8x32xf32>
    %44 = vector.extract_strided_slice %23 {offsets = [0, 32], sizes = [8, 32], strides = [1, 1]} : vector<8x128xbf16> to vector<8x32xbf16>
    %45 = vector.extract_strided_slice %25 {offsets = [0, 32], sizes = [8, 32], strides = [1, 1]} : vector<8x128xbf16> to vector<8x32xbf16>
    %cst_18 = arith.constant dense<0.000000e+00> : vector<8x8xf32>
    %46 = tpu.matmul %44, %45, %cst_18 {dimension_numbers = #tpu.dot_dimension_numbers<[1], [1], [0], [0], [0, 0, 1, 0], [], []>} : vector<8x32xbf16>, vector<8x32xbf16>, vector<8x8xf32> -> vector<8x8xf32>
    %cst_19 = arith.constant dense<0xFF800000> : vector<8xf32>
    %47 = vector.multi_reduction <maximumf>, %46, %cst_19 [1] : vector<8x8xf32> to vector<8xf32>
    %48 = vector.shape_cast %47 : vector<8xf32> to vector<8x1xf32>
    %49 = vector.broadcast %48 : vector<8x1xf32> to vector<8x8xf32>
    %50 = arith.subf %46, %49 : vector<8x8xf32>
    %51 = math.exp %50 : vector<8x8xf32>
    %cst_20 = arith.constant dense<0.000000e+00> : vector<8xf32>
    %52 = vector.multi_reduction <add>, %51, %cst_20 [1] : vector<8x8xf32> to vector<8xf32>
    %53 = vector.shape_cast %52 : vector<8xf32> to vector<8x1xf32>
    %54 = tpu.reciprocal %53 {approx = true} : vector<8x1xf32> -> vector<8x1xf32>
    %55 = vector.broadcast %54 : vector<8x1xf32> to vector<8x8xf32>
    %56 = arith.mulf %51, %55 : vector<8x8xf32>
    %57 = arith.truncf %56 : vector<8x8xf32> to vector<8x8xbf16>
    %58 = vector.extract_strided_slice %27 {offsets = [0, 32], sizes = [8, 32], strides = [1, 1]} : vector<8x128xbf16> to vector<8x32xbf16>
    %cst_21 = arith.constant dense<0.000000e+00> : vector<8x32xf32>
    %59 = tpu.matmul %57, %58, %cst_21 {dimension_numbers = #tpu.dot_dimension_numbers<[1], [0], [0], [1], [0, 0, 1, 1], [], []>} : vector<8x8xbf16>, vector<8x32xbf16>, vector<8x32xf32> -> vector<8x32xf32>
    %60 = vector.extract_strided_slice %23 {offsets = [0, 64], sizes = [8, 32], strides = [1, 1]} : vector<8x128xbf16> to vector<8x32xbf16>
    %61 = vector.extract_strided_slice %25 {offsets = [0, 64], sizes = [8, 32], strides = [1, 1]} : vector<8x128xbf16> to vector<8x32xbf16>
    %cst_22 = arith.constant dense<0.000000e+00> : vector<8x8xf32>
    %62 = tpu.matmul %60, %61, %cst_22 {dimension_numbers = #tpu.dot_dimension_numbers<[1], [1], [0], [0], [0, 0, 1, 0], [], []>} : vector<8x32xbf16>, vector<8x32xbf16>, vector<8x8xf32> -> vector<8x8xf32>
    %cst_23 = arith.constant dense<0xFF800000> : vector<8xf32>
    %63 = vector.multi_reduction <maximumf>, %62, %cst_23 [1] : vector<8x8xf32> to vector<8xf32>
    %64 = vector.shape_cast %63 : vector<8xf32> to vector<8x1xf32>
    %65 = vector.broadcast %64 : vector<8x1xf32> to vector<8x8xf32>
    %66 = arith.subf %62, %65 : vector<8x8xf32>
    %67 = math.exp %66 : vector<8x8xf32>
    %cst_24 = arith.constant dense<0.000000e+00> : vector<8xf32>
    %68 = vector.multi_reduction <add>, %67, %cst_24 [1] : vector<8x8xf32> to vector<8xf32>
    %69 = vector.shape_cast %68 : vector<8xf32> to vector<8x1xf32>
    %70 = tpu.reciprocal %69 {approx = true} : vector<8x1xf32> -> vector<8x1xf32>
    %71 = vector.broadcast %70 : vector<8x1xf32> to vector<8x8xf32>
    %72 = arith.mulf %67, %71 : vector<8x8xf32>
    %73 = arith.truncf %72 : vector<8x8xf32> to vector<8x8xbf16>
    %74 = vector.extract_strided_slice %27 {offsets = [0, 64], sizes = [8, 32], strides = [1, 1]} : vector<8x128xbf16> to vector<8x32xbf16>
    %cst_25 = arith.constant dense<0.000000e+00> : vector<8x32xf32>
    %75 = tpu.matmul %73, %74, %cst_25 {dimension_numbers = #tpu.dot_dimension_numbers<[1], [0], [0], [1], [0, 0, 1, 1], [], []>} : vector<8x8xbf16>, vector<8x32xbf16>, vector<8x32xf32> -> vector<8x32xf32>
    %76 = vector.extract_strided_slice %23 {offsets = [0, 96], sizes = [8, 32], strides = [1, 1]} : vector<8x128xbf16> to vector<8x32xbf16>
    %77 = vector.extract_strided_slice %25 {offsets = [0, 96], sizes = [8, 32], strides = [1, 1]} : vector<8x128xbf16> to vector<8x32xbf16>
    %cst_26 = arith.constant dense<0.000000e+00> : vector<8x8xf32>
    %78 = tpu.matmul %76, %77, %cst_26 {dimension_numbers = #tpu.dot_dimension_numbers<[1], [1], [0], [0], [0, 0, 1, 0], [], []>} : vector<8x32xbf16>, vector<8x32xbf16>, vector<8x8xf32> -> vector<8x8xf32>
    %cst_27 = arith.constant dense<0xFF800000> : vector<8xf32>
    %79 = vector.multi_reduction <maximumf>, %78, %cst_27 [1] : vector<8x8xf32> to vector<8xf32>
    %80 = vector.shape_cast %79 : vector<8xf32> to vector<8x1xf32>
    %81 = vector.broadcast %80 : vector<8x1xf32> to vector<8x8xf32>
    %82 = arith.subf %78, %81 : vector<8x8xf32>
    %83 = math.exp %82 : vector<8x8xf32>
    %cst_28 = arith.constant dense<0.000000e+00> : vector<8xf32>
    %84 = vector.multi_reduction <add>, %83, %cst_28 [1] : vector<8x8xf32> to vector<8xf32>
    %85 = vector.shape_cast %84 : vector<8xf32> to vector<8x1xf32>
    %86 = tpu.reciprocal %85 {approx = true} : vector<8x1xf32> -> vector<8x1xf32>
    %87 = vector.broadcast %86 : vector<8x1xf32> to vector<8x8xf32>
    %88 = arith.mulf %83, %87 : vector<8x8xf32>
    %89 = arith.truncf %88 : vector<8x8xf32> to vector<8x8xbf16>
    %90 = vector.extract_strided_slice %27 {offsets = [0, 96], sizes = [8, 32], strides = [1, 1]} : vector<8x128xbf16> to vector<8x32xbf16>
    %cst_29 = arith.constant dense<0.000000e+00> : vector<8x32xf32>
    %91 = tpu.matmul %89, %90, %cst_29 {dimension_numbers = #tpu.dot_dimension_numbers<[1], [0], [0], [1], [0, 0, 1, 1], [], []>} : vector<8x8xbf16>, vector<8x32xbf16>, vector<8x32xf32> -> vector<8x32xf32>
    %92 = tpu.concatenate %43, %59, %75, %91 in 1 : vector<8x32xf32>, vector<8x32xf32>, vector<8x32xf32>, vector<8x32xf32> -> vector<8x128xf32>
    %93 = arith.truncf %92 : vector<8x128xf32> to vector<8x128xbf16>
    %c0_30 = arith.constant 0 : index
    %94 = arith.index_cast %21 : i32 to index
    %95 = vector.load %arg24[%c0_30, %94] : memref<8x128xbf16, #tpu.memory_space<vmem>>, vector<8x128xbf16>
    tpu.vector_store %arg24[%c0_30, %94], %93 {strides = array<i32>} : memref<8x128xbf16, #tpu.memory_space<vmem>>, vector<8x128xbf16>,
    %c1_i32 = arith.constant 1 : i32
    %c0_31 = arith.constant 0 : index
    %c0_32 = arith.constant 0 : index
    %96 = vector.load %arg24[%c0_31, %c0_32] : memref<8x128xbf16, #tpu.memory_space<vmem>>, vector<8x128xbf16>
    %c0_33 = arith.constant 0 : index
    %c0_34 = arith.constant 0 : index
    %97 = vector.load %arg11[%c0_33, %c0_34] : memref<128x128xbf16, #tpu.memory_space<vmem>>, vector<128x128xbf16>
    %cst_35 = arith.constant dense<0.000000e+00> : vector<8x128xf32>
    %98 = tpu.matmul %96, %97, %cst_35 {dimension_numbers = #tpu.dot_dimension_numbers<[1], [0], [0], [1], [0, 0, 1, 1], [], []>} : vector<8x128xbf16>, vector<128x128xbf16>, vector<8x128xf32> -> vector<8x128xf32>
    %c0_36 = arith.constant 0 : index
    %c0_37 = arith.constant 0 : index
    %99 = vector.load %arg12[%c0_36, %c0_37] : memref<1x128xf32, #tpu.memory_space<vmem>>, vector<1x128xf32>
    %100 = vector.broadcast %99 : vector<1x128xf32> to vector<8x128xf32>
    %101 = arith.addf %98, %100 : vector<8x128xf32>
    %102 = arith.addf %7, %101 : vector<8x128xf32>
    %c0_38 = arith.constant 0 : index
    %c0_39 = arith.constant 0 : index
    %103 = vector.load %arg13[%c0_38, %c0_39] : memref<1x128xf32, #tpu.memory_space<vmem>>, vector<1x128xf32>
    %c0_40 = arith.constant 0 : index
    %c0_41 = arith.constant 0 : index
    %104 = vector.load %arg14[%c0_40, %c0_41] : memref<1x128xf32, #tpu.memory_space<vmem>>, vector<1x128xf32>
    %cst_42 = arith.constant dense<0.000000e+00> : vector<8xf32>
    %105 = vector.multi_reduction <add>, %102, %cst_42 [1] : vector<8x128xf32> to vector<8xf32>
    %106 = vector.shape_cast %105 : vector<8xf32> to vector<8x1xf32>
    %cst_43 = arith.constant 1.280000e+02 : f32
    %107 = vector.broadcast %cst_43 : f32 to vector<8x1xf32>
    %108 = arith.divf %106, %107 : vector<8x1xf32>
    %109 = vector.broadcast %108 : vector<8x1xf32> to vector<8x128xf32>
    %110 = arith.subf %102, %109 : vector<8x128xf32>
    %111 = arith.mulf %110, %110 : vector<8x128xf32>
    %cst_44 = arith.constant dense<0.000000e+00> : vector<8xf32>
    %112 = vector.multi_reduction <add>, %111, %cst_44 [1] : vector<8x128xf32> to vector<8xf32>
    %113 = vector.shape_cast %112 : vector<8xf32> to vector<8x1xf32>
    %cst_45 = arith.constant 1.280000e+02 : f32
    %114 = vector.broadcast %cst_45 : f32 to vector<8x1xf32>
    %115 = arith.divf %113, %114 : vector<8x1xf32>
    %cst_46 = arith.constant 9.99999974E-6 : f32
    %116 = vector.broadcast %cst_46 : f32 to vector<8x1xf32>
    %117 = arith.addf %115, %116 : vector<8x1xf32>
    %118 = math.rsqrt %117 : vector<8x1xf32>
    %119 = vector.broadcast %118 : vector<8x1xf32> to vector<8x128xf32>
    %120 = arith.mulf %110, %119 : vector<8x128xf32>
    %121 = vector.broadcast %103 : vector<1x128xf32> to vector<8x128xf32>
    %122 = arith.mulf %120, %121 : vector<8x128xf32>
    %123 = vector.broadcast %104 : vector<1x128xf32> to vector<8x128xf32>
    %124 = arith.addf %122, %123 : vector<8x128xf32>
    %125 = arith.truncf %124 : vector<8x128xf32> to vector<8x128xbf16>
    %cst_47 = arith.constant 0.000000e+00 : f32
    %126 = vector.broadcast %cst_47 : f32 to vector<8x128xf32>
    %c0_i32_48 = arith.constant 0 : i32
    %c256_i32 = arith.constant 256 : i32
    %127 = arith.muli %c0_i32_48, %c256_i32 : i32
    %128 = tpu.assume_multiple %127, 256 : i32
    %c0_49 = arith.constant 0 : index
    %129 = arith.index_cast %128 : i32 to index
    %130 = vector.load %arg15[%c0_49, %129] : memref<128x256xbf16, #tpu.memory_space<vmem>>, vector<128x256xbf16>
    %cst_50 = arith.constant dense<0.000000e+00> : vector<8x256xf32>
    %131 = tpu.matmul %125, %130, %cst_50 {dimension_numbers = #tpu.dot_dimension_numbers<[1], [0], [0], [1], [0, 0, 1, 1], [], []>} : vector<8x128xbf16>, vector<128x256xbf16>, vector<8x256xf32> -> vector<8x256xf32>
    %c0_51 = arith.constant 0 : index
    %132 = arith.index_cast %128 : i32 to index
    %133 = vector.load %arg16[%c0_51, %132] : memref<1x256xf32, #tpu.memory_space<vmem>>, vector<1x256xf32>
    %134 = vector.broadcast %133 : vector<1x256xf32> to vector<8x256xf32>
    %135 = arith.addf %131, %134 : vector<8x256xf32>
    %cst_52 = arith.constant 1.702000e+00 : f32
    %136 = vector.broadcast %cst_52 : f32 to vector<8x256xf32>
    %137 = arith.mulf %136, %135 : vector<8x256xf32>
    %138 = arith.negf %137 : vector<8x256xf32>
    %139 = math.exp %138 : vector<8x256xf32>
    %cst_53 = arith.constant 1.000000e+00 : f32
    %140 = vector.broadcast %cst_53 : f32 to vector<8x256xf32>
    %141 = arith.addf %140, %139 : vector<8x256xf32>
    %142 = arith.divf %140, %141 : vector<8x256xf32>
    %143 = arith.mulf %135, %142 : vector<8x256xf32>
    %144 = arith.truncf %143 : vector<8x256xf32> to vector<8x256xbf16>
    %145 = arith.index_cast %128 : i32 to index
    %c0_54 = arith.constant 0 : index
    %146 = vector.load %arg17[%145, %c0_54] : memref<256x128xbf16, #tpu.memory_space<vmem>>, vector<256x128xbf16>
    %cst_55 = arith.constant dense<0.000000e+00> : vector<8x128xf32>
    %147 = tpu.matmul %144, %146, %cst_55 {dimension_numbers = #tpu.dot_dimension_numbers<[1], [0], [0], [1], [0, 0, 1, 1], [], []>} : vector<8x256xbf16>, vector<256x128xbf16>, vector<8x128xf32> -> vector<8x128xf32>
    %148 = arith.addf %126, %147 : vector<8x128xf32>
    %c1_i32_56 = arith.constant 1 : i32
    %149 = arith.addf %102, %148 : vector<8x128xf32>
    %c0_57 = arith.constant 0 : index
    %c0_58 = arith.constant 0 : index
    %150 = vector.load %arg18[%c0_57, %c0_58] : memref<1x128xf32, #tpu.memory_space<vmem>>, vector<1x128xf32>
    %151 = vector.broadcast %150 : vector<1x128xf32> to vector<8x128xf32>
    %152 = arith.addf %149, %151 : vector<8x128xf32>
    %c0_59 = arith.constant 0 : index
    %c0_60 = arith.constant 0 : index
    %c0_61 = arith.constant 0 : index
    %153 = vector.load %arg19[%c0_59, %c0_60, %c0_61] : memref<1x8x128xf32, #tpu.memory_space<vmem>>, vector<1x8x128xf32>
    %154 = vector.shape_cast %153 : vector<1x8x128xf32> to vector<8x128xf32>
    %155 = vector.shape_cast %152 : vector<8x128xf32> to vector<1x8x128xf32>
    tpu.vector_store %arg19[%c0_59, %c0_60, %c0_61], %155 {strides = array<i32>} : memref<1x8x128xf32, #tpu.memory_space<vmem>>, vector<1x8x128xf32>,
    return
  }
  func.func @transform_0(%arg0: i32, %arg1: i32) -> (i32, i32, i32) {
    %c0_i32 = arith.constant 0 : i32
    %c0_i32_0 = arith.constant 0 : i32
    %c0_i32_1 = arith.constant 0 : i32
    return %arg0, %c0_i32, %c0_i32_0 : i32, i32, i32
  }
  func.func @transform_1(%arg0: i32, %arg1: i32) -> (i32, i32) {
    %c0_i32 = arith.constant 0 : i32
    %c0_i32_0 = arith.constant 0 : i32
    %c0_i32_1 = arith.constant 0 : i32
    return %c0_i32, %c0_i32_0 : i32, i32
  }
  func.func @transform_2(%arg0: i32, %arg1: i32) -> (i32, i32) {
    %c0_i32 = arith.constant 0 : i32
    %c0_i32_0 = arith.constant 0 : i32
    %c0_i32_1 = arith.constant 0 : i32
    return %c0_i32, %c0_i32_0 : i32, i32
  }
  func.func @transform_3(%arg0: i32, %arg1: i32) -> (i32, i32) {
    %c0_i32 = arith.constant 0 : i32
    %c0_i32_0 = arith.constant 0 : i32
    %c0_i32_1 = arith.constant 0 : i32
    return %c0_i32, %c0_i32_0 : i32, i32
  }
  func.func @transform_4(%arg0: i32, %arg1: i32) -> (i32, i32) {
    %c0_i32 = arith.constant 0 : i32
    %c0_i32_0 = arith.constant 0 : i32
    %c0_i32_1 = arith.constant 0 : i32
    return %c0_i32, %c0_i32_0 : i32, i32
  }
  func.func @transform_5(%arg0: i32, %arg1: i32) -> (i32, i32) {
    %c0_i32 = arith.constant 0 : i32
    %c0_i32_0 = arith.constant 0 : i32
    %c0_i32_1 = arith.constant 0 : i32
    return %c0_i32, %c0_i32_0 : i32, i32
  }
  func.func @transform_6(%arg0: i32, %arg1: i32) -> (i32, i32) {
    %c0_i32 = arith.constant 0 : i32
    %c0_i32_0 = arith.constant 0 : i32
    %c0_i32_1 = arith.constant 0 : i32
    return %c0_i32, %c0_i32_0 : i32, i32
  }
  func.func @transform_7(%arg0: i32, %arg1: i32) -> (i32, i32) {
    %c0_i32 = arith.constant 0 : i32
    %c0_i32_0 = arith.constant 0 : i32
    %c0_i32_1 = arith.constant 0 : i32
    return %c0_i32, %c0_i32_0 : i32, i32
  }
  func.func @transform_8(%arg0: i32, %arg1: i32) -> (i32, i32) {
    %c0_i32 = arith.constant 0 : i32
    %c0_i32_0 = arith.constant 0 : i32
    %c0_i32_1 = arith.constant 0 : i32
    return %c0_i32, %c0_i32_0 : i32, i32
  }
  func.func @transform_9(%arg0: i32, %arg1: i32) -> (i32, i32) {
    %c0_i32 = arith.constant 0 : i32
    %c0_i32_0 = arith.constant 0 : i32
    %c0_i32_1 = arith.constant 0 : i32
    return %c0_i32, %c0_i32_0 : i32, i32
  }
  func.func @transform_10(%arg0: i32, %arg1: i32) -> (i32, i32) {
    %c0_i32 = arith.constant 0 : i32
    %c0_i32_0 = arith.constant 0 : i32
    %c0_i32_1 = arith.constant 0 : i32
    return %c0_i32, %c0_i32_0 : i32, i32
  }
  func.func @transform_11(%arg0: i32, %arg1: i32) -> (i32, i32) {
    %c0_i32 = arith.constant 0 : i32
    %c0_i32_0 = arith.constant 0 : i32
    %c0_i32_1 = arith.constant 0 : i32
    return %c0_i32, %c0_i32_0 : i32, i32
  }
  func.func @transform_12(%arg0: i32, %arg1: i32) -> (i32, i32) {
    %c0_i32 = arith.constant 0 : i32
    %c0_i32_0 = arith.constant 0 : i32
    %c0_i32_1 = arith.constant 0 : i32
    return %c0_i32, %c0_i32_0 : i32, i32
  }
  func.func @transform_13(%arg0: i32, %arg1: i32) -> (i32, i32) {
    %c0_i32 = arith.constant 0 : i32
    %c0_i32_0 = arith.constant 0 : i32
    %c0_i32_1 = arith.constant 0 : i32
    return %c0_i32, %c0_i32_0 : i32, i32
  }
  func.func @transform_14(%arg0: i32, %arg1: i32) -> (i32, i32) {
    %c0_i32 = arith.constant 0 : i32
    %c0_i32_0 = arith.constant 0 : i32
    %c0_i32_1 = arith.constant 0 : i32
    return %c0_i32, %c0_i32_0 : i32, i32
  }
  func.func @transform_15(%arg0: i32, %arg1: i32) -> (i32, i32) {
    %c0_i32 = arith.constant 0 : i32
    %c0_i32_0 = arith.constant 0 : i32
    %c0_i32_1 = arith.constant 0 : i32
    return %c0_i32, %c0_i32_0 : i32, i32
  }
  func.func @transform_16(%arg0: i32, %arg1: i32) -> (i32, i32) {
    %c0_i32 = arith.constant 0 : i32
    %c0_i32_0 = arith.constant 0 : i32
    %c0_i32_1 = arith.constant 0 : i32
    return %c0_i32, %c0_i32_0 : i32, i32
  }
  func.func @transform_17(%arg0: i32, %arg1: i32) -> (i32, i32, i32) {
    %c0_i32 = arith.constant 0 : i32
    %c0_i32_0 = arith.constant 0 : i32
    return %arg0, %arg1, %c0_i32 : i32, i32, i32
  }
}

module attributes {stable_mosaic.version = 11 : i64} {
  func.func @residual_attention_block_kernel(%arg0: i32, %arg1: i32, %arg2: memref<1x8x128xf32, #tpu.memory_space<vmem>>, %arg3: memref<1x128xf32, #tpu.memory_space<vmem>>, %arg4: memref<1x128xf32, #tpu.memory_space<vmem>>, %arg5: memref<128x128xbf16, #tpu.memory_space<vmem>>, %arg6: memref<1x128xf32, #tpu.memory_space<vmem>>, %arg7: memref<128x128xbf16, #tpu.memory_space<vmem>>, %arg8: memref<1x128xf32, #tpu.memory_space<vmem>>, %arg9: memref<128x128xbf16, #tpu.memory_space<vmem>>, %arg10: memref<1x128xf32, #tpu.memory_space<vmem>>, %arg11: memref<128x128xbf16, #tpu.memory_space<vmem>>, %arg12: memref<1x128xf32, #tpu.memory_space<vmem>>, %arg13: memref<1x128xf32, #tpu.memory_space<vmem>>, %arg14: memref<1x128xf32, #tpu.memory_space<vmem>>, %arg15: memref<128x256xbf16, #tpu.memory_space<vmem>>, %arg16: memref<1x256xf32, #tpu.memory_space<vmem>>, %arg17: memref<256x128xbf16, #tpu.memory_space<vmem>>, %arg18: memref<1x128xf32, #tpu.memory_space<vmem>>, %arg19: memref<1x8x128xf32, #tpu.memory_space<vmem>>, %arg20: memref<8x128xf32, #tpu.memory_space<vmem>>, %arg21: memref<8x128xbf16, #tpu.memory_space<vmem>>, %arg22: memref<8x128xbf16, #tpu.memory_space<vmem>>, %arg23: memref<8x128xbf16, #tpu.memory_space<vmem>>, %arg24: memref<8x128xbf16, #tpu.memory_space<vmem>>) attributes {dimension_semantics = [#tpu.dimension_semantics<parallel>, #tpu.dimension_semantics<arbitrary>], iteration_bounds = array<i64: 2, 1>, scalar_prefetch = 0 : i64, scratch_operands = 5 : i64, tpu.core_type = #tpu.core_type<tc>, window_params = [{transform_indices = @transform_0, window_bounds = array<i64: 1, 8, 128>}, {pipeline_mode = #tpu.pipeline_mode<synchronous>, transform_indices = @transform_1, window_bounds = array<i64: 1, 128>}, {pipeline_mode = #tpu.pipeline_mode<synchronous>, transform_indices = @transform_2, window_bounds = array<i64: 1, 128>}, {pipeline_mode = #tpu.pipeline_mode<synchronous>, transform_indices = @transform_3, window_bounds = array<i64: 128, 128>}, {pipeline_mode = #tpu.pipeline_mode<synchronous>, transform_indices = @transform_4, window_bounds = array<i64: 1, 128>}, {pipeline_mode = #tpu.pipeline_mode<synchronous>, transform_indices = @transform_5, window_bounds = array<i64: 128, 128>}, {pipeline_mode = #tpu.pipeline_mode<synchronous>, transform_indices = @transform_6, window_bounds = array<i64: 1, 128>}, {pipeline_mode = #tpu.pipeline_mode<synchronous>, transform_indices = @transform_7, window_bounds = array<i64: 128, 128>}, {pipeline_mode = #tpu.pipeline_mode<synchronous>, transform_indices = @transform_8, window_bounds = array<i64: 1, 128>}, {pipeline_mode = #tpu.pipeline_mode<synchronous>, transform_indices = @transform_9, window_bounds = array<i64: 128, 128>}, {pipeline_mode = #tpu.pipeline_mode<synchronous>, transform_indices = @transform_10, window_bounds = array<i64: 1, 128>}, {pipeline_mode = #tpu.pipeline_mode<synchronous>, transform_indices = @transform_11, window_bounds = array<i64: 1, 128>}, {pipeline_mode = #tpu.pipeline_mode<synchronous>, transform_indices = @transform_12, window_bounds = array<i64: 1, 128>}, {pipeline_mode = #tpu.pipeline_mode<synchronous>, transform_indices = @transform_13, window_bounds = array<i64: 128, 256>}, {pipeline_mode = #tpu.pipeline_mode<synchronous>, transform_indices = @transform_14, window_bounds = array<i64: 1, 256>}, {pipeline_mode = #tpu.pipeline_mode<synchronous>, transform_indices = @transform_15, window_bounds = array<i64: 256, 128>}, {pipeline_mode = #tpu.pipeline_mode<synchronous>, transform_indices = @transform_16, window_bounds = array<i64: 1, 128>}, {transform_indices = @transform_17, window_bounds = array<i64: 1, 8, 128>}]} {
    %c0_i32 = arith.constant 0 : i32
    %0 = arith.cmpi eq, %arg1, %c0_i32 : i32
    %1 = arith.extui %0 : i1 to i32
    %c0_i32_0 = arith.constant 0 : i32
    %2 = arith.cmpi ne, %1, %c0_i32_0 : i32
    scf.if %2 {
      %c0_62 = arith.constant 0 : index
      %c0_63 = arith.constant 0 : index
      %c0_64 = arith.constant 0 : index
      %156 = vector.load %arg2[%c0_62, %c0_63, %c0_64] : memref<1x8x128xf32, #tpu.memory_space<vmem>>, vector<1x8x128xf32>
      %157 = vector.shape_cast %156 : vector<1x8x128xf32> to vector<8x128xf32>
      %c0_65 = arith.constant 0 : index
      %c0_66 = arith.constant 0 : index
      %158 = vector.load %arg3[%c0_65, %c0_66] : memref<1x128xf32, #tpu.memory_space<vmem>>, vector<1x128xf32>
      %c0_67 = arith.constant 0 : index
      %c0_68 = arith.constant 0 : index
      %159 = vector.load %arg4[%c0_67, %c0_68] : memref<1x128xf32, #tpu.memory_space<vmem>>, vector<1x128xf32>
      %cst_69 = arith.constant dense<0.000000e+00> : vector<8xf32>
      %160 = vector.multi_reduction <add>, %157, %cst_69 [1] : vector<8x128xf32> to vector<8xf32>
      %161 = vector.shape_cast %160 : vector<8xf32> to vector<8x1xf32>
      %cst_70 = arith.constant 1.280000e+02 : f32
      %162 = vector.broadcast %cst_70 : f32 to vector<8x1xf32>
      %163 = arith.divf %161, %162 : vector<8x1xf32>
      %164 = vector.broadcast %163 : vector<8x1xf32> to vector<8x128xf32>
      %165 = arith.subf %157, %164 : vector<8x128xf32>
      %166 = arith.mulf %165, %165 : vector<8x128xf32>
      %cst_71 = arith.constant dense<0.000000e+00> : vector<8xf32>
      %167 = vector.multi_reduction <add>, %166, %cst_71 [1] : vector<8x128xf32> to vector<8xf32>
      %168 = vector.shape_cast %167 : vector<8xf32> to vector<8x1xf32>
      %cst_72 = arith.constant 1.280000e+02 : f32
      %169 = vector.broadcast %cst_72 : f32 to vector<8x1xf32>
      %170 = arith.divf %168, %169 : vector<8x1xf32>
      %cst_73 = arith.constant 9.99999974E-6 : f32
      %171 = vector.broadcast %cst_73 : f32 to vector<8x1xf32>
      %172 = arith.addf %170, %171 : vector<8x1xf32>
      %173 = math.rsqrt %172 : vector<8x1xf32>
      %174 = vector.broadcast %173 : vector<8x1xf32> to vector<8x128xf32>
      %175 = arith.mulf %165, %174 : vector<8x128xf32>
      %176 = vector.broadcast %158 : vector<1x128xf32> to vector<8x128xf32>
      %177 = arith.mulf %175, %176 : vector<8x128xf32>
      %178 = vector.broadcast %159 : vector<1x128xf32> to vector<8x128xf32>
      %179 = arith.addf %177, %178 : vector<8x128xf32>
      %c0_74 = arith.constant 0 : index
      %c0_75 = arith.constant 0 : index
      %180 = vector.load %arg20[%c0_74, %c0_75] : memref<8x128xf32, #tpu.memory_space<vmem>>, vector<8x128xf32>
      tpu.vector_store %arg20[%c0_74, %c0_75], %179 {strides = array<i32>} : memref<8x128xf32, #tpu.memory_space<vmem>>, vector<8x128xf32>,
      %181 = arith.truncf %179 : vector<8x128xf32> to vector<8x128xbf16>
      %c0_76 = arith.constant 0 : index
      %c0_77 = arith.constant 0 : index
      %182 = vector.load %arg7[%c0_76, %c0_77] : memref<128x128xbf16, #tpu.memory_space<vmem>>, vector<128x128xbf16>
      %cst_78 = arith.constant dense<0.000000e+00> : vector<8x128xf32>
      %183 = tpu.matmul %181, %182, %cst_78 {dimension_numbers = #tpu.dot_dimension_numbers<[1], [0], [0], [1], [0, 0, 1, 1], [], []>} : vector<8x128xbf16>, vector<128x128xbf16>, vector<8x128xf32> -> vector<8x128xf32>
      %c0_79 = arith.constant 0 : index
      %c0_80 = arith.constant 0 : index
      %184 = vector.load %arg8[%c0_79, %c0_80] : memref<1x128xf32, #tpu.memory_space<vmem>>, vector<1x128xf32>
      %185 = vector.broadcast %184 : vector<1x128xf32> to vector<8x128xf32>
      %186 = arith.addf %183, %185 : vector<8x128xf32>
      %187 = arith.truncf %186 : vector<8x128xf32> to vector<8x128xbf16>
      %c0_81 = arith.constant 0 : index
      %c0_82 = arith.constant 0 : index
      %188 = vector.load %arg21[%c0_81, %c0_82] : memref<8x128xbf16, #tpu.memory_space<vmem>>, vector<8x128xbf16>
      tpu.vector_store %arg21[%c0_81, %c0_82], %187 {strides = array<i32>} : memref<8x128xbf16, #tpu.memory_space<vmem>>, vector<8x128xbf16>,
      %c0_83 = arith.constant 0 : index
      %c0_84 = arith.constant 0 : index
      %189 = vector.load %arg9[%c0_83, %c0_84] : memref<128x128xbf16, #tpu.memory_space<vmem>>, vector<128x128xbf16>
      %cst_85 = arith.constant dense<0.000000e+00> : vector<8x128xf32>
      %190 = tpu.matmul %181, %189, %cst_85 {dimension_numbers = #tpu.dot_dimension_numbers<[1], [0], [0], [1], [0, 0, 1, 1], [], []>} : vector<8x128xbf16>, vector<128x128xbf16>, vector<8x128xf32> -> vector<8x128xf32>
      %c0_86 = arith.constant 0 : index
      %c0_87 = arith.constant 0 : index
      %191 = vector.load %arg10[%c0_86, %c0_87] : memref<1x128xf32, #tpu.memory_space<vmem>>, vector<1x128xf32>
      %192 = vector.broadcast %191 : vector<1x128xf32> to vector<8x128xf32>
      %193 = arith.addf %190, %192 : vector<8x128xf32>
      %194 = arith.truncf %193 : vector<8x128xf32> to vector<8x128xbf16>
      %c0_88 = arith.constant 0 : index
      %c0_89 = arith.constant 0 : index
      %195 = vector.load %arg22[%c0_88, %c0_89] : memref<8x128xbf16, #tpu.memory_space<vmem>>, vector<8x128xbf16>
      tpu.vector_store %arg22[%c0_88, %c0_89], %194 {strides = array<i32>} : memref<8x128xbf16, #tpu.memory_space<vmem>>, vector<8x128xbf16>,
    } else {
    }
    %c8_i32 = arith.constant 8 : i32
    %3 = arith.muli %arg1, %c8_i32 : i32
    %4 = tpu.assume_multiple %3, 8 : i32
    %c0 = arith.constant 0 : index
    %5 = arith.index_cast %4 : i32 to index
    %c0_1 = arith.constant 0 : index
    %6 = vector.load %arg2[%c0, %5, %c0_1] : memref<1x8x128xf32, #tpu.memory_space<vmem>>, vector<1x8x128xf32>
    %7 = vector.shape_cast %6 : vector<1x8x128xf32> to vector<8x128xf32>
    %8 = arith.index_cast %4 : i32 to index
    %c0_2 = arith.constant 0 : index
    %9 = vector.load %arg20[%8, %c0_2] : memref<8x128xf32, #tpu.memory_space<vmem>>, vector<8x128xf32>
    %10 = arith.truncf %9 : vector<8x128xf32> to vector<8x128xbf16>
    %c0_3 = arith.constant 0 : index
    %c0_4 = arith.constant 0 : index
    %11 = vector.load %arg5[%c0_3, %c0_4] : memref<128x128xbf16, #tpu.memory_space<vmem>>, vector<128x128xbf16>
    %cst = arith.constant dense<0.000000e+00> : vector<8x128xf32>
    %12 = tpu.matmul %10, %11, %cst {dimension_numbers = #tpu.dot_dimension_numbers<[1], [0], [0], [1], [0, 0, 1, 1], [], []>} : vector<8x128xbf16>, vector<128x128xbf16>, vector<8x128xf32> -> vector<8x128xf32>
    %c0_5 = arith.constant 0 : index
    %c0_6 = arith.constant 0 : index
    %13 = vector.load %arg6[%c0_5, %c0_6] : memref<1x128xf32, #tpu.memory_space<vmem>>, vector<1x128xf32>
    %14 = vector.broadcast %13 : vector<1x128xf32> to vector<8x128xf32>
    %15 = arith.addf %12, %14 : vector<8x128xf32>
    %cst_7 = arith.constant 0.176776692 : f32
    %16 = vector.broadcast %cst_7 : f32 to vector<8x128xf32>
    %17 = arith.mulf %15, %16 : vector<8x128xf32>
    %18 = arith.truncf %17 : vector<8x128xf32> to vector<8x128xbf16>
    %c0_8 = arith.constant 0 : index
    %c0_9 = arith.constant 0 : index
    %19 = vector.load %arg23[%c0_8, %c0_9] : memref<8x128xbf16, #tpu.memory_space<vmem>>, vector<8x128xbf16>
    tpu.vector_store %arg23[%c0_8, %c0_9], %18 {strides = array<i32>} : memref<8x128xbf16, #tpu.memory_space<vmem>>, vector<8x128xbf16>,
    %c0_i32_10 = arith.constant 0 : i32
    %c128_i32 = arith.constant 128 : i32
    %20 = arith.muli %c0_i32_10, %c128_i32 : i32
    %21 = tpu.assume_multiple %20, 128 : i32
    %c0_11 = arith.constant 0 : index
    %22 = arith.index_cast %21 : i32 to index
    %23 = vector.load %arg23[%c0_11, %22] : memref<8x128xbf16, #tpu.memory_space<vmem>>, vector<8x128xbf16>
    %c0_12 = arith.constant 0 : index
    %24 = arith.index_cast %21 : i32 to index
    %25 = vector.load %arg21[%c0_12, %24] : memref<8x128xbf16, #tpu.memory_space<vmem>>, vector<8x128xbf16>
    %c0_13 = arith.constant 0 : index
    %26 = arith.index_cast %21 : i32 to index
    %27 = vector.load %arg22[%c0_13, %26] : memref<8x128xbf16, #tpu.memory_space<vmem>>, vector<8x128xbf16>
    %28 = vector.extract_strided_slice %23 {offsets = [0, 0], sizes = [8, 32], strides = [1, 1]} : vector<8x128xbf16> to vector<8x32xbf16>
    %29 = vector.extract_strided_slice %25 {offsets = [0, 0], sizes = [8, 32], strides = [1, 1]} : vector<8x128xbf16> to vector<8x32xbf16>
    %cst_14 = arith.constant dense<0.000000e+00> : vector<8x8xf32>
    %30 = tpu.matmul %28, %29, %cst_14 {dimension_numbers = #tpu.dot_dimension_numbers<[1], [1], [0], [0], [0, 0, 1, 0], [], []>} : vector<8x32xbf16>, vector<8x32xbf16>, vector<8x8xf32> -> vector<8x8xf32>
    %cst_15 = arith.constant dense<0xFF800000> : vector<8xf32>
    %31 = vector.multi_reduction <maximumf>, %30, %cst_15 [1] : vector<8x8xf32> to vector<8xf32>
    %32 = vector.shape_cast %31 : vector<8xf32> to vector<8x1xf32>
    %33 = vector.broadcast %32 : vector<8x1xf32> to vector<8x8xf32>
    %34 = arith.subf %30, %33 : vector<8x8xf32>
    %35 = math.exp %34 : vector<8x8xf32>
    %cst_16 = arith.constant dense<0.000000e+00> : vector<8xf32>
    %36 = vector.multi_reduction <add>, %35, %cst_16 [1] : vector<8x8xf32> to vector<8xf32>
    %37 = vector.shape_cast %36 : vector<8xf32> to vector<8x1xf32>
    %38 = tpu.reciprocal %37 {approx = true} : vector<8x1xf32> -> vector<8x1xf32>
    %39 = vector.broadcast %38 : vector<8x1xf32> to vector<8x8xf32>
    %40 = arith.mulf %35, %39 : vector<8x8xf32>
    %41 = arith.truncf %40 : vector<8x8xf32> to vector<8x8xbf16>
    %42 = vector.extract_strided_slice %27 {offsets = [0, 0], sizes = [8, 32], strides = [1, 1]} : vector<8x128xbf16> to vector<8x32xbf16>
    %cst_17 = arith.constant dense<0.000000e+00> : vector<8x32xf32>
    %43 = tpu.matmul %41, %42, %cst_17 {dimension_numbers = #tpu.dot_dimension_numbers<[1], [0], [0], [1], [0, 0, 1, 1], [], []>} : vector<8x8xbf16>, vector<8x32xbf16>, vector<8x32xf32> -> vector<8x32xf32>
    %44 = vector.extract_strided_slice %23 {offsets = [0, 32], sizes = [8, 32], strides = [1, 1]} : vector<8x128xbf16> to vector<8x32xbf16>
    %45 = vector.extract_strided_slice %25 {offsets = [0, 32], sizes = [8, 32], strides = [1, 1]} : vector<8x128xbf16> to vector<8x32xbf16>
    %cst_18 = arith.constant dense<0.000000e+00> : vector<8x8xf32>
    %46 = tpu.matmul %44, %45, %cst_18 {dimension_numbers = #tpu.dot_dimension_numbers<[1], [1], [0], [0], [0, 0, 1, 0], [], []>} : vector<8x32xbf16>, vector<8x32xbf16>, vector<8x8xf32> -> vector<8x8xf32>
    %cst_19 = arith.constant dense<0xFF800000> : vector<8xf32>
    %47 = vector.multi_reduction <maximumf>, %46, %cst_19 [1] : vector<8x8xf32> to vector<8xf32>
    %48 = vector.shape_cast %47 : vector<8xf32> to vector<8x1xf32>
    %49 = vector.broadcast %48 : vector<8x1xf32> to vector<8x8xf32>
    %50 = arith.subf %46, %49 : vector<8x8xf32>
    %51 = math.exp %50 : vector<8x8xf32>
    %cst_20 = arith.constant dense<0.000000e+00> : vector<8xf32>
    %52 = vector.multi_reduction <add>, %51, %cst_20 [1] : vector<8x8xf32> to vector<8xf32>
    %53 = vector.shape_cast %52 : vector<8xf32> to vector<8x1xf32>
    %54 = tpu.reciprocal %53 {approx = true} : vector<8x1xf32> -> vector<8x1xf32>
    %55 = vector.broadcast %54 : vector<8x1xf32> to vector<8x8xf32>
    %56 = arith.mulf %51, %55 : vector<8x8xf32>
    %57 = arith.truncf %56 : vector<8x8xf32> to vector<8x8xbf16>
    %58 = vector.extract_strided_slice %27 {offsets = [0, 32], sizes = [8, 32], strides = [1, 1]} : vector<8x128xbf16> to vector<8x32xbf16>
    %cst_21 = arith.constant dense<0.000000e+00> : vector<8x32xf32>
    %59 = tpu.matmul %57, %58, %cst_21 {dimension_numbers = #tpu.dot_dimension_numbers<[1], [0], [0], [1], [0, 0, 1, 1], [], []>} : vector<8x8xbf16>, vector<8x32xbf16>, vector<8x32xf32> -> vector<8x32xf32>
    %60 = vector.extract_strided_slice %23 {offsets = [0, 64], sizes = [8, 32], strides = [1, 1]} : vector<8x128xbf16> to vector<8x32xbf16>
    %61 = vector.extract_strided_slice %25 {offsets = [0, 64], sizes = [8, 32], strides = [1, 1]} : vector<8x128xbf16> to vector<8x32xbf16>
    %cst_22 = arith.constant dense<0.000000e+00> : vector<8x8xf32>
    %62 = tpu.matmul %60, %61, %cst_22 {dimension_numbers = #tpu.dot_dimension_numbers<[1], [1], [0], [0], [0, 0, 1, 0], [], []>} : vector<8x32xbf16>, vector<8x32xbf16>, vector<8x8xf32> -> vector<8x8xf32>
    %cst_23 = arith.constant dense<0xFF800000> : vector<8xf32>
    %63 = vector.multi_reduction <maximumf>, %62, %cst_23 [1] : vector<8x8xf32> to vector<8xf32>
    %64 = vector.shape_cast %63 : vector<8xf32> to vector<8x1xf32>
    %65 = vector.broadcast %64 : vector<8x1xf32> to vector<8x8xf32>
    %66 = arith.subf %62, %65 : vector<8x8xf32>
    %67 = math.exp %66 : vector<8x8xf32>
    %cst_24 = arith.constant dense<0.000000e+00> : vector<8xf32>
    %68 = vector.multi_reduction <add>, %67, %cst_24 [1] : vector<8x8xf32> to vector<8xf32>
    %69 = vector.shape_cast %68 : vector<8xf32> to vector<8x1xf32>
    %70 = tpu.reciprocal %69 {approx = true} : vector<8x1xf32> -> vector<8x1xf32>
    %71 = vector.broadcast %70 : vector<8x1xf32> to vector<8x8xf32>
    %72 = arith.mulf %67, %71 : vector<8x8xf32>
    %73 = arith.truncf %72 : vector<8x8xf32> to vector<8x8xbf16>
    %74 = vector.extract_strided_slice %27 {offsets = [0, 64], sizes = [8, 32], strides = [1, 1]} : vector<8x128xbf16> to vector<8x32xbf16>
    %cst_25 = arith.constant dense<0.000000e+00> : vector<8x32xf32>
    %75 = tpu.matmul %73, %74, %cst_25 {dimension_numbers = #tpu.dot_dimension_numbers<[1], [0], [0], [1], [0, 0, 1, 1], [], []>} : vector<8x8xbf16>, vector<8x32xbf16>, vector<8x32xf32> -> vector<8x32xf32>
    %76 = vector.extract_strided_slice %23 {offsets = [0, 96], sizes = [8, 32], strides = [1, 1]} : vector<8x128xbf16> to vector<8x32xbf16>
    %77 = vector.extract_strided_slice %25 {offsets = [0, 96], sizes = [8, 32], strides = [1, 1]} : vector<8x128xbf16> to vector<8x32xbf16>
    %cst_26 = arith.constant dense<0.000000e+00> : vector<8x8xf32>
    %78 = tpu.matmul %76, %77, %cst_26 {dimension_numbers = #tpu.dot_dimension_numbers<[1], [1], [0], [0], [0, 0, 1, 0], [], []>} : vector<8x32xbf16>, vector<8x32xbf16>, vector<8x8xf32> -> vector<8x8xf32>
    %cst_27 = arith.constant dense<0xFF800000> : vector<8xf32>
    %79 = vector.multi_reduction <maximumf>, %78, %cst_27 [1] : vector<8x8xf32> to vector<8xf32>
    %80 = vector.shape_cast %79 : vector<8xf32> to vector<8x1xf32>
    %81 = vector.broadcast %80 : vector<8x1xf32> to vector<8x8xf32>
    %82 = arith.subf %78, %81 : vector<8x8xf32>
    %83 = math.exp %82 : vector<8x8xf32>
    %cst_28 = arith.constant dense<0.000000e+00> : vector<8xf32>
    %84 = vector.multi_reduction <add>, %83, %cst_28 [1] : vector<8x8xf32> to vector<8xf32>
    %85 = vector.shape_cast %84 : vector<8xf32> to vector<8x1xf32>
    %86 = tpu.reciprocal %85 {approx = true} : vector<8x1xf32> -> vector<8x1xf32>
    %87 = vector.broadcast %86 : vector<8x1xf32> to vector<8x8xf32>
    %88 = arith.mulf %83, %87 : vector<8x8xf32>
    %89 = arith.truncf %88 : vector<8x8xf32> to vector<8x8xbf16>
    %90 = vector.extract_strided_slice %27 {offsets = [0, 96], sizes = [8, 32], strides = [1, 1]} : vector<8x128xbf16> to vector<8x32xbf16>
    %cst_29 = arith.constant dense<0.000000e+00> : vector<8x32xf32>
    %91 = tpu.matmul %89, %90, %cst_29 {dimension_numbers = #tpu.dot_dimension_numbers<[1], [0], [0], [1], [0, 0, 1, 1], [], []>} : vector<8x8xbf16>, vector<8x32xbf16>, vector<8x32xf32> -> vector<8x32xf32>
    %92 = tpu.concatenate %43, %59, %75, %91 in 1 : vector<8x32xf32>, vector<8x32xf32>, vector<8x32xf32>, vector<8x32xf32> -> vector<8x128xf32>
    %93 = arith.truncf %92 : vector<8x128xf32> to vector<8x128xbf16>
    %c0_30 = arith.constant 0 : index
    %94 = arith.index_cast %21 : i32 to index
    %95 = vector.load %arg24[%c0_30, %94] : memref<8x128xbf16, #tpu.memory_space<vmem>>, vector<8x128xbf16>
    tpu.vector_store %arg24[%c0_30, %94], %93 {strides = array<i32>} : memref<8x128xbf16, #tpu.memory_space<vmem>>, vector<8x128xbf16>,
    %c1_i32 = arith.constant 1 : i32
    %c0_31 = arith.constant 0 : index
    %c0_32 = arith.constant 0 : index
    %96 = vector.load %arg24[%c0_31, %c0_32] : memref<8x128xbf16, #tpu.memory_space<vmem>>, vector<8x128xbf16>
    %c0_33 = arith.constant 0 : index
    %c0_34 = arith.constant 0 : index
    %97 = vector.load %arg11[%c0_33, %c0_34] : memref<128x128xbf16, #tpu.memory_space<vmem>>, vector<128x128xbf16>
    %cst_35 = arith.constant dense<0.000000e+00> : vector<8x128xf32>
    %98 = tpu.matmul %96, %97, %cst_35 {dimension_numbers = #tpu.dot_dimension_numbers<[1], [0], [0], [1], [0, 0, 1, 1], [], []>} : vector<8x128xbf16>, vector<128x128xbf16>, vector<8x128xf32> -> vector<8x128xf32>
    %c0_36 = arith.constant 0 : index
    %c0_37 = arith.constant 0 : index
    %99 = vector.load %arg12[%c0_36, %c0_37] : memref<1x128xf32, #tpu.memory_space<vmem>>, vector<1x128xf32>
    %100 = vector.broadcast %99 : vector<1x128xf32> to vector<8x128xf32>
    %101 = arith.addf %98, %100 : vector<8x128xf32>
    %102 = arith.addf %7, %101 : vector<8x128xf32>
    %c0_38 = arith.constant 0 : index
    %c0_39 = arith.constant 0 : index
    %103 = vector.load %arg13[%c0_38, %c0_39] : memref<1x128xf32, #tpu.memory_space<vmem>>, vector<1x128xf32>
    %c0_40 = arith.constant 0 : index
    %c0_41 = arith.constant 0 : index
    %104 = vector.load %arg14[%c0_40, %c0_41] : memref<1x128xf32, #tpu.memory_space<vmem>>, vector<1x128xf32>
    %cst_42 = arith.constant dense<0.000000e+00> : vector<8xf32>
    %105 = vector.multi_reduction <add>, %102, %cst_42 [1] : vector<8x128xf32> to vector<8xf32>
    %106 = vector.shape_cast %105 : vector<8xf32> to vector<8x1xf32>
    %cst_43 = arith.constant 1.280000e+02 : f32
    %107 = vector.broadcast %cst_43 : f32 to vector<8x1xf32>
    %108 = arith.divf %106, %107 : vector<8x1xf32>
    %109 = vector.broadcast %108 : vector<8x1xf32> to vector<8x128xf32>
    %110 = arith.subf %102, %109 : vector<8x128xf32>
    %111 = arith.mulf %110, %110 : vector<8x128xf32>
    %cst_44 = arith.constant dense<0.000000e+00> : vector<8xf32>
    %112 = vector.multi_reduction <add>, %111, %cst_44 [1] : vector<8x128xf32> to vector<8xf32>
    %113 = vector.shape_cast %112 : vector<8xf32> to vector<8x1xf32>
    %cst_45 = arith.constant 1.280000e+02 : f32
    %114 = vector.broadcast %cst_45 : f32 to vector<8x1xf32>
    %115 = arith.divf %113, %114 : vector<8x1xf32>
    %cst_46 = arith.constant 9.99999974E-6 : f32
    %116 = vector.broadcast %cst_46 : f32 to vector<8x1xf32>
    %117 = arith.addf %115, %116 : vector<8x1xf32>
    %118 = math.rsqrt %117 : vector<8x1xf32>
    %119 = vector.broadcast %118 : vector<8x1xf32> to vector<8x128xf32>
    %120 = arith.mulf %110, %119 : vector<8x128xf32>
    %121 = vector.broadcast %103 : vector<1x128xf32> to vector<8x128xf32>
    %122 = arith.mulf %120, %121 : vector<8x128xf32>
    %123 = vector.broadcast %104 : vector<1x128xf32> to vector<8x128xf32>
    %124 = arith.addf %122, %123 : vector<8x128xf32>
    %125 = arith.truncf %124 : vector<8x128xf32> to vector<8x128xbf16>
    %cst_47 = arith.constant 0.000000e+00 : f32
    %126 = vector.broadcast %cst_47 : f32 to vector<8x128xf32>
    %c0_i32_48 = arith.constant 0 : i32
    %c256_i32 = arith.constant 256 : i32
    %127 = arith.muli %c0_i32_48, %c256_i32 : i32
    %128 = tpu.assume_multiple %127, 256 : i32
    %c0_49 = arith.constant 0 : index
    %129 = arith.index_cast %128 : i32 to index
    %130 = vector.load %arg15[%c0_49, %129] : memref<128x256xbf16, #tpu.memory_space<vmem>>, vector<128x256xbf16>
    %cst_50 = arith.constant dense<0.000000e+00> : vector<8x256xf32>
    %131 = tpu.matmul %125, %130, %cst_50 {dimension_numbers = #tpu.dot_dimension_numbers<[1], [0], [0], [1], [0, 0, 1, 1], [], []>} : vector<8x128xbf16>, vector<128x256xbf16>, vector<8x256xf32> -> vector<8x256xf32>
    %c0_51 = arith.constant 0 : index
    %132 = arith.index_cast %128 : i32 to index
    %133 = vector.load %arg16[%c0_51, %132] : memref<1x256xf32, #tpu.memory_space<vmem>>, vector<1x256xf32>
    %134 = vector.broadcast %133 : vector<1x256xf32> to vector<8x256xf32>
    %135 = arith.addf %131, %134 : vector<8x256xf32>
    %cst_52 = arith.constant 1.702000e+00 : f32
    %136 = vector.broadcast %cst_52 : f32 to vector<8x256xf32>
    %137 = arith.mulf %136, %135 : vector<8x256xf32>
    %138 = arith.negf %137 : vector<8x256xf32>
    %139 = math.exp %138 : vector<8x256xf32>
    %cst_53 = arith.constant 1.000000e+00 : f32
    %140 = vector.broadcast %cst_53 : f32 to vector<8x256xf32>
    %141 = arith.addf %140, %139 : vector<8x256xf32>
    %142 = arith.divf %140, %141 : vector<8x256xf32>
    %143 = arith.mulf %135, %142 : vector<8x256xf32>
    %144 = arith.truncf %143 : vector<8x256xf32> to vector<8x256xbf16>
    %145 = arith.index_cast %128 : i32 to index
    %c0_54 = arith.constant 0 : index
    %146 = vector.load %arg17[%145, %c0_54] : memref<256x128xbf16, #tpu.memory_space<vmem>>, vector<256x128xbf16>
    %cst_55 = arith.constant dense<0.000000e+00> : vector<8x128xf32>
    %147 = tpu.matmul %144, %146, %cst_55 {dimension_numbers = #tpu.dot_dimension_numbers<[1], [0], [0], [1], [0, 0, 1, 1], [], []>} : vector<8x256xbf16>, vector<256x128xbf16>, vector<8x128xf32> -> vector<8x128xf32>
    %148 = arith.addf %126, %147 : vector<8x128xf32>
    %c1_i32_56 = arith.constant 1 : i32
    %149 = arith.addf %102, %148 : vector<8x128xf32>
    %c0_57 = arith.constant 0 : index
    %c0_58 = arith.constant 0 : index
    %150 = vector.load %arg18[%c0_57, %c0_58] : memref<1x128xf32, #tpu.memory_space<vmem>>, vector<1x128xf32>
    %151 = vector.broadcast %150 : vector<1x128xf32> to vector<8x128xf32>
    %152 = arith.addf %149, %151 : vector<8x128xf32>
    %c0_59 = arith.constant 0 : index
    %c0_60 = arith.constant 0 : index
    %c0_61 = arith.constant 0 : index
    %153 = vector.load %arg19[%c0_59, %c0_60, %c0_61] : memref<1x8x128xf32, #tpu.memory_space<vmem>>, vector<1x8x128xf32>
    %154 = vector.shape_cast %153 : vector<1x8x128xf32> to vector<8x128xf32>
    %155 = vector.shape_cast %152 : vector<8x128xf32> to vector<1x8x128xf32>
    tpu.vector_store %arg19[%c0_59, %c0_60, %c0_61], %155 {strides = array<i32>} : memref<1x8x128xf32, #tpu.memory_space<vmem>>, vector<1x8x128xf32>,
    return
  }
  func.func @transform_0(%arg0: i32, %arg1: i32) -> (i32, i32, i32) {
    %c0_i32 = arith.constant 0 : i32
    %c0_i32_0 = arith.constant 0 : i32
    %c0_i32_1 = arith.constant 0 : i32
    return %arg0, %c0_i32, %c0_i32_0 : i32, i32, i32
  }
  func.func @transform_1(%arg0: i32, %arg1: i32) -> (i32, i32) {
    %c0_i32 = arith.constant 0 : i32
    %c0_i32_0 = arith.constant 0 : i32
    %c0_i32_1 = arith.constant 0 : i32
    return %c0_i32, %c0_i32_0 : i32, i32
  }
  func.func @transform_2(%arg0: i32, %arg1: i32) -> (i32, i32) {
    %c0_i32 = arith.constant 0 : i32
    %c0_i32_0 = arith.constant 0 : i32
    %c0_i32_1 = arith.constant 0 : i32
    return %c0_i32, %c0_i32_0 : i32, i32
  }
  func.func @transform_3(%arg0: i32, %arg1: i32) -> (i32, i32) {
    %c0_i32 = arith.constant 0 : i32
    %c0_i32_0 = arith.constant 0 : i32
    %c0_i32_1 = arith.constant 0 : i32
    return %c0_i32, %c0_i32_0 : i32, i32
  }
  func.func @transform_4(%arg0: i32, %arg1: i32) -> (i32, i32) {
    %c0_i32 = arith.constant 0 : i32
    %c0_i32_0 = arith.constant 0 : i32
    %c0_i32_1 = arith.constant 0 : i32
    return %c0_i32, %c0_i32_0 : i32, i32
  }
  func.func @transform_5(%arg0: i32, %arg1: i32) -> (i32, i32) {
    %c0_i32 = arith.constant 0 : i32
    %c0_i32_0 = arith.constant 0 : i32
    %c0_i32_1 = arith.constant 0 : i32
    return %c0_i32, %c0_i32_0 : i32, i32
  }
  func.func @transform_6(%arg0: i32, %arg1: i32) -> (i32, i32) {
    %c0_i32 = arith.constant 0 : i32
    %c0_i32_0 = arith.constant 0 : i32
    %c0_i32_1 = arith.constant 0 : i32
    return %c0_i32, %c0_i32_0 : i32, i32
  }
  func.func @transform_7(%arg0: i32, %arg1: i32) -> (i32, i32) {
    %c0_i32 = arith.constant 0 : i32
    %c0_i32_0 = arith.constant 0 : i32
    %c0_i32_1 = arith.constant 0 : i32
    return %c0_i32, %c0_i32_0 : i32, i32
  }
  func.func @transform_8(%arg0: i32, %arg1: i32) -> (i32, i32) {
    %c0_i32 = arith.constant 0 : i32
    %c0_i32_0 = arith.constant 0 : i32
    %c0_i32_1 = arith.constant 0 : i32
    return %c0_i32, %c0_i32_0 : i32, i32
  }
  func.func @transform_9(%arg0: i32, %arg1: i32) -> (i32, i32) {
    %c0_i32 = arith.constant 0 : i32
    %c0_i32_0 = arith.constant 0 : i32
    %c0_i32_1 = arith.constant 0 : i32
    return %c0_i32, %c0_i32_0 : i32, i32
  }
  func.func @transform_10(%arg0: i32, %arg1: i32) -> (i32, i32) {
    %c0_i32 = arith.constant 0 : i32
    %c0_i32_0 = arith.constant 0 : i32
    %c0_i32_1 = arith.constant 0 : i32
    return %c0_i32, %c0_i32_0 : i32, i32
  }
  func.func @transform_11(%arg0: i32, %arg1: i32) -> (i32, i32) {
    %c0_i32 = arith.constant 0 : i32
    %c0_i32_0 = arith.constant 0 : i32
    %c0_i32_1 = arith.constant 0 : i32
    return %c0_i32, %c0_i32_0 : i32, i32
  }
  func.func @transform_12(%arg0: i32, %arg1: i32) -> (i32, i32) {
    %c0_i32 = arith.constant 0 : i32
    %c0_i32_0 = arith.constant 0 : i32
    %c0_i32_1 = arith.constant 0 : i32
    return %c0_i32, %c0_i32_0 : i32, i32
  }
  func.func @transform_13(%arg0: i32, %arg1: i32) -> (i32, i32) {
    %c0_i32 = arith.constant 0 : i32
    %c0_i32_0 = arith.constant 0 : i32
    %c0_i32_1 = arith.constant 0 : i32
    return %c0_i32, %c0_i32_0 : i32, i32
  }
  func.func @transform_14(%arg0: i32, %arg1: i32) -> (i32, i32) {
    %c0_i32 = arith.constant 0 : i32
    %c0_i32_0 = arith.constant 0 : i32
    %c0_i32_1 = arith.constant 0 : i32
    return %c0_i32, %c0_i32_0 : i32, i32
  }
  func.func @transform_15(%arg0: i32, %arg1: i32) -> (i32, i32) {
    %c0_i32 = arith.constant 0 : i32
    %c0_i32_0 = arith.constant 0 : i32
    %c0_i32_1 = arith.constant 0 : i32
    return %c0_i32, %c0_i32_0 : i32, i32
  }
  func.func @transform_16(%arg0: i32, %arg1: i32) -> (i32, i32) {
    %c0_i32 = arith.constant 0 : i32
    %c0_i32_0 = arith.constant 0 : i32
    %c0_i32_1 = arith.constant 0 : i32
    return %c0_i32, %c0_i32_0 : i32, i32
  }
  func.func @transform_17(%arg0: i32, %arg1: i32) -> (i32, i32, i32) {
    %c0_i32 = arith.constant 0 : i32
    %c0_i32_0 = arith.constant 0 : i32
    return %arg0, %arg1, %c0_i32 : i32, i32, i32
  }
}

</mosaic_0001>

<bundles_post_ra>
// kernel: tpu_custom_call.1
= control target key start
LH: loop header
LB: loop body
LE: loop exit
PB: predicated region body
PF: predicated region fallthrough
CT: control target
= control target key end

     0   :  { %s3621_s0 = inlined_call_operand.hbm [shape: f32[2,8,128], index: 0, kind: input, shape index: {}]   ;;  %s3622_s1 = inlined_call_operand.vmem [shape: f32[1,128], index: 1, kind: input, shape index: {}]   ;;  %s3623_s2 = inlined_call_operand.vmem [shape: f32[1,128], index: 2, kind: input, shape index: {}]   ;;  %s3624_s3 = inlined_call_operand.hbm [shape: bf16[128,128], index: 3, kind: input, shape index: {}]   ;;  %s3625_s4 = inlined_call_operand.vmem [shape: f32[1,128], index: 4, kind: input, shape index: {}]   ;;  %s3626_s5 = inlined_call_operand.hbm [shape: bf16[128,128], index: 5, kind: input, shape index: {}]   ;;  %s3627_s6 = inlined_call_operand.vmem [shape: f32[1,128], index: 6, kind: input, shape index: {}]   ;;  %s3628_s7 = inlined_call_operand.hbm [shape: bf16[128,128], index: 7, kind: input, shape index: {}]   ;;  %s3629_s8 = inlined_call_operand.vmem [shape: f32[1,128], index: 8, kind: input, shape index: {}]   ;;  %s3630_s9 = inlined_call_operand.hbm [shape: bf16[128,128], index: 9, kind: input, shape index: {}]   ;;  %s3631_s10 = inlined_call_operand.vmem [shape: f32[1,128], index: 10, kind: input, shape index: {}]   ;;  %s3632_s11 = inlined_call_operand.vmem [shape: f32[1,128], index: 11, kind: input, shape index: {}]   ;;  %s3633_s12 = inlined_call_operand.vmem [shape: f32[1,128], index: 12, kind: input, shape index: {}]   ;;  %s3634_s13 = inlined_call_operand.hbm [shape: bf16[128,256], index: 13, kind: input, shape index: {}]   ;;  %s3635_s14 = inlined_call_operand.vmem [shape: f32[1,256], index: 14, kind: input, shape index: {}]   ;;  %s3636_s15 = inlined_call_operand.hbm [shape: bf16[256,128], index: 15, kind: input, shape index: {}]   ;;  %s3637_s16 = inlined_call_operand.vmem [shape: f32[1,128], index: 16, kind: input, shape index: {}]   ;;  %s3638_s17 = inlined_call_operand.hbm [shape: f32[2,8,128], index: 17, kind: output, shape index: {}]  }
   0x1   :  { %3650 = sst [smem:[#allocation26_spill]] %s3621_s0 }
   0x2   :  { %3651 = sst [smem:[#allocation27_spill]] %s3622_s1 }
   0x3   :  { %3652 = sst [smem:[#allocation28_spill]] %s3624_s3 }
   0x4   :  { %3653 = sst [smem:[#allocation29_spill]] %s3625_s4 }
   0x5   :  { %3654 = sst [smem:[#allocation30_spill]] %s3628_s7 }
   0x6   :  { %3655 = sst [smem:[#allocation31_spill]] %s3629_s8 }
   0x7   :  { %3656 = sst [smem:[#allocation32_spill]] %s3631_s10 }
   0x8   :  { %3657 = sst [smem:[#allocation33_spill]] %s3632_s11 }
   0x9   :  { %3658 = sst [smem:[#allocation34_spill]] %s3633_s12 }
   0xa   :  { %3659 = sst [smem:[#allocation35_spill]] %s3635_s14 }
   0xb   :  { %3660 = sst [smem:[#allocation36_spill]] %s3637_s16 }
   0xc   :  { %3661 = sst [smem:[#allocation37_spill]] %s3638_s17 }
   0xd   :  { %22 = vsyncpa [#allocation8], 0 }
   0xe   :  { %24 = vsyncpa [#allocation8 + $0x1], 0 }
   0xf   :  { %25 = vsyncpa [#allocation11], 0 }
  0x10   :  { %26 = vsyncpa [#allocation14], 0 }
  0x11   :  { %27 = vsyncpa [#allocation17], 0 }
  0x12   :  { %28 = vsyncpa [#allocation9], 0 }
  0x13   :  { %30 = vsyncpa [#allocation9 + $0x1], 0  ;;  %s3108_s24 = smov 0   ;;  %s3110_s25 = smov 0  }
  0x14   :  { %s3112_s26 = smov 0   ;;  %s3114_s27 = smov 0  }
  0x15   :  { %s3116_s28 = smov 0   ;;  %s3118_s29 = smov 0  }
  0x16 LB: > { %3662 = sst [smem:[#allocation25_spill]] %s2990_s27  ;;  %s3640_s0 = sadd.s32 4294967295, %s2998_s29   ;;  %s2998_s29 = sphi %s3118_s29, %s36_s29   ;;  %s2994_s28 = sphi %s3116_s28, %s3698_s28   ;;  %s2990_s27 = sphi %s3114_s27, %s3697_s27   ;;  %s2986_s26 = sphi %s3112_s26, %s3696_s26   ;;  %s2982_s25 = sphi %s3110_s25, %s3695_s25   ;;  %s2978_s24 = sphi %s3108_s24, %s3694_s24  }
  0x17   : > { %p2159_p0 = scmp.ge.s32.totalorder %s2998_s29, 1  ;;  %p3142_p1 = scmp.eq.s32.totalorder %s3640_s0, 0 }
  0x18   : > { %p443_p2 = scmp.lt.s32.totalorder %s2998_s29, 3  ;;  %s3000_s19 = smov [#allocation10]  }
  0x19   : > { %s3663_s30 = scalar_select %p3142_p1, 1, 0 }
  0x1a   : > { %p3147_p3 = pnand %p2159_p0, %p443_p2  ;;  %s461_s1 = sshll.u32 %s3000_s19, 4  ;;  %s3151_s1 = int_to_ptr.vmem [resolvable:$true] %s461_s1 }
  0x1b   : > { %s3001_s21 = smov [#allocation13]   ;;  %s3002_s23 = smov [#allocation16]  }
  0x1c   : > { %s3664_s18 = scalar_select %p3147_p3, 1, 0 }
  0x1d   : > { %p2498_p4 = pneg %p3147_p3  ;;  %s493_s22 = sshll.u32 %s3001_s21, 4  ;;  %s3162_s22 = int_to_ptr.vmem [resolvable:$true] %s493_s22 }
  0x1e   : > { %s3164_s0 = sshll.u32 %s3002_s23, 4  ;;  %s3666_s3 = sld [smem:[#allocation28_spill]]  ;;  %s532_s0 = int_to_ptr.vmem [resolvable:$true] %s3164_s0 }
  0x1f   : > { %p3158_p6 = pnand %p2498_p4, %p3142_p1 }
  0x21   : > { %p3174_p8 = pneg %p3158_p6 }
  0x24   : > { %s2706_s16 = scalar_lea.hbm %s3666_s3, 1024 }
  0x25   : > { %p2707_p7 = scmp.ne.s32.totalorder %s3666_s3, %s2706_s16  ;;  %p2713_p11 = scmp.lt.u32.totalorder %s2706_s16, %s3666_s3 }
  0x27   : > { %p2709_p9 = pnand %p3174_p8, %p2707_p7 }
  0x29   : > { %p2710_p10 = pneg %p2709_p9 }
  0x2b   : > { %p2715_p12 = pnand %p2713_p11, %p2710_p10 }
  0x2d   : > { %2718 = shalt.err (!%p2715_p12)
}
  0x2e   : > { %s2719_s14 = scalar_lea.vmem %s3151_s1, 1024  ;;  %p2727_p4 = scmp.lt.s32.totalorder %s3151_s1, %s3151_s1 }
  0x2f   : > { %p2720_p13 = scmp.ne.s32.totalorder %s3151_s1, %s2719_s14  ;;  %p2728_p5 = scmp.lt.s32.totalorder %s2719_s14, %s2719_s14 }
  0x31   : > { %p2722_p0 = pnand %p2720_p13, %p3174_p8  ;;  %p2729_p7 = por %p2728_p5, %p2727_p4 }
  0x33   : > { %p2723_p2 = pneg %p2722_p0 }
  0x35   : > { %p2730_p9 = pnand %p2729_p7, %p2723_p2 }
  0x37   : > { %2733 = shalt.err (!%p2730_p9)
}
  0x38   : > { %s3645_s17 = smov 64   ;;  %s3647_s16 = smov 4  }
  0x39   : > { %2501 = dma.hbm_to_vmem [thread:$0]  (!%p3158_p6), %s3666_s3, 1024, %s3151_s1, [#allocation11], %s3645_s17, %s3645_s17, %s3647_s16  }
  0x3a   : > { %s3668_s7 = sld [smem:[#allocation30_spill]] }
  0x40   : > { %s2734_s14 = scalar_lea.hbm %s3668_s7, 1024 }
  0x41   : > { %p2735_p5 = scmp.ne.s32.totalorder %s3668_s7, %s2734_s14  ;;  %p2741_p12 = scmp.lt.u32.totalorder %s2734_s14, %s3668_s7 }
  0x43   : > { %p2737_p10 = pnand %p2735_p5, %p3174_p8 }
  0x45   : > { %p2738_p11 = pneg %p2737_p10 }
  0x47   : > { %p2743_p13 = pnand %p2741_p12, %p2738_p11 }
  0x49   : > { %2746 = shalt.err (!%p2743_p13)
}
  0x4a   : > { %s2747_s1 = scalar_lea.vmem %s3162_s22, 1024  ;;  %p2755_p7 = scmp.lt.s32.totalorder %s3162_s22, %s3162_s22 }
  0x4b   : > { %p2748_p0 = scmp.ne.s32.totalorder %s3162_s22, %s2747_s1  ;;  %p2756_p9 = scmp.lt.s32.totalorder %s2747_s1, %s2747_s1 }
  0x4d   : > { %p2750_p2 = pnand %p2748_p0, %p3174_p8  ;;  %p2757_p5 = por %p2756_p9, %p2755_p7 }
  0x4f   : > { %p2751_p4 = pneg %p2750_p2 }
  0x51   : > { %p2758_p10 = pnand %p2757_p5, %p2751_p4 }
  0x53   : > { %2761 = shalt.err (!%p2758_p10)
}
  0x54   : > { %2507 = dma.hbm_to_vmem [thread:$0]  (!%p3158_p6), %s3668_s7, 1024, %s3162_s22, [#allocation14], %s3645_s17, %s3645_s17, %s3647_s16  }
  0x55   : > { %s2762_s27 = scalar_lea.hbm %s3634_s13, 2048 }
  0x56   : > { %p2763_p11 = scmp.ne.s32.totalorder %s3634_s13, %s2762_s27  ;;  %p2769_p0 = scmp.lt.u32.totalorder %s2762_s27, %s3634_s13 }
  0x58   : > { %p2765_p12 = pnand %p2763_p11, %p3174_p8 }
  0x5a   : > { %p2766_p13 = pneg %p2765_p12 }
  0x5c   : > { %p2771_p2 = pnand %p2769_p0, %p2766_p13 }
  0x5e   : > { %2774 = shalt.err (!%p2771_p2)
}
  0x5f   : > { %s2775_s1 = scalar_lea.vmem %s532_s0, 2048  ;;  %p2783_p5 = scmp.lt.s32.totalorder %s532_s0, %s532_s0 }
  0x60   : > { %p2776_p4 = scmp.ne.s32.totalorder %s532_s0, %s2775_s1  ;;  %p2784_p10 = scmp.lt.s32.totalorder %s2775_s1, %s2775_s1 }
  0x62   : > { %p2778_p7 = pnand %p2776_p4, %p3174_p8  ;;  %p2785_p3 = por %p2784_p10, %p2783_p5 }
  0x64   : > { %p2779_p9 = pneg %p2778_p7 }
  0x66   : > { %p2786_p1 = pnand %p2785_p3, %p2779_p9 }
  0x68   : > { %2789 = shalt.err (!%p2786_p1)
}
  0x69   : > { %s3005_s22 = smov 128   ;;  %s3006_s4 = smov 8  }
  0x6a   : > { %2513 = dma.hbm_to_vmem [thread:$0]  (!%p3158_p6), %s3634_s13, 2048, %s532_s0, [#allocation17], %s3005_s22, %s3005_s22, %s3006_s4  }
  0x6b   : > { %s3007_s11 = smov [#allocation12]   ;;  %s3008_s19 = smov [#allocation15]  }
  0x6c   : > { %s477_s27 = sshll.u32 %s3007_s11, 4  ;;  %s509_s21 = sshll.u32 %s3008_s19, 4  ;;  %s478_s27 = int_to_ptr.vmem [resolvable:$true] %s477_s27  ;;  %s510_s21 = int_to_ptr.vmem [resolvable:$true] %s509_s21 }
  0x6d   : > { %s2790_s1 = scalar_lea.hbm %s3626_s5, 1024 }
  0x6e   : > { %p2791_p1 = scmp.ne.s32.totalorder %s3626_s5, %s2790_s1  ;;  %p2797_p12 = scmp.lt.u32.totalorder %s2790_s1, %s3626_s5 }
  0x70   : > { %p2793_p3 = pnand %p2791_p1, %p3174_p8 }
  0x72   : > { %p2794_p11 = pneg %p2793_p3 }
  0x74   : > { %p2799_p13 = pnand %p2797_p12, %p2794_p11 }
  0x76   : > { %2802 = shalt.err (!%p2799_p13)
}
  0x77   : > { %s2803_s0 = scalar_lea.vmem %s478_s27, 1024  ;;  %p2811_p7 = scmp.lt.s32.totalorder %s478_s27, %s478_s27 }
  0x78   : > { %p2804_p0 = scmp.ne.s32.totalorder %s478_s27, %s2803_s0  ;;  %p2812_p9 = scmp.lt.s32.totalorder %s2803_s0, %s2803_s0 }
  0x7a   : > { %p2806_p2 = pnand %p2804_p0, %p3174_p8  ;;  %p2813_p5 = por %p2812_p9, %p2811_p7 }
  0x7c   : > { %p2807_p4 = pneg %p2806_p2 }
  0x7e   : > { %p2814_p10 = pnand %p2813_p5, %p2807_p4 }
  0x80   : > { %2817 = shalt.err (!%p2814_p10)
}
  0x81   : > { %s3669_s17 = smov 4   ;;  %s3670_s16 = smov 64  }
  0x82   : > { %2504 = dma.hbm_to_vmem [thread:$0]  (!%p3158_p6), %s3626_s5, 1024, %s478_s27, [#allocation11], %s3670_s16, %s3670_s16, %s3669_s17  }
  0x83   : > { %s2818_s8 = scalar_lea.hbm %s3630_s9, 1024 }
  0x84   : > { %p2819_p1 = scmp.ne.s32.totalorder %s3630_s9, %s2818_s8  ;;  %p2825_p12 = scmp.lt.u32.totalorder %s2818_s8, %s3630_s9 }
  0x86   : > { %p2821_p3 = pnand %p2819_p1, %p3174_p8 }
  0x88   : > { %p2822_p11 = pneg %p2821_p3 }
  0x8a   : > { %p2827_p13 = pnand %p2825_p12, %p2822_p11 }
  0x8c   : > { %2830 = shalt.err (!%p2827_p13)
}
  0x8d   : > { %s2831_s14 = scalar_lea.vmem %s510_s21, 1024  ;;  %p2839_p7 = scmp.lt.s32.totalorder %s510_s21, %s510_s21 }
  0x8e   : > { %p2832_p0 = scmp.ne.s32.totalorder %s510_s21, %s2831_s14  ;;  %p2840_p9 = scmp.lt.s32.totalorder %s2831_s14, %s2831_s14 }
  0x90   : > { %p2834_p2 = pnand %p2832_p0, %p3174_p8  ;;  %p2841_p5 = por %p2840_p9, %p2839_p7 }
  0x92   : > { %p2835_p4 = pneg %p2834_p2 }
  0x94   : > { %p2842_p10 = pnand %p2841_p5, %p2835_p4 }
  0x96   : > { %2845 = shalt.err (!%p2842_p10)
}
  0x97   : > { %2510 = dma.hbm_to_vmem [thread:$0]  (!%p3158_p6), %s3630_s9, 1024, %s510_s21, [#allocation14], %s3670_s16, %s3670_s16, %s3669_s17  }
  0x98   : > { %s3009_s0 = smov [#allocation18]   ;;  %s2846_s4 = scalar_lea.hbm %s3636_s15, 2048 }
  0x99   : > { %s547_s3 = sshll.u32 %s3009_s0, 4  ;;  %p2847_p1 = scmp.ne.s32.totalorder %s3636_s15, %s2846_s4  ;;  %s548_s3 = int_to_ptr.vmem [resolvable:$true] %s547_s3 }
  0x9a   : > { %p2853_p12 = scmp.lt.u32.totalorder %s2846_s4, %s3636_s15 }
  0x9b   : > { %p2849_p3 = pnand %p2847_p1, %p3174_p8 }
  0x9d   : > { %p2850_p11 = pneg %p2849_p3 }
  0x9f   : > { %p2855_p13 = pnand %p2853_p12, %p2850_p11 }
  0xa1   : > { %2858 = shalt.err (!%p2855_p13)
}
  0xa2   : > { %s2859_s21 = scalar_lea.vmem %s548_s3, 2048  ;;  %p2867_p7 = scmp.lt.s32.totalorder %s548_s3, %s548_s3 }
  0xa3   : > { %p2860_p0 = scmp.ne.s32.totalorder %s548_s3, %s2859_s21  ;;  %p2868_p9 = scmp.lt.s32.totalorder %s2859_s21, %s2859_s21 }
  0xa5   : > { %p2862_p2 = pnand %p2860_p0, %p3174_p8  ;;  %p2869_p5 = por %p2868_p9, %p2867_p7 }
  0xa7   : > { %p2863_p4 = pneg %p2862_p2 }
  0xa9   : > { %p2870_p10 = pnand %p2869_p5, %p2863_p4 }
  0xab   : > { %2873 = shalt.err (!%p2870_p10)
}
  0xac   : > { %2516 = dma.hbm_to_vmem [thread:$0]  (!%p3158_p6), %s3636_s15, 2048, %s548_s3, [#allocation17], %s3670_s16, %s3670_s16, %s3669_s17  }
  0xad   : > { %s2158_s12 = sadd.s32 4294967294, %s2998_s29   ;;  %s48_s20 = sadd.s32 1, %s2994_s28 }
  0xae   : > { %p50_p8 = scmp.ge.s32.totalorder %s48_s20, 2  ;;  %s55_s27 = sadd.s32 1, %s2986_s26 }
  0xaf   : > { %p62_p1 = scmp.ne.s32.totalorder %s2986_s26, %s2982_s25  ;;  %p63_p3 = scmp.eq.s32.totalorder %s2998_s29, 0 }
  0xb0   : > { %s3700_s20 = smov (%p50_p8, %s48_s20), 0  ;;  %p68_p12 = scmp.ne.s32.totalorder %s2982_s25, %s2978_s24 }
  0xb1   : > { %p3314_p11 = por %p63_p3, %p62_p1  ;;  %s52_s17 = ssub.s32 %s2994_s28, %s3700_s20 }
  0xb2   : > { %s3672_s16 = sadd.s32 4294967295, %s2998_s29   ;;  %p53_p13 = scmp.eq.s32.totalorder %s52_s17, 0 }
  0xb3   : > { %p430_p6 = scmp.eq.s32.totalorder %s3672_s16, 1  ;;  %p3673_p0 = scmp.ne.s32.totalorder %s3663_s30, 0 }
  0xb4   : > { %p436_p7 = scmp.eq.s32.totalorder %s2158_s12, 1  ;;  %p2531_p5 = scmp.lt.s32.totalorder %s2998_s29, 2 }
  0xb5   : > { %p3326_p2 = por %p3673_p0, %p68_p12  ;;  %p3330_p4 = por %p430_p6, %p62_p1 }
  0xb6   : > { %s3335_s7 = scalar_select %p53_p13, %s2986_s26, %s55_s27  }
  0xb7   : > { %s3675_s3 = scalar_select %p3330_p4, 1, 0 }
  0xb8   : > { %p3337_p9 = por %p436_p7, %p68_p12  ;;  %s564_s4 = sand.u32 1, %s2986_s26  }
  0xb9   : > { %s2168_s8 = sshll.u32 %s2994_s28, 7  ;;  %s2167_s10 = sshll.u32 %s564_s4, 3 }
  0xba   : > { %s3676_s22 = scalar_select %p3337_p9, 1, 0 }
  0xbb   : > { %s3677_s21 = sld [smem:[#allocation26_spill]]  ;;  %s568_s14 = scalar_lea.vmem [#allocation7], %s2167_s10 }
  0xbc   : > { %s575_s12 = sshll.u32 %s568_s14, 4  ;;  %p3351_p10 = pnand %p2531_p5, %p3314_p11  ;;  %s3355_s12 = int_to_ptr.vmem [resolvable:$true] %s575_s12 }
  0xbd   : > { %s565_s17 = scalar_lea.sflag [#allocation8], %s564_s4 }
  0xbe   : > { %p2876_p1 = pneg %p3351_p10 }
  0xc1   : > { %s3347_s23 = scalar_lea.hbm %s3677_s21, %s2168_s8  ;;  %s2879_s1 = scalar_lea.hbm %s3677_s21, 256 }
  0xc2   : > { %s2874_s16 = scalar_lea.hbm %s3347_s23, 128  ;;  %p2880_p11 = scmp.lt.u32.totalorder %s3347_s23, %s3677_s21 }
  0xc3   : > { %p2875_p8 = scmp.ne.s32.totalorder %s3347_s23, %s2874_s16  ;;  %p2881_p6 = scmp.lt.u32.totalorder %s2879_s1, %s2874_s16 }
  0xc4   : > { %p2883_p0 = scmp.lt.u32.totalorder %s2874_s16, %s3347_s23 }
  0xc5   : > { %p2877_p3 = pnand %p2876_p1, %p2875_p8  ;;  %p2882_p13 = por %p2881_p6, %p2880_p11 }
  0xc7   : > { %p2878_p12 = pneg %p2877_p3  ;;  %p2884_p7 = por %p2883_p0, %p2882_p13 }
  0xc9   : > { %p2885_p5 = pnand %p2884_p7, %p2878_p12 }
  0xcb   : > { %2888 = shalt.err (!%p2885_p5)
}
  0xcc   : > { %s2889_s4 = scalar_lea.vmem %s3355_s12, 128  ;;  %s3010_s14 = smov [#allocation7]  }
  0xcd   : > { %p2890_p8 = scmp.ne.s32.totalorder %s3355_s12, %s2889_s4  ;;  %s2894_s8 = sshll.u32 %s3010_s14, 4  ;;  %s2895_s8 = int_to_ptr.vmem [resolvable:$false] %s2894_s8 }
  0xce   : > { %s2896_s10 = scalar_lea.vmem %s2895_s8, 256  ;;  %p2897_p4 = scmp.lt.s32.totalorder %s3355_s12, %s2895_s8 }
  0xcf   : > { %p2892_p3 = pnand %p2890_p8, %p2876_p1  ;;  %p2898_p11 = scmp.lt.s32.totalorder %s2896_s10, %s2889_s4 }
  0xd1   : > { %p2893_p9 = pneg %p2892_p3  ;;  %p2899_p6 = por %p2898_p11, %p2897_p4 }
  0xd3   : > { %p2900_p13 = pnand %p2899_p6, %p2893_p9 }
  0xd5   : > { %2903 = shalt.err (!%p2900_p13)
}
  0xd6   : > { %2520 = dma.hbm_to_vmem [thread:$0]  (!%p3351_p10), %s3347_s23, 128, %s3355_s12, %s565_s17  }
  0xd7   : > { %p3679_p12 = scmp.ne.s32.totalorder %s3664_s18, 0 }
  0xd8   : > { %s3385_s16 = sand.u32 (!%p3679_p12), 1, %s2982_s25  }
  0xd9   : > { %584 = sbr.rel (%p3679_p12) target bundleno = 4288 (0x10c0), region = 88  ;;  %s2170_s1 = sshll.u32 (!%p3679_p12), %s3385_s16, 3 }
  0xda   : > { %s587_s11 = scalar_lea.sflag (!%p3679_p12), [#allocation8], %s3385_s16  ;;  %s590_s19 = scalar_lea.vmem (!%p3679_p12), [#allocation7], %s2170_s1 }
  0xe0   : > { %2957 = dma.done.wait (%p3326_p2), %s587_s11, 128  }
  0xe1   : > { %2959 = vsyncadd (%p3326_p2), %s587_s11, 4294967168  ;;  %p3680_p4 = scmp.ne.s32.totalorder %s3663_s30, 0 }
  0xe3   : > { %2961 = dma.done.wait (%p3680_p4), [#allocation11], 2048  }
  0xe4   : > { %2963 = vsyncadd (%p3680_p4), [#allocation11], 4294965248 }
  0xe5   : > { %2965 = dma.done.wait (%p3680_p4), [#allocation14], 2048  }
  0xe6   : > { %2967 = vsyncadd (%p3680_p4), [#allocation14], 4294965248 }
  0xe7   : > { %2969 = dma.done.wait (%p3680_p4), [#allocation17], 4096  }
  0xe8   : > { %2971 = vsyncadd (%p3680_p4), [#allocation17], 4294963200  ;;  %v3407_v0 = vld [vmem:[%s590_s19] sm:$0xff]  ;;  %v2603_v1 = vld [vmem:[#allocation12] sm:$0xff]   ;;  %v3011_v3 = vmov 0.0   ;;  %vm3012_vm0 = vmmov 0  }
  0xe9   : > { %673 = vadd.xlane.f32.xlu0 %v3407_v0  ;;  %v2604_v2 = vld [vmem:[#allocation13] sm:$0xff]   ;;  %2342 = vmatprep.subr.bf16.mxu0 %v3011_v3  ;;  %v2605_v4 = vld [vmem:[#allocation12 + $0x8] sm:$0xff]   ;;  %v2607_v6 = vld [vmem:[#allocation12 + $0x10] sm:$0xff]   ;;  %s3681_s0 = sld [smem:[#allocation27_spill]]  ;;  %s3682_s8 = sld [smem:[#allocation31_spill]]  ;;  %vm1050_vm1 = vcmask 261120  }
  0xea   : > { %2362 = vmatprep.subr.bf16.mxu1 %v3011_v3  ;;  %v2606_v5 = vld [vmem:[#allocation13 + $0x8] sm:$0xff]   ;;  %2343 = vmatpush3.bf16.msra.mxu0 %v2603_v1  ;;  %v2608_v11 = vld [vmem:[#allocation13 + $0x10] sm:$0xff]   ;;  %v2609_v12 = vld [vmem:[#allocation12 + $0x18] sm:$0xff]   ;;  %s3013_s10 = smov 96   ;;  %s3683_s30 = sld [smem:[#allocation29_spill]]  ;;  %vm1113_vm2 = vcmask 1043456  }
  0xeb   : > { %2363 = vmatpush3.bf16.msra.mxu1 %v2604_v2  ;;  %2344 = vmatprep.subr.bf16.mxu0 %v3011_v3  ;;  %v2610_v13 = vld [vmem:[#allocation13 + $0x18] sm:$0xff]   ;;  %v2611_v14 = vld [vmem:[#allocation12 + $0x20] sm:$0xff]   ;;  %v2613_v16 = vld [vmem:[#allocation12 + $0x28] sm:$0xff]   ;;  %vm1097_vm3 = vcmask 64512   ;;  %s3014_s18 = smov 64   ;;  %vm1509_vm4 = vcmask 523264  }
  0xec   : > { %2364 = vmatprep.subr.bf16.mxu1 %v3011_v3  ;;  %v2612_v15 = vld [vmem:[#allocation13 + $0x20] sm:$0xff]   ;;  %2358 = vmatprep.mubr.msk.bf16.mxu0 %vm3012_vm0, %v3011_v3  ;;  %v2614_v17 = vld [vmem:[#allocation13 + $0x28] sm:$0xff]   ;;  %v2615_v18 = vld [vmem:[#allocation12 + $0x30] sm:$0xff]   ;;  %vm1511_vm5 = vcmask 785408   ;;  %s3684_s27 = sld [smem:[#allocation32_spill]]  ;;  %s3685_s14 = sld [smem:[#allocation33_spill]] }
  0xed   : > { %2378 = vmatprep.mubr.msk.bf16.mxu1 %vm3012_vm0, %v3011_v3  ;;  %v2616_v19 = vld [vmem:[#allocation13 + $0x30] sm:$0xff]   ;;  %v2617_v20 = vld [vmem:[#allocation12 + $0x38] sm:$0xff]   ;;  %v2179_v28 = vld [vmem:[%s3623_s2] ss:$0 sm:$0xff]  ;;  %s3686_s11 = sld [smem:[#allocation34_spill]]  ;;  %s664_s4 = scalar_lea.vmem [#allocation19], %s2170_s1 }
  0xee   : > { %2345 = vmatpush3.bf16.msra.mxu0 %v2605_v4  ;;  %v2618_v21 = vld [vmem:[#allocation13 + $0x38] sm:$0xff]   ;;  %v2619_v31 = vld [vmem:[#allocation10] sm:$0xff]   ;;  %v2620_v33 = vld [vmem:[#allocation10 + $0x8] sm:$0xff]   ;;  %p3691_p9 = scmp.ne.s32.totalorder %s3675_s3, 0  ;;  %s3017_s1 = smov [#allocation19]  }
  0xef   : > { %2365 = vmatpush3.bf16.msra.mxu1 %v2606_v5  ;;  %2346 = vmatprep.subr.bf16.mxu0 %v3011_v3  ;;  %v2178_v26 = vld [vmem:[%s3681_s0] ss:$0 sm:$0xff]  ;;  %v2621_v34 = vld [vmem:[#allocation10 + $0x10] sm:$0xff]   ;;  %v2622_v35 = vld [vmem:[#allocation10 + $0x18] sm:$0xff]   ;;  %s3015_s0 = smov 32  }
  0xf0   : > { %2366 = vmatprep.subr.bf16.mxu1 %v3011_v3  ;;  %v2623_v36 = vld [vmem:[#allocation10 + $0x20] sm:$0xff]   ;;  %v2624_v37 = vld [vmem:[#allocation10 + $0x28] sm:$0xff]   ;;  %v2625_v38 = vld [vmem:[#allocation10 + $0x30] sm:$0xff]  }
  0xf1   : > { %v2626_v39 = vld [vmem:[#allocation10 + $0x38] sm:$0xff]   ;;  %v2180_v40 = vld [vmem:[%s3627_s6] ss:$0 sm:$0xff] }
  0xf2   : > { %2347 = vmatpush3.bf16.msra.mxu0 %v2607_v6  ;;  %v2189_v41 = vld [vmem:[%s3682_s8] ss:$0 sm:$0xff] }
  0xf3   : > { %2348 = vmatprep.subr.bf16.mxu0 %v3011_v3  ;;  %2367 = vmatpush3.bf16.msra.mxu1 %v2608_v11  ;;  %v2198_v57 = vld [vmem:[%s3683_s30] ss:$0 sm:$0xff]  ;;  %s2003_s30 = scalar_lea.sflag [#allocation9], %s3385_s16 }
  0xf4   : > { %2368 = vmatprep.subr.bf16.mxu1 %v3011_v3 }
  0xf6   : > { %2349 = vmatpush3.bf16.msra.mxu0 %v2609_v12 }
  0xf7   : > { %2369 = vmatpush3.bf16.msra.mxu1 %v2610_v13  ;;  %2350 = vmatprep.subr.bf16.mxu0 %v3011_v3 }
  0xf8   : > { %2370 = vmatprep.subr.bf16.mxu1 %v3011_v3 }
  0xfa   : > { %2351 = vmatpush3.bf16.msra.mxu0 %v2611_v14 }
  0xfb   : > { %2371 = vmatpush3.bf16.msra.mxu1 %v2612_v15  ;;  %2352 = vmatprep.subr.bf16.mxu0 %v3011_v3 }
  0xfc   : > { %2372 = vmatprep.subr.bf16.mxu1 %v3011_v3 }
  0xfe   : > { %2353 = vmatpush3.bf16.msra.mxu0 %v2613_v16 }
  0xff   : > { %2373 = vmatpush3.bf16.msra.mxu1 %v2614_v17  ;;  %2354 = vmatprep.subr.bf16.mxu0 %v3011_v3 }
 0x100   : > { %2374 = vmatprep.subr.bf16.mxu1 %v3011_v3 }
 0x102   : > { %2355 = vmatpush3.bf16.msra.mxu0 %v2615_v18 }
 0x103   : > { %2375 = vmatpush3.bf16.msra.mxu1 %v2616_v19  ;;  %2356 = vmatprep.subr.bf16.mxu0 %v3011_v3 }
 0x104   : > { %2376 = vmatprep.subr.bf16.mxu1 %v3011_v3 }
 0x106   : > { %2357 = vmatpush3.bf16.msra.mxu0 %v2617_v20 }
 0x107   : > { %2377 = vmatpush3.bf16.msra.mxu1 %v2618_v21  ;;  %2382 = vmatprep.subr.bf16.mxu0 %v3011_v3 }
 0x108   : > { %2402 = vmatprep.subr.bf16.mxu1 %v3011_v3 }
 0x176   : > { %v674_v7 = vpop.xlane.xlu0 %673 }
 0x177   : > { %v676_v8 = vmul.f32 0.0078125, %v674_v7 }
 0x179   : > { %v677_v9 = vsub.f32 %v3407_v0, %v676_v8 }
 0x17b   : > { %v678_v10 = vmul.f32 %v677_v9, %v677_v9 }
 0x17d   : > { %679 = vadd.xlane.f32.xlu0 %v678_v10 }
 0x20a   : > { %v680_v22 = vpop.xlane.xlu0 %679 }
 0x20b   : > { %v681_v23 = vmul.f32 0.0078125, %v680_v22 }
 0x20d   : > { %v682_v24 = vadd.f32 1e-05, %v681_v23 }
 0x20f   : > { %2678 = vrsqrt.f32 %v682_v24 }
 0x219   : > { %v2679_v25 = vpop.eup %2678 }
 0x21a   : > { %v684_v27 = vmul.f32 %v2679_v25, %v677_v9 }
 0x21c   : > { %v691_v29 = vmul.f32 %v2178_v26, %v684_v27 }
 0x21e   : > { %v698_v30 = vadd.f32 %v2179_v28, %v691_v29 }
 0x220   : > { %v700_v32 = vpack.c.bf16 %v698_v30, %v698_v30 }
 0x222   : > { %2359 = vmatmul.mubr.bf16.vlgmr.msra.gmra.mrb[0].mxu0 %v700_v32  ;;  %2379 = vmatmul.mubr.bf16.vlgmr.msra.gmra.mrb[0].mxu1 %v700_v32 }
 0x223   : > { %2383 = vmatpush3.bf16.msra.mxu0 %v2619_v31  ;;  %2398 = vmatprep.mubr.msk.bf16.mxu0 %vm3012_vm0, %v3011_v3 }
 0x224   : > { %2384 = vmatprep.subr.bf16.mxu0 %v3011_v3  ;;  %2404 = vmatprep.mubr.msk.bf16.mxu1 %vm3012_vm0, %v3011_v3 }
 0x227   : > { %2385 = vmatpush3.bf16.msra.mxu0 %v2620_v33 }
 0x228   : > { %2386 = vmatprep.subr.bf16.mxu0 %v3011_v3 }
 0x22b   : > { %2387 = vmatpush3.bf16.msra.mxu0 %v2621_v34 }
 0x22c   : > { %2388 = vmatprep.subr.bf16.mxu0 %v3011_v3 }
 0x22f   : > { %2389 = vmatpush3.bf16.msra.mxu0 %v2622_v35 }
 0x230   : > { %2390 = vmatprep.subr.bf16.mxu0 %v3011_v3 }
 0x233   : > { %2391 = vmatpush3.bf16.msra.mxu0 %v2623_v36 }
 0x234   : > { %2392 = vmatprep.subr.bf16.mxu0 %v3011_v3 }
 0x237   : > { %2393 = vmatpush3.bf16.msra.mxu0 %v2624_v37 }
 0x238   : > { %2394 = vmatprep.subr.bf16.mxu0 %v3011_v3 }
 0x23b   : > { %2395 = vmatpush3.bf16.msra.mxu0 %v2625_v38 }
 0x23c   : > { %2396 = vmatprep.subr.bf16.mxu0 %v3011_v3 }
 0x23f   : > { %2397 = vmatpush3.bf16.msra.mxu0 %v2626_v39 }
 0x240   : > { %2450 = vmatprep.subr.bf16.mxu0 %v3011_v3 }
 0x242   : > { %2399 = vmatmul.mubr.bf16.vlgmr.msra.gmra.mrb[4].mxu0 %v700_v32 }
 0x243   : > { %2466 = vmatprep.mubr.msk.bf16.mxu0 %vm3012_vm0, %v3011_v3 }
 0x2f5   : > { %v806_v42 = vpop.f32.mrb[0].mxu0  ;;  %v919_v43 = vpop.f32.mrb[0].mxu1 }
 0x2f6   : > { %v807_v44 = vadd.f32 %v2180_v40, %v806_v42  ;;  %v920_v45 = vadd.f32 %v2189_v41, %v919_v43  ;;  %v2360_v46 = vpop.f32.mrb[1].mxu0  ;;  %v2380_v47 = vpop.f32.mrb[1].mxu1 }
 0x2f7   : > { %v809_v48 = vpop.f32.mrb[2].mxu0  ;;  %v922_v49 = vpop.f32.mrb[2].mxu1 }
 0x2f8   : > { %v812_v50 = vpack.c.bf16 %v807_v44, %v807_v44  ;;  %v925_v51 = vpack.c.bf16 %v920_v45, %v920_v45  ;;  %v2361_v52 = vpop.f32.mrb[3].mxu0  ;;  %v2381_v53 = vpop.f32.mrb[3].mxu1 }
 0x2fa   : > { %813 = vst [vmem:[#allocation3] sm:$0xf] %v812_v50  ;;  %926 = vst [vmem:[#allocation4] sm:$0xf] %v925_v51 }
 0x301   : > { %v1048_v54 = vld [vmem:[#allocation3] sm:$0xf]  ;;  %v1049_v2 = vld [vmem:[#allocation4] sm:$0xf] }
 0x302   : > { %v1055_v55 = vsel %vm1050_vm1, %v1048_v54, 0  ;;  %v3460_v56 = vcombine.low %v1048_v54, %v1048_v54  ;;  %v1115_v5 = vsel %vm1113_vm2, %v1049_v2, 0  ;;  %v3495_v38 = vcombine.low %v1049_v2, %v1049_v2 }
 0x303   : > { %2403 = vmatpush3.bf16.xpose.msra.mxu1 %v1055_v55 }
 0x304   : > { %1165 = vrot.lane.b32.xlu0 %v3460_v56, %s3013_s10  ;;  %2408 = vmatprep.subr.bf16.mxu1 %v3011_v3 }
 0x315   : > { %v1038_v58 = vpop.f32.mrb[4].mxu0 }
 0x316   : > { %v1039_v59 = vadd.f32 %v2198_v57, %v1038_v58  ;;  %v2400_v60 = vpop.f32.mrb[5].mxu0 }
 0x317   : > { %v1041_v61 = vpop.f32.mrb[6].mxu0 }
 0x318   : > { %v1044_v62 = vmul.f32 0.17677669, %v1039_v59  ;;  %v2401_v63 = vpop.f32.mrb[7].mxu0 }
 0x31a   : > { %v1045_v1 = vpack.c.bf16 %v1044_v62, %v1044_v62 }
 0x31c   : > { %1046 = vst [vmem:[#allocation5] sm:$0xf] %v1045_v1 }
 0x323   : > { %v1047_v4 = vld [vmem:[#allocation5] sm:$0xf] }
 0x324   : > { %2405 = vmatmul.mubr.msk.bf16.vlgmr.msra.gmra.mrb[4].mxu1 %vm1050_vm1, %v1047_v4  ;;  %v3475_v16 = vcombine.low %v1047_v4, %v1047_v4 }
 0x325   : > { %2409 = vmatpush3.bf16.msra.mxu1 %v1115_v5  ;;  %2410 = vmatprep.mubr.msk.bf16.mxu1 %vm3012_vm0, %v3011_v3 }
 0x326   : > { %2414 = vmatprep.subr.bf16.mxu1 %v3011_v3 }
 0x376   : > { %v1166_v20 = vpop.permute.xlu0 %1165 }
 0x377   : > { %v1171_v22 = vsel %vm1050_vm1, %v1166_v20, 0 }
 0x3f7   : > { %v1091_v6 = vpop.f32.mrb[4].mxu1 }
 0x3f8   : > { %v2406_v7 = vpop.f32.mrb[5].mxu1  ;;  %v1098_v8 = vsel %vm1097_vm3, %v1091_v6, -inf }
 0x3f9   : > { %1099 = vmax.xlane.f32.xlu1 %v1098_v8  ;;  %v1094_v9 = vpop.f32.mrb[6].mxu1 }
 0x3fa   : > { %v2407_v10 = vpop.f32.mrb[7].mxu1 }
 0x486   : > { %v1100_v11 = vpop.xlane.xlu1 %1099 }
 0x487   : > { %v1101_v12 = vsub.f32 %v1091_v6, %v1100_v11 }
 0x489   : > { %v1102_v13 = vmul.f32 1.442695, %v1101_v12 }
 0x48b   : > { %2680 = vpow2.f32 %v1102_v13 }
 0x495   : > { %v2681_v14 = vpop.eup %2680 }
 0x496   : > { %v1104_v15 = vsel %vm1097_vm3, %v2681_v14, 0.0 }
 0x497   : > { %1105 = vadd.xlane.f32.xlu1 %v1104_v15 }
 0x4a8   : > { %1160 = vrot.lane.b32.xlu1 %v3475_v16, %s3013_s10 }
 0x524   : > { %v1106_v17 = vpop.xlane.xlu1 %1105 }
 0x525   : > { %2682 = vrcp.f32 %v1106_v17 }
 0x528   : > { %v1161_v23 = vpop.permute.xlu1 %1160 }
 0x52f   : > { %v2683_v18 = vpop.eup %2682 }
 0x530   : > { %v1108_v19 = vmul.f32 %v2683_v18, %v2681_v14 }
 0x532   : > { %v1109_v21 = vpack.c.bf16 %v1108_v19, %v1108_v19 }
 0x534   : > { %2411 = vmatmul.mubr.msk.bf16.vlgmr.msra.gmra.mrb[8].mxu1 %vm1097_vm3, %v1109_v21 }
 0x535   : > { %2415 = vmatpush3.bf16.xpose.msra.mxu1 %v1171_v22  ;;  %2416 = vmatprep.mubr.msk.bf16.mxu1 %vm3012_vm0, %v3011_v3 }
 0x536   : > { %2420 = vmatprep.subr.bf16.mxu1 %v3011_v3 }
 0x53c   : > { %2417 = vmatmul.mubr.msk.bf16.vlgmr.msra.gmra.mrb[12].mxu1 %vm1050_vm1, %v1161_v23 }
 0x53d   : > { %2422 = vmatprep.mubr.msk.bf16.mxu1 %vm3012_vm0, %v3011_v3 }
 0x607   : > { %v3487_v24 = vpop.f32.mrb[8].mxu1 }
 0x608   : > { %v2412_v25 = vpop.f32.mrb[9].mxu1 }
 0x609   : > { %v1154_v26 = vpop.f32.mrb[10].mxu1 }
 0x60a   : > { %v2413_v27 = vpop.f32.mrb[11].mxu1 }
 0x60f   : > { %v1207_v28 = vpop.f32.mrb[12].mxu1 }
 0x610   : > { %v2418_v29 = vpop.f32.mrb[13].mxu1  ;;  %v1213_v30 = vsel %vm1097_vm3, %v1207_v28, -inf }
 0x611   : > { %1214 = vmax.xlane.f32.xlu1 %v1213_v30  ;;  %v1210_v31 = vpop.f32.mrb[14].mxu1  ;;  %v2630_v30 = vld [vmem:[#allocation15] sm:$0xff]  }
 0x612   : > { %v2419_v32 = vpop.f32.mrb[15].mxu1  ;;  %2451 = vmatpush3.bf16.msra.mxu0 %v2630_v30  ;;  %v2631_v31 = vld [vmem:[#allocation15 + $0x8] sm:$0xff]   ;;  %v2668_v30 = vld [vmem:[#allocation18 + $0x58] sm:$0xff]  }
 0x613   : > { %2452 = vmatprep.subr.bf16.mxu0 %v3011_v3  ;;  %v2632_v32 = vld [vmem:[#allocation15 + $0x10] sm:$0xff]  }
 0x616   : > { %2453 = vmatpush3.bf16.msra.mxu0 %v2631_v31  ;;  %v2669_v31 = vld [vmem:[#allocation18 + $0x18] sm:$0xff]  }
 0x617   : > { %2454 = vmatprep.subr.bf16.mxu0 %v3011_v3 }
 0x61a   : > { %2455 = vmatpush3.bf16.msra.mxu0 %v2632_v32  ;;  %v2670_v32 = vld [vmem:[#allocation18 + $0x60] sm:$0xff]  }
 0x61b   : > { %2456 = vmatprep.subr.bf16.mxu0 %v3011_v3 }
 0x622   : > { %1278 = vrot.lane.b32.xlu1 %v3460_v56, %s3014_s18 }
 0x626   : > { %1276 = vrot.lane.b32.xlu1 %v3475_v16, %s3014_s18 }
 0x69e   : > { %v1215_v33 = vpop.xlane.xlu1 %1214 }
 0x69f   : > { %v1216_v34 = vsub.f32 %v1207_v28, %v1215_v33  ;;  %v2633_v33 = vld [vmem:[#allocation15 + $0x18] sm:$0xff]  }
 0x6a0   : > { %2457 = vmatpush3.bf16.msra.mxu0 %v2633_v33  ;;  %v2671_v33 = vld [vmem:[#allocation18 + $0x20] sm:$0xff]  }
 0x6a1   : > { %v1217_v35 = vmul.f32 1.442695, %v1216_v34  ;;  %v2634_v34 = vld [vmem:[#allocation15 + $0x20] sm:$0xff]   ;;  %2458 = vmatprep.subr.bf16.mxu0 %v3011_v3 }
 0x6a2   : > { %v1279_v44 = vpop.permute.xlu1 %1278 }
 0x6a3   : > { %2684 = vpow2.f32 %v1217_v35  ;;  %v1284_v46 = vsel %vm1050_vm1, %v1279_v44, 0  ;;  %v2635_v35 = vld [vmem:[#allocation15 + $0x28] sm:$0xff]  }
 0x6a4   : > { %2459 = vmatpush3.bf16.msra.mxu0 %v2634_v34  ;;  %v2672_v34 = vld [vmem:[#allocation18 + $0x68] sm:$0xff]  }
 0x6a5   : > { %2460 = vmatprep.subr.bf16.mxu0 %v3011_v3 }
 0x6a6   : > { %v1277_v47 = vpop.permute.xlu1 %1276 }
 0x6a8   : > { %2461 = vmatpush3.bf16.msra.mxu0 %v2635_v35  ;;  %v2673_v35 = vld [vmem:[#allocation18 + $0x28] sm:$0xff]  }
 0x6a9   : > { %2462 = vmatprep.subr.bf16.mxu0 %v3011_v3 }
 0x6ad   : > { %v2685_v36 = vpop.eup %2684 }
 0x6ae   : > { %v1219_v37 = vsel %vm1097_vm3, %v2685_v36, 0.0 }
 0x6af   : > { %1220 = vadd.xlane.f32.xlu0 %v1219_v37  ;;  %v2637_v37 = vld [vmem:[#allocation15 + $0x38] sm:$0xff]  }
 0x6c5   : > { %1228 = vrot.lane.b32.xlu0 %v3495_v38, %s3013_s10 }
 0x73c   : > { %v1221_v39 = vpop.xlane.xlu0 %1220 }
 0x73d   : > { %2686 = vrcp.f32 %v1221_v39 }
 0x740   : > { %v1229_v40 = vpop.permute.xlu0 %1228 }
 0x741   : > { %v1234_v41 = vsel %vm1113_vm2, %v1229_v40, 0 }
 0x742   : > { %2421 = vmatpush3.bf16.msra.mxu1 %v1234_v41 }
 0x743   : > { %2426 = vmatprep.subr.bf16.mxu1 %v3011_v3 }
 0x747   : > { %v2687_v42 = vpop.eup %2686 }
 0x748   : > { %v1223_v43 = vmul.f32 %v2687_v42, %v2685_v36  ;;  %v2636_v36 = vld [vmem:[#allocation15 + $0x30] sm:$0xff]  }
 0x749   : > { %2463 = vmatpush3.bf16.msra.mxu0 %v2636_v36  ;;  %v2674_v36 = vld [vmem:[#allocation18 + $0x70] sm:$0xff]  }
 0x74a   : > { %v1224_v45 = vpack.c.bf16 %v1223_v43, %v1223_v43  ;;  %2464 = vmatprep.subr.bf16.mxu0 %v3011_v3 }
 0x74c   : > { %2423 = vmatmul.mubr.msk.bf16.vlgmr.msra.gmra.mrb[16].mxu1 %vm1097_vm3, %v1224_v45 }
 0x74d   : > { %2427 = vmatpush3.bf16.xpose.msra.mxu1 %v1284_v46  ;;  %2428 = vmatprep.mubr.msk.bf16.mxu1 %vm3012_vm0, %v3011_v3 }
 0x74e   : > { %2432 = vmatprep.subr.bf16.mxu1 %v3011_v3  ;;  %2465 = vmatpush3.bf16.msra.mxu0 %v2637_v37  ;;  %v2675_v37 = vld [vmem:[#allocation18 + $0x30] sm:$0xff]  }
 0x754   : > { %2429 = vmatmul.mubr.msk.bf16.vlgmr.msra.gmra.mrb[20].mxu1 %vm1050_vm1, %v1277_v47 }
 0x755   : > { %2434 = vmatprep.mubr.msk.bf16.mxu1 %vm3012_vm0, %v3011_v3 }
 0x81f   : > { %v1270_v48 = vpop.f32.mrb[16].mxu1 }
 0x820   : > { %v2424_v49 = vpop.f32.mrb[17].mxu1 }
 0x821   : > { %v1273_v50 = vpop.f32.mrb[18].mxu1  ;;  %v2218_v49 = vld [vmem:[%s3684_s27] ss:$0 sm:$0xff]  ;;  %s3689_s27 = sld [smem:[#allocation36_spill]] }
 0x822   : > { %v2425_v51 = vpop.f32.mrb[19].mxu1 }
 0x827   : > { %v1320_v52 = vpop.f32.mrb[20].mxu1 }
 0x828   : > { %v2430_v53 = vpop.f32.mrb[21].mxu1  ;;  %v1326_v54 = vsel %vm1097_vm3, %v1320_v52, -inf }
 0x829   : > { %1327 = vmax.xlane.f32.xlu1 %v1326_v54  ;;  %v1323_v55 = vpop.f32.mrb[22].mxu1 }
 0x82a   : > { %v2431_v57 = vpop.f32.mrb[23].mxu1  ;;  %v2638_v55 = vld [vmem:[#allocation16] ss:$8 sps:$4 sm:$0xff]  }
 0x82b   : > { %v2640_v57 = vld [vmem:[#allocation16 + $0x4] ss:$8 sps:$4 sm:$0xff]  }
 0x83a   : > { %1388 = vrot.lane.b32.xlu1 %v3460_v56, %s3015_s0 }
 0x83e   : > { %1386 = vrot.lane.b32.xlu1 %v3475_v16, %s3015_s0 }
 0x8b6   : > { %v1328_v58 = vpop.xlane.xlu1 %1327 }
 0x8b7   : > { %v1329_v59 = vsub.f32 %v1320_v52, %v1328_v58  ;;  %v2643_v58 = vld [vmem:[#allocation16 + $0x14] ss:$8 sps:$4 sm:$0xff]  }
 0x8b9   : > { %v1330_v60 = vmul.f32 1.442695, %v1329_v59  ;;  %v2641_v59 = vld [vmem:[#allocation16 + $0x10] ss:$8 sps:$4 sm:$0xff]  }
 0x8ba   : > { %v1389_v5 = vpop.permute.xlu1 %1388 }
 0x8bb   : > { %2688 = vpow2.f32 %v1330_v60  ;;  %v1394_v7 = vsel %vm1050_vm1, %v1389_v5, 0  ;;  %v2646_v60 = vld [vmem:[#allocation16 + $0x24] ss:$8 sps:$4 sm:$0xff]   ;;  %v2650_v5 = vld [vmem:[#allocation16 + $0x40] ss:$8 sps:$4 sm:$0xff]  }
 0x8be   : > { %v1387_v8 = vpop.permute.xlu1 %1386 }
 0x8c5   : > { %v2689_v61 = vpop.eup %2688 }
 0x8c6   : > { %v1332_v62 = vsel %vm1097_vm3, %v2689_v61, 0.0 }
 0x8c7   : > { %1333 = vadd.xlane.f32.xlu0 %v1332_v62 }
 0x8dd   : > { %1338 = vrot.lane.b32.xlu0 %v3495_v38, %s3014_s18 }
 0x954   : > { %v1334_v63 = vpop.xlane.xlu0 %1333 }
 0x955   : > { %2690 = vrcp.f32 %v1334_v63 }
 0x958   : > { %v1339_v1 = vpop.permute.xlu0 %1338 }
 0x959   : > { %v1344_v2 = vsel %vm1113_vm2, %v1339_v1, 0 }
 0x95a   : > { %2433 = vmatpush3.bf16.msra.mxu1 %v1344_v2  ;;  %v2649_v2 = vld [vmem:[#allocation16 + $0x34] ss:$8 sps:$4 sm:$0xff]  }
 0x95b   : > { %2438 = vmatprep.subr.bf16.mxu1 %v3011_v3 }
 0x95f   : > { %v2691_v56 = vpop.eup %2690 }
 0x960   : > { %v1336_v4 = vmul.f32 %v2691_v56, %v2689_v61  ;;  %v2644_v61 = vld [vmem:[#allocation16 + $0x20] ss:$8 sps:$4 sm:$0xff]   ;;  %v2647_v56 = vld [vmem:[#allocation16 + $0x30] ss:$8 sps:$4 sm:$0xff]  }
 0x962   : > { %v1337_v6 = vpack.c.bf16 %v1336_v4, %v1336_v4  ;;  %v2652_v4 = vld [vmem:[#allocation16 + $0x44] ss:$8 sps:$4 sm:$0xff]  }
 0x964   : > { %2435 = vmatmul.mubr.msk.bf16.vlgmr.msra.gmra.mrb[24].mxu1 %vm1097_vm3, %v1337_v6  ;;  %v2655_v6 = vld [vmem:[#allocation16 + $0x54] ss:$8 sps:$4 sm:$0xff]  }
 0x965   : > { %2439 = vmatpush3.bf16.xpose.msra.mxu1 %v1394_v7  ;;  %2440 = vmatprep.mubr.msk.bf16.mxu1 %vm3012_vm0, %v3011_v3  ;;  %v2653_v7 = vld [vmem:[#allocation16 + $0x50] ss:$8 sps:$4 sm:$0xff]  }
 0x966   : > { %2444 = vmatprep.subr.bf16.mxu1 %v3011_v3 }
 0x96c   : > { %2441 = vmatmul.mubr.msk.bf16.vlgmr.msra.gmra.mrb[28].mxu1 %vm1050_vm1, %v1387_v8  ;;  %v2658_v8 = vld [vmem:[#allocation16 + $0x64] ss:$8 sps:$4 sm:$0xff]  }
 0x96d   : > { %2446 = vmatprep.mubr.msk.bf16.mxu1 %vm3012_vm0, %v3011_v3 }
 0xa37   : > { %v1380_v9 = vpop.f32.mrb[24].mxu1 }
 0xa38   : > { %v2436_v10 = vpop.f32.mrb[25].mxu1 }
 0xa39   : > { %v1383_v11 = vpop.f32.mrb[26].mxu1  ;;  %v2661_v10 = vld [vmem:[#allocation16 + $0x74] ss:$8 sps:$4 sm:$0xff]  }
 0xa3a   : > { %v2437_v12 = vpop.f32.mrb[27].mxu1  ;;  %v2659_v11 = vld [vmem:[#allocation16 + $0x70] ss:$8 sps:$4 sm:$0xff]  }
 0xa3b   : > { %v3016_v12 = vmov 0  }
 0xa3f   : > { %v1430_v13 = vpop.f32.mrb[28].mxu1 }
 0xa40   : > { %v2442_v14 = vpop.f32.mrb[29].mxu1  ;;  %v1436_v15 = vsel %vm1097_vm3, %v1430_v13, -inf }
 0xa41   : > { %1437 = vmax.xlane.f32.xlu0 %v1436_v15  ;;  %v1433_v16 = vpop.f32.mrb[30].mxu1 }
 0xa42   : > { %v2443_v17 = vpop.f32.mrb[31].mxu1 }
 0xa43   : > { %v2227_v17 = vld [vmem:[%s3685_s14] ss:$0 sm:$0xff]  ;;  %s2017_s14 = sshll.u32 %s664_s4, 4  ;;  %s3574_s14 = int_to_ptr.vmem [resolvable:$true] %s2017_s14 }
 0xa57   : > { %1448 = vrot.lane.b32.xlu0 %v3495_v38, %s3015_s0 }
 0xa5b   : > { %1501 = vrot.lane.b32.xlu0 %v1380_v9, %s3014_s18  ;;  %v2656_v9 = vld [vmem:[#allocation16 + $0x60] ss:$8 sps:$4 sm:$0xff]   ;;  %s3687_s18 = sld [smem:[#allocation35_spill]] }
 0xace   : > { %v1438_v18 = vpop.xlane.xlu0 %1437 }
 0xacf   : > { %v1439_v19 = vsub.f32 %v1430_v13, %v1438_v18 }
 0xad1   : > { %v1440_v20 = vmul.f32 1.442695, %v1439_v19  ;;  %v2228_v19 = vld [vmem:[%s3686_s11] ss:$0 sm:$0xff]  ;;  %s3690_s11 = sld [smem:[#allocation37_spill]] }
 0xad2   : > { %v1449_v21 = vpop.permute.xlu0 %1448 }
 0xad3   : > { %2692 = vpow2.f32 %v1440_v20  ;;  %v1454_v22 = vsel %vm1113_vm2, %v1449_v21, 0 }
 0xad4   : > { %2445 = vmatpush3.bf16.msra.mxu1 %v1454_v22 }
 0xad5   : > { %1765 = vmatprep.subr.bf16.mxu1 %v2640_v57 }
 0xad6   : > { %v1502_v44 = vpop.permute.xlu0 %1501 }
 0xadd   : > { %v2693_v23 = vpop.eup %2692 }
 0xade   : > { %v1442_v25 = vsel %vm1097_vm3, %v2693_v23, 0.0 }
 0xadf   : > { %1443 = vadd.xlane.f32.xlu1 %v1442_v25  ;;  %v2663_v25 = vld [vmem:[#allocation18] sm:$0xff]  }
 0xaf0   : > { %1497 = vrot.lane.b32.xlu1 %v1270_v48, %s3015_s0  ;;  %s3688_s0 = sld [smem:[#allocation25_spill]] }
 0xaf6   : > { %s2265_s17 = sshll.u32 %s3688_s0, 7  ;;  %s2908_s0 = sshll.u32 %s3017_s1, 4  ;;  %s2909_s0 = int_to_ptr.vmem [resolvable:$false] %s2908_s0 }
 0xaf7   : > { %s3572_s19 = scalar_lea.hbm %s3690_s11, %s2265_s17  ;;  %s2910_s23 = scalar_lea.vmem %s2909_s0, 256 }
 0xaf8   : > { %p2911_p0 = scmp.lt.s32.totalorder %s3574_s14, %s2909_s0 }
 0xb6c   : > { %v1444_v26 = vpop.xlane.xlu1 %1443 }
 0xb6d   : > { %2694 = vrcp.f32 %v1444_v26  ;;  %v2664_v26 = vld [vmem:[#allocation18 + $0x48] sm:$0xff]  }
 0xb70   : > { %v1498_v42 = vpop.permute.xlu1 %1497 }
 0xb71   : > { %v1508_v43 = vsel %vm1050_vm1, %v3487_v24, %v1498_v42 }
 0xb72   : > { %v1510_v45 = vsel %vm1509_vm4, %v1508_v43, %v1502_v44  ;;  %v1673_v43 = vld [vmem:[%s3687_s18] sm:$0x3]  ;;  %s2904_s18 = scalar_lea.vmem %s3574_s14, 128 }
 0xb73   : > { %p2905_p2 = scmp.ne.s32.totalorder %s3574_s14, %s2904_s18  ;;  %p2912_p7 = scmp.lt.s32.totalorder %s2910_s23, %s2904_s18 }
 0xb75   : > { %p2906_p10 = pnand %p2905_p2, %p3691_p9  ;;  %p2913_p5 = por %p2912_p7, %p2911_p0 }
 0xb77   : > { %v2695_v27 = vpop.eup %2694  ;;  %p2907_p1 = pneg %p2906_p10 }
 0xb78   : > { %v1446_v28 = vmul.f32 %v2695_v27, %v2693_v23  ;;  %v2662_v23 = vld [vmem:[#allocation18 + $0x40] sm:$0xff]   ;;  %v2665_v27 = vld [vmem:[#allocation18 + $0x8] sm:$0xff]  }
 0xb79   : > { %2320 = vmatprep.subr.bf16.mxu0 %v2662_v23  ;;  %p2914_p8 = pnand %p2913_p5, %p2907_p1 }
 0xb7a   : > { %v1447_v29 = vpack.c.bf16 %v1446_v28, %v1446_v28  ;;  %v2666_v28 = vld [vmem:[#allocation18 + $0x50] sm:$0xff]  }
 0xb7c   : > { %2447 = vmatmul.mubr.msk.bf16.vlgmr.msra.gmra.mrb[32].mxu1 %vm1097_vm3, %v1447_v29  ;;  %v2667_v29 = vld [vmem:[#allocation18 + $0x10] sm:$0xff]  }
 0xb7d   : > { %1766 = vmatpush1.bf16.msra.mxu1 %v2638_v55  ;;  %1797 = vmatprep.mubr.bf16.mxu1 %v3016_v12 }
 0xb7e   : > { %1767 = vmatprep.subr.bf16.mxu1 %v2643_v58 }
 0xb81   : > { %1768 = vmatpush1.bf16.msra.mxu1 %v2641_v59 }
 0xb82   : > { %1769 = vmatprep.subr.bf16.mxu1 %v2646_v60 }
 0xb85   : > { %1770 = vmatpush1.bf16.msra.mxu1 %v2644_v61 }
 0xb86   : > { %1771 = vmatprep.subr.bf16.mxu1 %v2649_v2 }
 0xb89   : > { %1772 = vmatpush1.bf16.msra.mxu1 %v2647_v56 }
 0xb8a   : > { %1773 = vmatprep.subr.bf16.mxu1 %v2652_v4 }
 0xb8d   : > { %1774 = vmatpush1.bf16.msra.mxu1 %v2650_v5 }
 0xb8e   : > { %1775 = vmatprep.subr.bf16.mxu1 %v2655_v6 }
 0xb91   : > { %1776 = vmatpush1.bf16.msra.mxu1 %v2653_v7  ;;  %v2263_v7 = vld [vmem:[%s3689_s27] ss:$0 sm:$0xff] }
 0xb92   : > { %1777 = vmatprep.subr.bf16.mxu1 %v2658_v8 }
 0xb95   : > { %1778 = vmatpush1.bf16.msra.mxu1 %v2656_v9 }
 0xb96   : > { %1779 = vmatprep.subr.bf16.mxu1 %v2661_v10 }
 0xb99   : > { %1780 = vmatpush1.bf16.msra.mxu1 %v2659_v11 }
 0xc4f   : > { %v1490_v38 = vpop.f32.mrb[32].mxu1 }
 0xc50   : > { %1505 = vrot.lane.b32.xlu1 %v1490_v38, %s3013_s10  ;;  %v2448_v39 = vpop.f32.mrb[33].mxu1  ;;  %v2676_v38 = vld [vmem:[#allocation18 + $0x78] sm:$0xff]  }
 0xc51   : > { %v1493_v40 = vpop.f32.mrb[34].mxu1  ;;  %v2677_v39 = vld [vmem:[#allocation18 + $0x38] sm:$0xff]  }
 0xc52   : > { %v2449_v41 = vpop.f32.mrb[35].mxu1  ;;  %v1675_v40 = vlaneseq }
 0xc54   : > { %v1676_v41 = vshrl.u32 %v1675_v40, 7 }
 0xc56   : > { %v1677_v42 = vsub.s32 0, %v1676_v41  ;;  %v1681_v44 = vsub.s32 1, %v1676_v41 }
 0xcc2   : > { %v1506_v46 = vpop.permute.xlu1 %1505 }
 0xcc3   : > { %v1512_v47 = vsel %vm1511_vm5, %v1510_v45, %v1506_v46  ;;  %v1678_v45 = vrot.slane %v1673_v43, %v1677_v42  ;;  %v1682_v46 = vrot.slane %v1673_v43, %v1681_v44 }
 0xcc4   : > { %v1513_v48 = vpack.c.bf16 %v1512_v47, %v1512_v47 }
 0xcc6   : > { %1514 = vst [vmem:[#allocation6] sm:$0xf] %v1513_v48 }
 0xccd   : > { %v1515_v3 = vld [vmem:[#allocation6] sm:$0xf] }
 0xcce   : > { %2467 = vmatmul.mubr.bf16.vlgmr.msra.gmra.mrb[8].mxu0 %v1515_v3 }
 0xccf   : > { %2321 = vmatpush3.bf16.msra.mxu0 %v2663_v25 }
 0xcd0   : > { %2322 = vmatprep.subr.bf16.mxu0 %v2664_v26 }
 0xcd3   : > { %2323 = vmatpush3.bf16.msra.mxu0 %v2665_v27 }
 0xcd4   : > { %2324 = vmatprep.subr.bf16.mxu0 %v2666_v28 }
 0xcd7   : > { %2325 = vmatpush3.bf16.msra.mxu0 %v2667_v29 }
 0xcd8   : > { %2326 = vmatprep.subr.bf16.mxu0 %v2668_v30 }
 0xcdb   : > { %2327 = vmatpush3.bf16.msra.mxu0 %v2669_v31 }
 0xcdc   : > { %2328 = vmatprep.subr.bf16.mxu0 %v2670_v32 }
 0xcdf   : > { %2329 = vmatpush3.bf16.msra.mxu0 %v2671_v33 }
 0xce0   : > { %2330 = vmatprep.subr.bf16.mxu0 %v2672_v34 }
 0xce3   : > { %2331 = vmatpush3.bf16.msra.mxu0 %v2673_v35 }
 0xce4   : > { %2332 = vmatprep.subr.bf16.mxu0 %v2674_v36 }
 0xce7   : > { %2333 = vmatpush3.bf16.msra.mxu0 %v2675_v37 }
 0xce8   : > { %2334 = vmatprep.subr.bf16.mxu0 %v2676_v38 }
 0xceb   : > { %2335 = vmatpush3.bf16.msra.mxu0 %v2677_v39 }
 0xda1   : > { %v1621_v50 = vpop.f32.mrb[8].mxu0 }
 0xda2   : > { %v1622_v51 = vadd.f32 %v2218_v49, %v1621_v50  ;;  %v2468_v52 = vpop.f32.mrb[9].mxu0 }
 0xda3   : > { %v1624_v53 = vpop.f32.mrb[10].mxu0 }
 0xda4   : > { %v3549_v24 = vadd.f32 %v1622_v51, %v3407_v0  ;;  %v2469_v54 = vpop.f32.mrb[11].mxu0 }
 0xda6   : > { %1630 = vadd.xlane.f32.xlu0 %v3549_v24 }
 0xe33   : > { %v1631_v62 = vpop.xlane.xlu0 %1630 }
 0xe34   : > { %v1633_v63 = vmul.f32 0.0078125, %v1631_v62 }
 0xe36   : > { %v1634_v0 = vsub.f32 %v3549_v24, %v1633_v63 }
 0xe38   : > { %v1635_v1 = vmul.f32 %v1634_v0, %v1634_v0 }
 0xe3a   : > { %1636 = vadd.xlane.f32.xlu1 %v1635_v1 }
 0xec7   : > { %v1637_v13 = vpop.xlane.xlu1 %1636 }
 0xec8   : > { %v1638_v14 = vmul.f32 0.0078125, %v1637_v13 }
 0xeca   : > { %v1639_v15 = vadd.f32 1e-05, %v1638_v14 }
 0xecc   : > { %2696 = vrsqrt.f32 %v1639_v15 }
 0xed6   : > { %v2697_v16 = vpop.eup %2696 }
 0xed7   : > { %v1641_v18 = vmul.f32 %v2697_v16, %v1634_v0 }
 0xed9   : > { %v1648_v20 = vmul.f32 %v2227_v17, %v1641_v18 }
 0xedb   : > { %v1655_v21 = vadd.f32 %v2228_v19, %v1648_v20 }
 0xedd   : > { %v1656_v22 = vpack.c.bf16 %v1655_v21, %v1655_v21 }
 0xedf   : > { %1798 = vmatmul.mubr.bf16.vlgmr.msra.gmra.mrb[36].mxu1 %v1656_v22 }
 0xfb2   : > { %v1799_v47 = vpop.f32.mrb[36].mxu1 }
 0xfb3   : > { %v1800_v48 = vadd.f32 %v1799_v47, %v1678_v45  ;;  %v1801_v3 = vpop.f32.mrb[37].mxu1 }
 0xfb4   : > { %v1802_v49 = vadd.f32 %v1801_v3, %v1682_v46  ;;  %v1803_v50 = vpop.f32.mrb[38].mxu1 }
 0xfb5   : > { %v2245_v51 = vmul.f32 -1.702, %v1800_v48  ;;  %v1804_v52 = vpop.f32.mrb[39].mxu1 }
 0xfb6   : > { %v2246_v53 = vmul.f32 -1.702, %v1802_v49 }
 0xfb7   : > { %v1810_v54 = vmul.f32 1.442695, %v2245_v51 }
 0xfb8   : > { %v1812_v55 = vmul.f32 1.442695, %v2246_v53 }
 0xfb9   : > { %2698 = vpow2.f32 %v1810_v54 }
 0xfba   : > { %2700 = vpow2.f32 %v1812_v55 }
 0xfc3   : > { %v2699_v57 = vpop.eup %2698 }
 0xfc4   : > { %v2701_v58 = vpop.eup %2700  ;;  %v1814_v59 = vadd.f32 1.0, %v2699_v57 }
 0xfc5   : > { %v1815_v60 = vadd.f32 1.0, %v2701_v58 }
 0xfc6   : > { %2702 = vrcp.f32 %v1814_v59 }
 0xfc7   : > { %2704 = vrcp.f32 %v1815_v60 }
 0xfd0   : > { %v2703_v61 = vpop.eup %2702 }
 0xfd1   : > { %v2705_v62 = vpop.eup %2704  ;;  %v1820_v63 = vmul.f32 %v2703_v61, %v1800_v48 }
 0xfd2   : > { %v1821_v0 = vmul.f32 %v2705_v62, %v1802_v49 }
 0xfd3   : > { %v1822_v2 = vpack.c.bf16 %v1820_v63, %v1820_v63 }
 0xfd4   : > { %v1823_v1 = vpack.c.bf16 %v1821_v0, %v1821_v0 }
 0xfd6   : > { %1984 = vmatprep.mubr.bf16.mxu0 %v1823_v1 }
 0xfd7   : > { %1985 = vmatmul.mubr.bf16.vlgmr.msra.gmra.mrb[12].mxu0 %v1822_v2 }
0x10aa   : > { %v2336_v56 = vpop.f32.mrb[12].mxu0 }
0x10ab   : > { %v2337_v4 = vpop.f32.mrb[13].mxu0 }
0x10ac   : > { %v2338_v5 = vadd.f32 %v2337_v4, %v2336_v56  ;;  %v2339_v6 = vpop.f32.mrb[14].mxu0 }
0x10ad   : > { %v2340_v8 = vpop.f32.mrb[15].mxu0 }
0x10ae   : > { %v1992_v9 = vadd.f32 %v2338_v5, %v3549_v24 }
0x10b0   : > { %v2000_v10 = vadd.f32 %v2263_v7, %v1992_v9 }
0x10b2   : > { %2001 = vst [vmem:[%s664_s4] sm:$0xff] %v2000_v10 }
0x10b3   : > { %2917 = shalt.err (!%p2914_p8)
}
0x10b4   : > { %s2918_s16 = scalar_lea.hbm %s3572_s19, 128  ;;  %s2922_s17 = scalar_lea.hbm %s3690_s11, 256 }
0x10b5   : > { %p2919_p3 = scmp.ne.s32.totalorder %s3572_s19, %s2918_s16  ;;  %p2923_p13 = scmp.lt.u32.totalorder %s3572_s19, %s3690_s11 }
0x10b6   : > { %p2924_p12 = scmp.lt.u32.totalorder %s2922_s17, %s2918_s16  ;;  %p2926_p2 = scmp.lt.u32.totalorder %s2918_s16, %s3572_s19 }
0x10b7   : > { %p2920_p11 = pnand %p2919_p3, %p3691_p9 }
0x10b8   : > { %p2925_p4 = por %p2924_p12, %p2923_p13 }
0x10b9   : > { %p2921_p6 = pneg %p2920_p11 }
0x10ba   : > { %p2927_p10 = por %p2926_p2, %p2925_p4 }
0x10bc   : > { %p2928_p1 = pnand %p2927_p10, %p2921_p6 }
0x10be   : > { %2931 = shalt.err (!%p2928_p1)
}
0x10bf   : > { %2496 = dma.vmem_to_hbm [thread:$0]  (%p3691_p9), %s3574_s14, 128, %s3572_s19, %s2003_s30  }
0x10c0 PF: > { %s2029_s10 = sand.u32 1, %s2978_s24   ;;  %p3692_p0 = scmp.ne.s32.totalorder %s3676_s22, 0 }
0x10c1   : > { %p3693_p7 = scmp.ge.s32.totalorder %s2998_s29, 2  ;;  %s2030_s18 = scalar_lea.sflag [#allocation9], %s2029_s10 }
0x10c3   : > { %p2522_p5 = pnand %p3693_p7, %p3692_p0 }
0x10c5   : > { %2973 = dma.done.wait (!%p2522_p5), %s2030_s18, 128  }
0x10c6   : > { %2975 = vsyncadd (!%p2522_p5), %s2030_s18, 4294967168  ;;  %s36_s29 = sadd.s32 1, %s2998_s29   ;;  %s3694_s24 = smov %s2982_s25 }
0x10c7   : > { %p33_p8 = scmp.ge.s32.totalorder %s36_s29, 4   ;;  %s3695_s25 = smov %s2986_s26 }
0x10c8   : > { %s3696_s26 = smov %s3335_s7  ;;  %s3697_s27 = smov %s2994_s28 }
0x10c9   : > { %s3698_s28 = smov %s3700_s20  ;;  %35 = sbr.rel (!%p33_p8) target bundleno = 22 (0x16), region = 163 }
0x10d0   :  { %2035 = vsyncpa [#allocation8], 1 }
0x10d1   :  { %2037 = vsyncpa [#allocation8 + $0x1], 1 }
0x10d2   :  { %2038 = vsyncpa [#allocation11], 1 }
0x10d3   :  { %2039 = vsyncpa [#allocation14], 1 }
0x10d4   :  { %2040 = vsyncpa [#allocation17], 1 }
0x10d5   :  { %2041 = vsyncpa [#allocation9], 1 }
0x10d6   :  { %2043 = vsyncpa [#allocation9 + $0x1], 1 }

// kernel: tpu_custom_call.1
= control target key start
LH: loop header
LB: loop body
LE: loop exit
PB: predicated region body
PF: predicated region fallthrough
CT: control target
= control target key end

     0   :  { %s3621_s0 = inlined_call_operand.hbm [shape: f32[2,8,128], index: 0, kind: input, shape index: {}]   ;;  %s3622_s1 = inlined_call_operand.vmem [shape: f32[1,128], index: 1, kind: input, shape index: {}]   ;;  %s3623_s2 = inlined_call_operand.vmem [shape: f32[1,128], index: 2, kind: input, shape index: {}]   ;;  %s3624_s3 = inlined_call_operand.hbm [shape: bf16[128,128], index: 3, kind: input, shape index: {}]   ;;  %s3625_s4 = inlined_call_operand.vmem [shape: f32[1,128], index: 4, kind: input, shape index: {}]   ;;  %s3626_s5 = inlined_call_operand.hbm [shape: bf16[128,128], index: 5, kind: input, shape index: {}]   ;;  %s3627_s6 = inlined_call_operand.vmem [shape: f32[1,128], index: 6, kind: input, shape index: {}]   ;;  %s3628_s7 = inlined_call_operand.hbm [shape: bf16[128,128], index: 7, kind: input, shape index: {}]   ;;  %s3629_s8 = inlined_call_operand.vmem [shape: f32[1,128], index: 8, kind: input, shape index: {}]   ;;  %s3630_s9 = inlined_call_operand.hbm [shape: bf16[128,128], index: 9, kind: input, shape index: {}]   ;;  %s3631_s10 = inlined_call_operand.vmem [shape: f32[1,128], index: 10, kind: input, shape index: {}]   ;;  %s3632_s11 = inlined_call_operand.vmem [shape: f32[1,128], index: 11, kind: input, shape index: {}]   ;;  %s3633_s12 = inlined_call_operand.vmem [shape: f32[1,128], index: 12, kind: input, shape index: {}]   ;;  %s3634_s13 = inlined_call_operand.hbm [shape: bf16[128,256], index: 13, kind: input, shape index: {}]   ;;  %s3635_s14 = inlined_call_operand.vmem [shape: f32[1,256], index: 14, kind: input, shape index: {}]   ;;  %s3636_s15 = inlined_call_operand.hbm [shape: bf16[256,128], index: 15, kind: input, shape index: {}]   ;;  %s3637_s16 = inlined_call_operand.vmem [shape: f32[1,128], index: 16, kind: input, shape index: {}]   ;;  %s3638_s17 = inlined_call_operand.hbm [shape: f32[2,8,128], index: 17, kind: output, shape index: {}]  }
   0x1   :  { %3650 = sst [smem:[#allocation26_spill]] %s3621_s0 }
   0x2   :  { %3651 = sst [smem:[#allocation27_spill]] %s3622_s1 }
   0x3   :  { %3652 = sst [smem:[#allocation28_spill]] %s3624_s3 }
   0x4   :  { %3653 = sst [smem:[#allocation29_spill]] %s3625_s4 }
   0x5   :  { %3654 = sst [smem:[#allocation30_spill]] %s3628_s7 }
   0x6   :  { %3655 = sst [smem:[#allocation31_spill]] %s3629_s8 }
   0x7   :  { %3656 = sst [smem:[#allocation32_spill]] %s3631_s10 }
   0x8   :  { %3657 = sst [smem:[#allocation33_spill]] %s3632_s11 }
   0x9   :  { %3658 = sst [smem:[#allocation34_spill]] %s3633_s12 }
   0xa   :  { %3659 = sst [smem:[#allocation35_spill]] %s3635_s14 }
   0xb   :  { %3660 = sst [smem:[#allocation36_spill]] %s3637_s16 }
   0xc   :  { %3661 = sst [smem:[#allocation37_spill]] %s3638_s17 }
   0xd   :  { %22 = vsyncpa [#allocation8], 0 }
   0xe   :  { %24 = vsyncpa [#allocation8 + $0x1], 0 }
   0xf   :  { %25 = vsyncpa [#allocation11], 0 }
  0x10   :  { %26 = vsyncpa [#allocation14], 0 }
  0x11   :  { %27 = vsyncpa [#allocation17], 0 }
  0x12   :  { %28 = vsyncpa [#allocation9], 0 }
  0x13   :  { %30 = vsyncpa [#allocation9 + $0x1], 0  ;;  %s3108_s24 = smov 0   ;;  %s3110_s25 = smov 0  }
  0x14   :  { %s3112_s26 = smov 0   ;;  %s3114_s27 = smov 0  }
  0x15   :  { %s3116_s28 = smov 0   ;;  %s3118_s29 = smov 0  }
  0x16 LB: > { %3662 = sst [smem:[#allocation25_spill]] %s2990_s27  ;;  %s3640_s0 = sadd.s32 4294967295, %s2998_s29   ;;  %s2998_s29 = sphi %s3118_s29, %s36_s29   ;;  %s2994_s28 = sphi %s3116_s28, %s3698_s28   ;;  %s2990_s27 = sphi %s3114_s27, %s3697_s27   ;;  %s2986_s26 = sphi %s3112_s26, %s3696_s26   ;;  %s2982_s25 = sphi %s3110_s25, %s3695_s25   ;;  %s2978_s24 = sphi %s3108_s24, %s3694_s24  }
  0x17   : > { %p2159_p0 = scmp.ge.s32.totalorder %s2998_s29, 1  ;;  %p3142_p1 = scmp.eq.s32.totalorder %s3640_s0, 0 }
  0x18   : > { %p443_p2 = scmp.lt.s32.totalorder %s2998_s29, 3  ;;  %s3000_s19 = smov [#allocation10]  }
  0x19   : > { %s3663_s30 = scalar_select %p3142_p1, 1, 0 }
  0x1a   : > { %p3147_p3 = pnand %p2159_p0, %p443_p2  ;;  %s461_s1 = sshll.u32 %s3000_s19, 4  ;;  %s3151_s1 = int_to_ptr.vmem [resolvable:$true] %s461_s1 }
  0x1b   : > { %s3001_s21 = smov [#allocation13]   ;;  %s3002_s23 = smov [#allocation16]  }
  0x1c   : > { %s3664_s18 = scalar_select %p3147_p3, 1, 0 }
  0x1d   : > { %p2498_p4 = pneg %p3147_p3  ;;  %s493_s22 = sshll.u32 %s3001_s21, 4  ;;  %s3162_s22 = int_to_ptr.vmem [resolvable:$true] %s493_s22 }
  0x1e   : > { %s3164_s0 = sshll.u32 %s3002_s23, 4  ;;  %s3666_s3 = sld [smem:[#allocation28_spill]]  ;;  %s532_s0 = int_to_ptr.vmem [resolvable:$true] %s3164_s0 }
  0x1f   : > { %p3158_p6 = pnand %p2498_p4, %p3142_p1 }
  0x21   : > { %p3174_p8 = pneg %p3158_p6 }
  0x24   : > { %s2706_s16 = scalar_lea.hbm %s3666_s3, 1024 }
  0x25   : > { %p2707_p7 = scmp.ne.s32.totalorder %s3666_s3, %s2706_s16  ;;  %p2713_p11 = scmp.lt.u32.totalorder %s2706_s16, %s3666_s3 }
  0x27   : > { %p2709_p9 = pnand %p3174_p8, %p2707_p7 }
  0x29   : > { %p2710_p10 = pneg %p2709_p9 }
  0x2b   : > { %p2715_p12 = pnand %p2713_p11, %p2710_p10 }
  0x2d   : > { %2718 = shalt.err (!%p2715_p12)
}
  0x2e   : > { %s2719_s14 = scalar_lea.vmem %s3151_s1, 1024  ;;  %p2727_p4 = scmp.lt.s32.totalorder %s3151_s1, %s3151_s1 }
  0x2f   : > { %p2720_p13 = scmp.ne.s32.totalorder %s3151_s1, %s2719_s14  ;;  %p2728_p5 = scmp.lt.s32.totalorder %s2719_s14, %s2719_s14 }
  0x31   : > { %p2722_p0 = pnand %p2720_p13, %p3174_p8  ;;  %p2729_p7 = por %p2728_p5, %p2727_p4 }
  0x33   : > { %p2723_p2 = pneg %p2722_p0 }
  0x35   : > { %p2730_p9 = pnand %p2729_p7, %p2723_p2 }
  0x37   : > { %2733 = shalt.err (!%p2730_p9)
}
  0x38   : > { %s3645_s17 = smov 64   ;;  %s3647_s16 = smov 4  }
  0x39   : > { %2501 = dma.hbm_to_vmem [thread:$0]  (!%p3158_p6), %s3666_s3, 1024, %s3151_s1, [#allocation11], %s3645_s17, %s3645_s17, %s3647_s16  }
  0x3a   : > { %s3668_s7 = sld [smem:[#allocation30_spill]] }
  0x40   : > { %s2734_s14 = scalar_lea.hbm %s3668_s7, 1024 }
  0x41   : > { %p2735_p5 = scmp.ne.s32.totalorder %s3668_s7, %s2734_s14  ;;  %p2741_p12 = scmp.lt.u32.totalorder %s2734_s14, %s3668_s7 }
  0x43   : > { %p2737_p10 = pnand %p2735_p5, %p3174_p8 }
  0x45   : > { %p2738_p11 = pneg %p2737_p10 }
  0x47   : > { %p2743_p13 = pnand %p2741_p12, %p2738_p11 }
  0x49   : > { %2746 = shalt.err (!%p2743_p13)
}
  0x4a   : > { %s2747_s1 = scalar_lea.vmem %s3162_s22, 1024  ;;  %p2755_p7 = scmp.lt.s32.totalorder %s3162_s22, %s3162_s22 }
  0x4b   : > { %p2748_p0 = scmp.ne.s32.totalorder %s3162_s22, %s2747_s1  ;;  %p2756_p9 = scmp.lt.s32.totalorder %s2747_s1, %s2747_s1 }
  0x4d   : > { %p2750_p2 = pnand %p2748_p0, %p3174_p8  ;;  %p2757_p5 = por %p2756_p9, %p2755_p7 }
  0x4f   : > { %p2751_p4 = pneg %p2750_p2 }
  0x51   : > { %p2758_p10 = pnand %p2757_p5, %p2751_p4 }
  0x53   : > { %2761 = shalt.err (!%p2758_p10)
}
  0x54   : > { %2507 = dma.hbm_to_vmem [thread:$0]  (!%p3158_p6), %s3668_s7, 1024, %s3162_s22, [#allocation14], %s3645_s17, %s3645_s17, %s3647_s16  }
  0x55   : > { %s2762_s27 = scalar_lea.hbm %s3634_s13, 2048 }
  0x56   : > { %p2763_p11 = scmp.ne.s32.totalorder %s3634_s13, %s2762_s27  ;;  %p2769_p0 = scmp.lt.u32.totalorder %s2762_s27, %s3634_s13 }
  0x58   : > { %p2765_p12 = pnand %p2763_p11, %p3174_p8 }
  0x5a   : > { %p2766_p13 = pneg %p2765_p12 }
  0x5c   : > { %p2771_p2 = pnand %p2769_p0, %p2766_p13 }
  0x5e   : > { %2774 = shalt.err (!%p2771_p2)
}
  0x5f   : > { %s2775_s1 = scalar_lea.vmem %s532_s0, 2048  ;;  %p2783_p5 = scmp.lt.s32.totalorder %s532_s0, %s532_s0 }
  0x60   : > { %p2776_p4 = scmp.ne.s32.totalorder %s532_s0, %s2775_s1  ;;  %p2784_p10 = scmp.lt.s32.totalorder %s2775_s1, %s2775_s1 }
  0x62   : > { %p2778_p7 = pnand %p2776_p4, %p3174_p8  ;;  %p2785_p3 = por %p2784_p10, %p2783_p5 }
  0x64   : > { %p2779_p9 = pneg %p2778_p7 }
  0x66   : > { %p2786_p1 = pnand %p2785_p3, %p2779_p9 }
  0x68   : > { %2789 = shalt.err (!%p2786_p1)
}
  0x69   : > { %s3005_s22 = smov 128   ;;  %s3006_s4 = smov 8  }
  0x6a   : > { %2513 = dma.hbm_to_vmem [thread:$0]  (!%p3158_p6), %s3634_s13, 2048, %s532_s0, [#allocation17], %s3005_s22, %s3005_s22, %s3006_s4  }
  0x6b   : > { %s3007_s11 = smov [#allocation12]   ;;  %s3008_s19 = smov [#allocation15]  }
  0x6c   : > { %s477_s27 = sshll.u32 %s3007_s11, 4  ;;  %s509_s21 = sshll.u32 %s3008_s19, 4  ;;  %s478_s27 = int_to_ptr.vmem [resolvable:$true] %s477_s27  ;;  %s510_s21 = int_to_ptr.vmem [resolvable:$true] %s509_s21 }
  0x6d   : > { %s2790_s1 = scalar_lea.hbm %s3626_s5, 1024 }
  0x6e   : > { %p2791_p1 = scmp.ne.s32.totalorder %s3626_s5, %s2790_s1  ;;  %p2797_p12 = scmp.lt.u32.totalorder %s2790_s1, %s3626_s5 }
  0x70   : > { %p2793_p3 = pnand %p2791_p1, %p3174_p8 }
  0x72   : > { %p2794_p11 = pneg %p2793_p3 }
  0x74   : > { %p2799_p13 = pnand %p2797_p12, %p2794_p11 }
  0x76   : > { %2802 = shalt.err (!%p2799_p13)
}
  0x77   : > { %s2803_s0 = scalar_lea.vmem %s478_s27, 1024  ;;  %p2811_p7 = scmp.lt.s32.totalorder %s478_s27, %s478_s27 }
  0x78   : > { %p2804_p0 = scmp.ne.s32.totalorder %s478_s27, %s2803_s0  ;;  %p2812_p9 = scmp.lt.s32.totalorder %s2803_s0, %s2803_s0 }
  0x7a   : > { %p2806_p2 = pnand %p2804_p0, %p3174_p8  ;;  %p2813_p5 = por %p2812_p9, %p2811_p7 }
  0x7c   : > { %p2807_p4 = pneg %p2806_p2 }
  0x7e   : > { %p2814_p10 = pnand %p2813_p5, %p2807_p4 }
  0x80   : > { %2817 = shalt.err (!%p2814_p10)
}
  0x81   : > { %s3669_s17 = smov 4   ;;  %s3670_s16 = smov 64  }
  0x82   : > { %2504 = dma.hbm_to_vmem [thread:$0]  (!%p3158_p6), %s3626_s5, 1024, %s478_s27, [#allocation11], %s3670_s16, %s3670_s16, %s3669_s17  }
  0x83   : > { %s2818_s8 = scalar_lea.hbm %s3630_s9, 1024 }
  0x84   : > { %p2819_p1 = scmp.ne.s32.totalorder %s3630_s9, %s2818_s8  ;;  %p2825_p12 = scmp.lt.u32.totalorder %s2818_s8, %s3630_s9 }
  0x86   : > { %p2821_p3 = pnand %p2819_p1, %p3174_p8 }
  0x88   : > { %p2822_p11 = pneg %p2821_p3 }
  0x8a   : > { %p2827_p13 = pnand %p2825_p12, %p2822_p11 }
  0x8c   : > { %2830 = shalt.err (!%p2827_p13)
}
  0x8d   : > { %s2831_s14 = scalar_lea.vmem %s510_s21, 1024  ;;  %p2839_p7 = scmp.lt.s32.totalorder %s510_s21, %s510_s21 }
  0x8e   : > { %p2832_p0 = scmp.ne.s32.totalorder %s510_s21, %s2831_s14  ;;  %p2840_p9 = scmp.lt.s32.totalorder %s2831_s14, %s2831_s14 }
  0x90   : > { %p2834_p2 = pnand %p2832_p0, %p3174_p8  ;;  %p2841_p5 = por %p2840_p9, %p2839_p7 }
  0x92   : > { %p2835_p4 = pneg %p2834_p2 }
  0x94   : > { %p2842_p10 = pnand %p2841_p5, %p2835_p4 }
  0x96   : > { %2845 = shalt.err (!%p2842_p10)
}
  0x97   : > { %2510 = dma.hbm_to_vmem [thread:$0]  (!%p3158_p6), %s3630_s9, 1024, %s510_s21, [#allocation14], %s3670_s16, %s3670_s16, %s3669_s17  }
  0x98   : > { %s3009_s0 = smov [#allocation18]   ;;  %s2846_s4 = scalar_lea.hbm %s3636_s15, 2048 }
  0x99   : > { %s547_s3 = sshll.u32 %s3009_s0, 4  ;;  %p2847_p1 = scmp.ne.s32.totalorder %s3636_s15, %s2846_s4  ;;  %s548_s3 = int_to_ptr.vmem [resolvable:$true] %s547_s3 }
  0x9a   : > { %p2853_p12 = scmp.lt.u32.totalorder %s2846_s4, %s3636_s15 }
  0x9b   : > { %p2849_p3 = pnand %p2847_p1, %p3174_p8 }
  0x9d   : > { %p2850_p11 = pneg %p2849_p3 }
  0x9f   : > { %p2855_p13 = pnand %p2853_p12, %p2850_p11 }
  0xa1   : > { %2858 = shalt.err (!%p2855_p13)
}
  0xa2   : > { %s2859_s21 = scalar_lea.vmem %s548_s3, 2048  ;;  %p2867_p7 = scmp.lt.s32.totalorder %s548_s3, %s548_s3 }
  0xa3   : > { %p2860_p0 = scmp.ne.s32.totalorder %s548_s3, %s2859_s21  ;;  %p2868_p9 = scmp.lt.s32.totalorder %s2859_s21, %s2859_s21 }
  0xa5   : > { %p2862_p2 = pnand %p2860_p0, %p3174_p8  ;;  %p2869_p5 = por %p2868_p9, %p2867_p7 }
  0xa7   : > { %p2863_p4 = pneg %p2862_p2 }
  0xa9   : > { %p2870_p10 = pnand %p2869_p5, %p2863_p4 }
  0xab   : > { %2873 = shalt.err (!%p2870_p10)
}
  0xac   : > { %2516 = dma.hbm_to_vmem [thread:$0]  (!%p3158_p6), %s3636_s15, 2048, %s548_s3, [#allocation17], %s3670_s16, %s3670_s16, %s3669_s17  }
  0xad   : > { %s2158_s12 = sadd.s32 4294967294, %s2998_s29   ;;  %s48_s20 = sadd.s32 1, %s2994_s28 }
  0xae   : > { %p50_p8 = scmp.ge.s32.totalorder %s48_s20, 2  ;;  %s55_s27 = sadd.s32 1, %s2986_s26 }
  0xaf   : > { %p62_p1 = scmp.ne.s32.totalorder %s2986_s26, %s2982_s25  ;;  %p63_p3 = scmp.eq.s32.totalorder %s2998_s29, 0 }
  0xb0   : > { %s3700_s20 = smov (%p50_p8, %s48_s20), 0  ;;  %p68_p12 = scmp.ne.s32.totalorder %s2982_s25, %s2978_s24 }
  0xb1   : > { %p3314_p11 = por %p63_p3, %p62_p1  ;;  %s52_s17 = ssub.s32 %s2994_s28, %s3700_s20 }
  0xb2   : > { %s3672_s16 = sadd.s32 4294967295, %s2998_s29   ;;  %p53_p13 = scmp.eq.s32.totalorder %s52_s17, 0 }
  0xb3   : > { %p430_p6 = scmp.eq.s32.totalorder %s3672_s16, 1  ;;  %p3673_p0 = scmp.ne.s32.totalorder %s3663_s30, 0 }
  0xb4   : > { %p436_p7 = scmp.eq.s32.totalorder %s2158_s12, 1  ;;  %p2531_p5 = scmp.lt.s32.totalorder %s2998_s29, 2 }
  0xb5   : > { %p3326_p2 = por %p3673_p0, %p68_p12  ;;  %p3330_p4 = por %p430_p6, %p62_p1 }
  0xb6   : > { %s3335_s7 = scalar_select %p53_p13, %s2986_s26, %s55_s27  }
  0xb7   : > { %s3675_s3 = scalar_select %p3330_p4, 1, 0 }
  0xb8   : > { %p3337_p9 = por %p436_p7, %p68_p12  ;;  %s564_s4 = sand.u32 1, %s2986_s26  }
  0xb9   : > { %s2168_s8 = sshll.u32 %s2994_s28, 7  ;;  %s2167_s10 = sshll.u32 %s564_s4, 3 }
  0xba   : > { %s3676_s22 = scalar_select %p3337_p9, 1, 0 }
  0xbb   : > { %s3677_s21 = sld [smem:[#allocation26_spill]]  ;;  %s568_s14 = scalar_lea.vmem [#allocation7], %s2167_s10 }
  0xbc   : > { %s575_s12 = sshll.u32 %s568_s14, 4  ;;  %p3351_p10 = pnand %p2531_p5, %p3314_p11  ;;  %s3355_s12 = int_to_ptr.vmem [resolvable:$true] %s575_s12 }
  0xbd   : > { %s565_s17 = scalar_lea.sflag [#allocation8], %s564_s4 }
  0xbe   : > { %p2876_p1 = pneg %p3351_p10 }
  0xc1   : > { %s3347_s23 = scalar_lea.hbm %s3677_s21, %s2168_s8  ;;  %s2879_s1 = scalar_lea.hbm %s3677_s21, 256 }
  0xc2   : > { %s2874_s16 = scalar_lea.hbm %s3347_s23, 128  ;;  %p2880_p11 = scmp.lt.u32.totalorder %s3347_s23, %s3677_s21 }
  0xc3   : > { %p2875_p8 = scmp.ne.s32.totalorder %s3347_s23, %s2874_s16  ;;  %p2881_p6 = scmp.lt.u32.totalorder %s2879_s1, %s2874_s16 }
  0xc4   : > { %p2883_p0 = scmp.lt.u32.totalorder %s2874_s16, %s3347_s23 }
  0xc5   : > { %p2877_p3 = pnand %p2876_p1, %p2875_p8  ;;  %p2882_p13 = por %p2881_p6, %p2880_p11 }
  0xc7   : > { %p2878_p12 = pneg %p2877_p3  ;;  %p2884_p7 = por %p2883_p0, %p2882_p13 }
  0xc9   : > { %p2885_p5 = pnand %p2884_p7, %p2878_p12 }
  0xcb   : > { %2888 = shalt.err (!%p2885_p5)
}
  0xcc   : > { %s2889_s4 = scalar_lea.vmem %s3355_s12, 128  ;;  %s3010_s14 = smov [#allocation7]  }
  0xcd   : > { %p2890_p8 = scmp.ne.s32.totalorder %s3355_s12, %s2889_s4  ;;  %s2894_s8 = sshll.u32 %s3010_s14, 4  ;;  %s2895_s8 = int_to_ptr.vmem [resolvable:$false] %s2894_s8 }
  0xce   : > { %s2896_s10 = scalar_lea.vmem %s2895_s8, 256  ;;  %p2897_p4 = scmp.lt.s32.totalorder %s3355_s12, %s2895_s8 }
  0xcf   : > { %p2892_p3 = pnand %p2890_p8, %p2876_p1  ;;  %p2898_p11 = scmp.lt.s32.totalorder %s2896_s10, %s2889_s4 }
  0xd1   : > { %p2893_p9 = pneg %p2892_p3  ;;  %p2899_p6 = por %p2898_p11, %p2897_p4 }
  0xd3   : > { %p2900_p13 = pnand %p2899_p6, %p2893_p9 }
  0xd5   : > { %2903 = shalt.err (!%p2900_p13)
}
  0xd6   : > { %2520 = dma.hbm_to_vmem [thread:$0]  (!%p3351_p10), %s3347_s23, 128, %s3355_s12, %s565_s17  }
  0xd7   : > { %p3679_p12 = scmp.ne.s32.totalorder %s3664_s18, 0 }
  0xd8   : > { %s3385_s16 = sand.u32 (!%p3679_p12), 1, %s2982_s25  }
  0xd9   : > { %584 = sbr.rel (%p3679_p12) target bundleno = 4288 (0x10c0), region = 88  ;;  %s2170_s1 = sshll.u32 (!%p3679_p12), %s3385_s16, 3 }
  0xda   : > { %s587_s11 = scalar_lea.sflag (!%p3679_p12), [#allocation8], %s3385_s16  ;;  %s590_s19 = scalar_lea.vmem (!%p3679_p12), [#allocation7], %s2170_s1 }
  0xe0   : > { %2957 = dma.done.wait (%p3326_p2), %s587_s11, 128  }
  0xe1   : > { %2959 = vsyncadd (%p3326_p2), %s587_s11, 4294967168  ;;  %p3680_p4 = scmp.ne.s32.totalorder %s3663_s30, 0 }
  0xe3   : > { %2961 = dma.done.wait (%p3680_p4), [#allocation11], 2048  }
  0xe4   : > { %2963 = vsyncadd (%p3680_p4), [#allocation11], 4294965248 }
  0xe5   : > { %2965 = dma.done.wait (%p3680_p4), [#allocation14], 2048  }
  0xe6   : > { %2967 = vsyncadd (%p3680_p4), [#allocation14], 4294965248 }
  0xe7   : > { %2969 = dma.done.wait (%p3680_p4), [#allocation17], 4096  }
  0xe8   : > { %2971 = vsyncadd (%p3680_p4), [#allocation17], 4294963200  ;;  %v3407_v0 = vld [vmem:[%s590_s19] sm:$0xff]  ;;  %v2603_v1 = vld [vmem:[#allocation12] sm:$0xff]   ;;  %v3011_v3 = vmov 0.0   ;;  %vm3012_vm0 = vmmov 0  }
  0xe9   : > { %673 = vadd.xlane.f32.xlu0 %v3407_v0  ;;  %v2604_v2 = vld [vmem:[#allocation13] sm:$0xff]   ;;  %2342 = vmatprep.subr.bf16.mxu0 %v3011_v3  ;;  %v2605_v4 = vld [vmem:[#allocation12 + $0x8] sm:$0xff]   ;;  %v2607_v6 = vld [vmem:[#allocation12 + $0x10] sm:$0xff]   ;;  %s3681_s0 = sld [smem:[#allocation27_spill]]  ;;  %s3682_s8 = sld [smem:[#allocation31_spill]]  ;;  %vm1050_vm1 = vcmask 261120  }
  0xea   : > { %2362 = vmatprep.subr.bf16.mxu1 %v3011_v3  ;;  %v2606_v5 = vld [vmem:[#allocation13 + $0x8] sm:$0xff]   ;;  %2343 = vmatpush3.bf16.msra.mxu0 %v2603_v1  ;;  %v2608_v11 = vld [vmem:[#allocation13 + $0x10] sm:$0xff]   ;;  %v2609_v12 = vld [vmem:[#allocation12 + $0x18] sm:$0xff]   ;;  %s3013_s10 = smov 96   ;;  %s3683_s30 = sld [smem:[#allocation29_spill]]  ;;  %vm1113_vm2 = vcmask 1043456  }
  0xeb   : > { %2363 = vmatpush3.bf16.msra.mxu1 %v2604_v2  ;;  %2344 = vmatprep.subr.bf16.mxu0 %v3011_v3  ;;  %v2610_v13 = vld [vmem:[#allocation13 + $0x18] sm:$0xff]   ;;  %v2611_v14 = vld [vmem:[#allocation12 + $0x20] sm:$0xff]   ;;  %v2613_v16 = vld [vmem:[#allocation12 + $0x28] sm:$0xff]   ;;  %vm1097_vm3 = vcmask 64512   ;;  %s3014_s18 = smov 64   ;;  %vm1509_vm4 = vcmask 523264  }
  0xec   : > { %2364 = vmatprep.subr.bf16.mxu1 %v3011_v3  ;;  %v2612_v15 = vld [vmem:[#allocation13 + $0x20] sm:$0xff]   ;;  %2358 = vmatprep.mubr.msk.bf16.mxu0 %vm3012_vm0, %v3011_v3  ;;  %v2614_v17 = vld [vmem:[#allocation13 + $0x28] sm:$0xff]   ;;  %v2615_v18 = vld [vmem:[#allocation12 + $0x30] sm:$0xff]   ;;  %vm1511_vm5 = vcmask 785408   ;;  %s3684_s27 = sld [smem:[#allocation32_spill]]  ;;  %s3685_s14 = sld [smem:[#allocation33_spill]] }
  0xed   : > { %2378 = vmatprep.mubr.msk.bf16.mxu1 %vm3012_vm0, %v3011_v3  ;;  %v2616_v19 = vld [vmem:[#allocation13 + $0x30] sm:$0xff]   ;;  %v2617_v20 = vld [vmem:[#allocation12 + $0x38] sm:$0xff]   ;;  %v2179_v28 = vld [vmem:[%s3623_s2] ss:$0 sm:$0xff]  ;;  %s3686_s11 = sld [smem:[#allocation34_spill]]  ;;  %s664_s4 = scalar_lea.vmem [#allocation19], %s2170_s1 }
  0xee   : > { %2345 = vmatpush3.bf16.msra.mxu0 %v2605_v4  ;;  %v2618_v21 = vld [vmem:[#allocation13 + $0x38] sm:$0xff]   ;;  %v2619_v31 = vld [vmem:[#allocation10] sm:$0xff]   ;;  %v2620_v33 = vld [vmem:[#allocation10 + $0x8] sm:$0xff]   ;;  %p3691_p9 = scmp.ne.s32.totalorder %s3675_s3, 0  ;;  %s3017_s1 = smov [#allocation19]  }
  0xef   : > { %2365 = vmatpush3.bf16.msra.mxu1 %v2606_v5  ;;  %2346 = vmatprep.subr.bf16.mxu0 %v3011_v3  ;;  %v2178_v26 = vld [vmem:[%s3681_s0] ss:$0 sm:$0xff]  ;;  %v2621_v34 = vld [vmem:[#allocation10 + $0x10] sm:$0xff]   ;;  %v2622_v35 = vld [vmem:[#allocation10 + $0x18] sm:$0xff]   ;;  %s3015_s0 = smov 32  }
  0xf0   : > { %2366 = vmatprep.subr.bf16.mxu1 %v3011_v3  ;;  %v2623_v36 = vld [vmem:[#allocation10 + $0x20] sm:$0xff]   ;;  %v2624_v37 = vld [vmem:[#allocation10 + $0x28] sm:$0xff]   ;;  %v2625_v38 = vld [vmem:[#allocation10 + $0x30] sm:$0xff]  }
  0xf1   : > { %v2626_v39 = vld [vmem:[#allocation10 + $0x38] sm:$0xff]   ;;  %v2180_v40 = vld [vmem:[%s3627_s6] ss:$0 sm:$0xff] }
  0xf2   : > { %2347 = vmatpush3.bf16.msra.mxu0 %v2607_v6  ;;  %v2189_v41 = vld [vmem:[%s3682_s8] ss:$0 sm:$0xff] }
  0xf3   : > { %2348 = vmatprep.subr.bf16.mxu0 %v3011_v3  ;;  %2367 = vmatpush3.bf16.msra.mxu1 %v2608_v11  ;;  %v2198_v57 = vld [vmem:[%s3683_s30] ss:$0 sm:$0xff]  ;;  %s2003_s30 = scalar_lea.sflag [#allocation9], %s3385_s16 }
  0xf4   : > { %2368 = vmatprep.subr.bf16.mxu1 %v3011_v3 }
  0xf6   : > { %2349 = vmatpush3.bf16.msra.mxu0 %v2609_v12 }
  0xf7   : > { %2369 = vmatpush3.bf16.msra.mxu1 %v2610_v13  ;;  %2350 = vmatprep.subr.bf16.mxu0 %v3011_v3 }
  0xf8   : > { %2370 = vmatprep.subr.bf16.mxu1 %v3011_v3 }
  0xfa   : > { %2351 = vmatpush3.bf16.msra.mxu0 %v2611_v14 }
  0xfb   : > { %2371 = vmatpush3.bf16.msra.mxu1 %v2612_v15  ;;  %2352 = vmatprep.subr.bf16.mxu0 %v3011_v3 }
  0xfc   : > { %2372 = vmatprep.subr.bf16.mxu1 %v3011_v3 }
  0xfe   : > { %2353 = vmatpush3.bf16.msra.mxu0 %v2613_v16 }
  0xff   : > { %2373 = vmatpush3.bf16.msra.mxu1 %v2614_v17  ;;  %2354 = vmatprep.subr.bf16.mxu0 %v3011_v3 }
 0x100   : > { %2374 = vmatprep.subr.bf16.mxu1 %v3011_v3 }
 0x102   : > { %2355 = vmatpush3.bf16.msra.mxu0 %v2615_v18 }
 0x103   : > { %2375 = vmatpush3.bf16.msra.mxu1 %v2616_v19  ;;  %2356 = vmatprep.subr.bf16.mxu0 %v3011_v3 }
 0x104   : > { %2376 = vmatprep.subr.bf16.mxu1 %v3011_v3 }
 0x106   : > { %2357 = vmatpush3.bf16.msra.mxu0 %v2617_v20 }
 0x107   : > { %2377 = vmatpush3.bf16.msra.mxu1 %v2618_v21  ;;  %2382 = vmatprep.subr.bf16.mxu0 %v3011_v3 }
 0x108   : > { %2402 = vmatprep.subr.bf16.mxu1 %v3011_v3 }
 0x176   : > { %v674_v7 = vpop.xlane.xlu0 %673 }
 0x177   : > { %v676_v8 = vmul.f32 0.0078125, %v674_v7 }
 0x179   : > { %v677_v9 = vsub.f32 %v3407_v0, %v676_v8 }
 0x17b   : > { %v678_v10 = vmul.f32 %v677_v9, %v677_v9 }
 0x17d   : > { %679 = vadd.xlane.f32.xlu0 %v678_v10 }
 0x20a   : > { %v680_v22 = vpop.xlane.xlu0 %679 }
 0x20b   : > { %v681_v23 = vmul.f32 0.0078125, %v680_v22 }
 0x20d   : > { %v682_v24 = vadd.f32 1e-05, %v681_v23 }
 0x20f   : > { %2678 = vrsqrt.f32 %v682_v24 }
 0x219   : > { %v2679_v25 = vpop.eup %2678 }
 0x21a   : > { %v684_v27 = vmul.f32 %v2679_v25, %v677_v9 }
 0x21c   : > { %v691_v29 = vmul.f32 %v2178_v26, %v684_v27 }
 0x21e   : > { %v698_v30 = vadd.f32 %v2179_v28, %v691_v29 }
 0x220   : > { %v700_v32 = vpack.c.bf16 %v698_v30, %v698_v30 }
 0x222   : > { %2359 = vmatmul.mubr.bf16.vlgmr.msra.gmra.mrb[0].mxu0 %v700_v32  ;;  %2379 = vmatmul.mubr.bf16.vlgmr.msra.gmra.mrb[0].mxu1 %v700_v32 }
 0x223   : > { %2383 = vmatpush3.bf16.msra.mxu0 %v2619_v31  ;;  %2398 = vmatprep.mubr.msk.bf16.mxu0 %vm3012_vm0, %v3011_v3 }
 0x224   : > { %2384 = vmatprep.subr.bf16.mxu0 %v3011_v3  ;;  %2404 = vmatprep.mubr.msk.bf16.mxu1 %vm3012_vm0, %v3011_v3 }
 0x227   : > { %2385 = vmatpush3.bf16.msra.mxu0 %v2620_v33 }
 0x228   : > { %2386 = vmatprep.subr.bf16.mxu0 %v3011_v3 }
 0x22b   : > { %2387 = vmatpush3.bf16.msra.mxu0 %v2621_v34 }
 0x22c   : > { %2388 = vmatprep.subr.bf16.mxu0 %v3011_v3 }
 0x22f   : > { %2389 = vmatpush3.bf16.msra.mxu0 %v2622_v35 }
 0x230   : > { %2390 = vmatprep.subr.bf16.mxu0 %v3011_v3 }
 0x233   : > { %2391 = vmatpush3.bf16.msra.mxu0 %v2623_v36 }
 0x234   : > { %2392 = vmatprep.subr.bf16.mxu0 %v3011_v3 }
 0x237   : > { %2393 = vmatpush3.bf16.msra.mxu0 %v2624_v37 }
 0x238   : > { %2394 = vmatprep.subr.bf16.mxu0 %v3011_v3 }
 0x23b   : > { %2395 = vmatpush3.bf16.msra.mxu0 %v2625_v38 }
 0x23c   : > { %2396 = vmatprep.subr.bf16.mxu0 %v3011_v3 }
 0x23f   : > { %2397 = vmatpush3.bf16.msra.mxu0 %v2626_v39 }
 0x240   : > { %2450 = vmatprep.subr.bf16.mxu0 %v3011_v3 }
 0x242   : > { %2399 = vmatmul.mubr.bf16.vlgmr.msra.gmra.mrb[4].mxu0 %v700_v32 }
 0x243   : > { %2466 = vmatprep.mubr.msk.bf16.mxu0 %vm3012_vm0, %v3011_v3 }
 0x2f5   : > { %v806_v42 = vpop.f32.mrb[0].mxu0  ;;  %v919_v43 = vpop.f32.mrb[0].mxu1 }
 0x2f6   : > { %v807_v44 = vadd.f32 %v2180_v40, %v806_v42  ;;  %v920_v45 = vadd.f32 %v2189_v41, %v919_v43  ;;  %v2360_v46 = vpop.f32.mrb[1].mxu0  ;;  %v2380_v47 = vpop.f32.mrb[1].mxu1 }
 0x2f7   : > { %v809_v48 = vpop.f32.mrb[2].mxu0  ;;  %v922_v49 = vpop.f32.mrb[2].mxu1 }
 0x2f8   : > { %v812_v50 = vpack.c.bf16 %v807_v44, %v807_v44  ;;  %v925_v51 = vpack.c.bf16 %v920_v45, %v920_v45  ;;  %v2361_v52 = vpop.f32.mrb[3].mxu0  ;;  %v2381_v53 = vpop.f32.mrb[3].mxu1 }
 0x2fa   : > { %813 = vst [vmem:[#allocation3] sm:$0xf] %v812_v50  ;;  %926 = vst [vmem:[#allocation4] sm:$0xf] %v925_v51 }
 0x301   : > { %v1048_v54 = vld [vmem:[#allocation3] sm:$0xf]  ;;  %v1049_v2 = vld [vmem:[#allocation4] sm:$0xf] }
 0x302   : > { %v1055_v55 = vsel %vm1050_vm1, %v1048_v54, 0  ;;  %v3460_v56 = vcombine.low %v1048_v54, %v1048_v54  ;;  %v1115_v5 = vsel %vm1113_vm2, %v1049_v2, 0  ;;  %v3495_v38 = vcombine.low %v1049_v2, %v1049_v2 }
 0x303   : > { %2403 = vmatpush3.bf16.xpose.msra.mxu1 %v1055_v55 }
 0x304   : > { %1165 = vrot.lane.b32.xlu0 %v3460_v56, %s3013_s10  ;;  %2408 = vmatprep.subr.bf16.mxu1 %v3011_v3 }
 0x315   : > { %v1038_v58 = vpop.f32.mrb[4].mxu0 }
 0x316   : > { %v1039_v59 = vadd.f32 %v2198_v57, %v1038_v58  ;;  %v2400_v60 = vpop.f32.mrb[5].mxu0 }
 0x317   : > { %v1041_v61 = vpop.f32.mrb[6].mxu0 }
 0x318   : > { %v1044_v62 = vmul.f32 0.17677669, %v1039_v59  ;;  %v2401_v63 = vpop.f32.mrb[7].mxu0 }
 0x31a   : > { %v1045_v1 = vpack.c.bf16 %v1044_v62, %v1044_v62 }
 0x31c   : > { %1046 = vst [vmem:[#allocation5] sm:$0xf] %v1045_v1 }
 0x323   : > { %v1047_v4 = vld [vmem:[#allocation5] sm:$0xf] }
 0x324   : > { %2405 = vmatmul.mubr.msk.bf16.vlgmr.msra.gmra.mrb[4].mxu1 %vm1050_vm1, %v1047_v4  ;;  %v3475_v16 = vcombine.low %v1047_v4, %v1047_v4 }
 0x325   : > { %2409 = vmatpush3.bf16.msra.mxu1 %v1115_v5  ;;  %2410 = vmatprep.mubr.msk.bf16.mxu1 %vm3012_vm0, %v3011_v3 }
 0x326   : > { %2414 = vmatprep.subr.bf16.mxu1 %v3011_v3 }
 0x376   : > { %v1166_v20 = vpop.permute.xlu0 %1165 }
 0x377   : > { %v1171_v22 = vsel %vm1050_vm1, %v1166_v20, 0 }
 0x3f7   : > { %v1091_v6 = vpop.f32.mrb[4].mxu1 }
 0x3f8   : > { %v2406_v7 = vpop.f32.mrb[5].mxu1  ;;  %v1098_v8 = vsel %vm1097_vm3, %v1091_v6, -inf }
 0x3f9   : > { %1099 = vmax.xlane.f32.xlu1 %v1098_v8  ;;  %v1094_v9 = vpop.f32.mrb[6].mxu1 }
 0x3fa   : > { %v2407_v10 = vpop.f32.mrb[7].mxu1 }
 0x486   : > { %v1100_v11 = vpop.xlane.xlu1 %1099 }
 0x487   : > { %v1101_v12 = vsub.f32 %v1091_v6, %v1100_v11 }
 0x489   : > { %v1102_v13 = vmul.f32 1.442695, %v1101_v12 }
 0x48b   : > { %2680 = vpow2.f32 %v1102_v13 }
 0x495   : > { %v2681_v14 = vpop.eup %2680 }
 0x496   : > { %v1104_v15 = vsel %vm1097_vm3, %v2681_v14, 0.0 }
 0x497   : > { %1105 = vadd.xlane.f32.xlu1 %v1104_v15 }
 0x4a8   : > { %1160 = vrot.lane.b32.xlu1 %v3475_v16, %s3013_s10 }
 0x524   : > { %v1106_v17 = vpop.xlane.xlu1 %1105 }
 0x525   : > { %2682 = vrcp.f32 %v1106_v17 }
 0x528   : > { %v1161_v23 = vpop.permute.xlu1 %1160 }
 0x52f   : > { %v2683_v18 = vpop.eup %2682 }
 0x530   : > { %v1108_v19 = vmul.f32 %v2683_v18, %v2681_v14 }
 0x532   : > { %v1109_v21 = vpack.c.bf16 %v1108_v19, %v1108_v19 }
 0x534   : > { %2411 = vmatmul.mubr.msk.bf16.vlgmr.msra.gmra.mrb[8].mxu1 %vm1097_vm3, %v1109_v21 }
 0x535   : > { %2415 = vmatpush3.bf16.xpose.msra.mxu1 %v1171_v22  ;;  %2416 = vmatprep.mubr.msk.bf16.mxu1 %vm3012_vm0, %v3011_v3 }
 0x536   : > { %2420 = vmatprep.subr.bf16.mxu1 %v3011_v3 }
 0x53c   : > { %2417 = vmatmul.mubr.msk.bf16.vlgmr.msra.gmra.mrb[12].mxu1 %vm1050_vm1, %v1161_v23 }
 0x53d   : > { %2422 = vmatprep.mubr.msk.bf16.mxu1 %vm3012_vm0, %v3011_v3 }
 0x607   : > { %v3487_v24 = vpop.f32.mrb[8].mxu1 }
 0x608   : > { %v2412_v25 = vpop.f32.mrb[9].mxu1 }
 0x609   : > { %v1154_v26 = vpop.f32.mrb[10].mxu1 }
 0x60a   : > { %v2413_v27 = vpop.f32.mrb[11].mxu1 }
 0x60f   : > { %v1207_v28 = vpop.f32.mrb[12].mxu1 }
 0x610   : > { %v2418_v29 = vpop.f32.mrb[13].mxu1  ;;  %v1213_v30 = vsel %vm1097_vm3, %v1207_v28, -inf }
 0x611   : > { %1214 = vmax.xlane.f32.xlu1 %v1213_v30  ;;  %v1210_v31 = vpop.f32.mrb[14].mxu1  ;;  %v2630_v30 = vld [vmem:[#allocation15] sm:$0xff]  }
 0x612   : > { %v2419_v32 = vpop.f32.mrb[15].mxu1  ;;  %2451 = vmatpush3.bf16.msra.mxu0 %v2630_v30  ;;  %v2631_v31 = vld [vmem:[#allocation15 + $0x8] sm:$0xff]   ;;  %v2668_v30 = vld [vmem:[#allocation18 + $0x58] sm:$0xff]  }
 0x613   : > { %2452 = vmatprep.subr.bf16.mxu0 %v3011_v3  ;;  %v2632_v32 = vld [vmem:[#allocation15 + $0x10] sm:$0xff]  }
 0x616   : > { %2453 = vmatpush3.bf16.msra.mxu0 %v2631_v31  ;;  %v2669_v31 = vld [vmem:[#allocation18 + $0x18] sm:$0xff]  }
 0x617   : > { %2454 = vmatprep.subr.bf16.mxu0 %v3011_v3 }
 0x61a   : > { %2455 = vmatpush3.bf16.msra.mxu0 %v2632_v32  ;;  %v2670_v32 = vld [vmem:[#allocation18 + $0x60] sm:$0xff]  }
 0x61b   : > { %2456 = vmatprep.subr.bf16.mxu0 %v3011_v3 }
 0x622   : > { %1278 = vrot.lane.b32.xlu1 %v3460_v56, %s3014_s18 }
 0x626   : > { %1276 = vrot.lane.b32.xlu1 %v3475_v16, %s3014_s18 }
 0x69e   : > { %v1215_v33 = vpop.xlane.xlu1 %1214 }
 0x69f   : > { %v1216_v34 = vsub.f32 %v1207_v28, %v1215_v33  ;;  %v2633_v33 = vld [vmem:[#allocation15 + $0x18] sm:$0xff]  }
 0x6a0   : > { %2457 = vmatpush3.bf16.msra.mxu0 %v2633_v33  ;;  %v2671_v33 = vld [vmem:[#allocation18 + $0x20] sm:$0xff]  }
 0x6a1   : > { %v1217_v35 = vmul.f32 1.442695, %v1216_v34  ;;  %v2634_v34 = vld [vmem:[#allocation15 + $0x20] sm:$0xff]   ;;  %2458 = vmatprep.subr.bf16.mxu0 %v3011_v3 }
 0x6a2   : > { %v1279_v44 = vpop.permute.xlu1 %1278 }
 0x6a3   : > { %2684 = vpow2.f32 %v1217_v35  ;;  %v1284_v46 = vsel %vm1050_vm1, %v1279_v44, 0  ;;  %v2635_v35 = vld [vmem:[#allocation15 + $0x28] sm:$0xff]  }
 0x6a4   : > { %2459 = vmatpush3.bf16.msra.mxu0 %v2634_v34  ;;  %v2672_v34 = vld [vmem:[#allocation18 + $0x68] sm:$0xff]  }
 0x6a5   : > { %2460 = vmatprep.subr.bf16.mxu0 %v3011_v3 }
 0x6a6   : > { %v1277_v47 = vpop.permute.xlu1 %1276 }
 0x6a8   : > { %2461 = vmatpush3.bf16.msra.mxu0 %v2635_v35  ;;  %v2673_v35 = vld [vmem:[#allocation18 + $0x28] sm:$0xff]  }
 0x6a9   : > { %2462 = vmatprep.subr.bf16.mxu0 %v3011_v3 }
 0x6ad   : > { %v2685_v36 = vpop.eup %2684 }
 0x6ae   : > { %v1219_v37 = vsel %vm1097_vm3, %v2685_v36, 0.0 }
 0x6af   : > { %1220 = vadd.xlane.f32.xlu0 %v1219_v37  ;;  %v2637_v37 = vld [vmem:[#allocation15 + $0x38] sm:$0xff]  }
 0x6c5   : > { %1228 = vrot.lane.b32.xlu0 %v3495_v38, %s3013_s10 }
 0x73c   : > { %v1221_v39 = vpop.xlane.xlu0 %1220 }
 0x73d   : > { %2686 = vrcp.f32 %v1221_v39 }
 0x740   : > { %v1229_v40 = vpop.permute.xlu0 %1228 }
 0x741   : > { %v1234_v41 = vsel %vm1113_vm2, %v1229_v40, 0 }
 0x742   : > { %2421 = vmatpush3.bf16.msra.mxu1 %v1234_v41 }
 0x743   : > { %2426 = vmatprep.subr.bf16.mxu1 %v3011_v3 }
 0x747   : > { %v2687_v42 = vpop.eup %2686 }
 0x748   : > { %v1223_v43 = vmul.f32 %v2687_v42, %v2685_v36  ;;  %v2636_v36 = vld [vmem:[#allocation15 + $0x30] sm:$0xff]  }
 0x749   : > { %2463 = vmatpush3.bf16.msra.mxu0 %v2636_v36  ;;  %v2674_v36 = vld [vmem:[#allocation18 + $0x70] sm:$0xff]  }
 0x74a   : > { %v1224_v45 = vpack.c.bf16 %v1223_v43, %v1223_v43  ;;  %2464 = vmatprep.subr.bf16.mxu0 %v3011_v3 }
 0x74c   : > { %2423 = vmatmul.mubr.msk.bf16.vlgmr.msra.gmra.mrb[16].mxu1 %vm1097_vm3, %v1224_v45 }
 0x74d   : > { %2427 = vmatpush3.bf16.xpose.msra.mxu1 %v1284_v46  ;;  %2428 = vmatprep.mubr.msk.bf16.mxu1 %vm3012_vm0, %v3011_v3 }
 0x74e   : > { %2432 = vmatprep.subr.bf16.mxu1 %v3011_v3  ;;  %2465 = vmatpush3.bf16.msra.mxu0 %v2637_v37  ;;  %v2675_v37 = vld [vmem:[#allocation18 + $0x30] sm:$0xff]  }
 0x754   : > { %2429 = vmatmul.mubr.msk.bf16.vlgmr.msra.gmra.mrb[20].mxu1 %vm1050_vm1, %v1277_v47 }
 0x755   : > { %2434 = vmatprep.mubr.msk.bf16.mxu1 %vm3012_vm0, %v3011_v3 }
 0x81f   : > { %v1270_v48 = vpop.f32.mrb[16].mxu1 }
 0x820   : > { %v2424_v49 = vpop.f32.mrb[17].mxu1 }
 0x821   : > { %v1273_v50 = vpop.f32.mrb[18].mxu1  ;;  %v2218_v49 = vld [vmem:[%s3684_s27] ss:$0 sm:$0xff]  ;;  %s3689_s27 = sld [smem:[#allocation36_spill]] }
 0x822   : > { %v2425_v51 = vpop.f32.mrb[19].mxu1 }
 0x827   : > { %v1320_v52 = vpop.f32.mrb[20].mxu1 }
 0x828   : > { %v2430_v53 = vpop.f32.mrb[21].mxu1  ;;  %v1326_v54 = vsel %vm1097_vm3, %v1320_v52, -inf }
 0x829   : > { %1327 = vmax.xlane.f32.xlu1 %v1326_v54  ;;  %v1323_v55 = vpop.f32.mrb[22].mxu1 }
 0x82a   : > { %v2431_v57 = vpop.f32.mrb[23].mxu1  ;;  %v2638_v55 = vld [vmem:[#allocation16] ss:$8 sps:$4 sm:$0xff]  }
 0x82b   : > { %v2640_v57 = vld [vmem:[#allocation16 + $0x4] ss:$8 sps:$4 sm:$0xff]  }
 0x83a   : > { %1388 = vrot.lane.b32.xlu1 %v3460_v56, %s3015_s0 }
 0x83e   : > { %1386 = vrot.lane.b32.xlu1 %v3475_v16, %s3015_s0 }
 0x8b6   : > { %v1328_v58 = vpop.xlane.xlu1 %1327 }
 0x8b7   : > { %v1329_v59 = vsub.f32 %v1320_v52, %v1328_v58  ;;  %v2643_v58 = vld [vmem:[#allocation16 + $0x14] ss:$8 sps:$4 sm:$0xff]  }
 0x8b9   : > { %v1330_v60 = vmul.f32 1.442695, %v1329_v59  ;;  %v2641_v59 = vld [vmem:[#allocation16 + $0x10] ss:$8 sps:$4 sm:$0xff]  }
 0x8ba   : > { %v1389_v5 = vpop.permute.xlu1 %1388 }
 0x8bb   : > { %2688 = vpow2.f32 %v1330_v60  ;;  %v1394_v7 = vsel %vm1050_vm1, %v1389_v5, 0  ;;  %v2646_v60 = vld [vmem:[#allocation16 + $0x24] ss:$8 sps:$4 sm:$0xff]   ;;  %v2650_v5 = vld [vmem:[#allocation16 + $0x40] ss:$8 sps:$4 sm:$0xff]  }
 0x8be   : > { %v1387_v8 = vpop.permute.xlu1 %1386 }
 0x8c5   : > { %v2689_v61 = vpop.eup %2688 }
 0x8c6   : > { %v1332_v62 = vsel %vm1097_vm3, %v2689_v61, 0.0 }
 0x8c7   : > { %1333 = vadd.xlane.f32.xlu0 %v1332_v62 }
 0x8dd   : > { %1338 = vrot.lane.b32.xlu0 %v3495_v38, %s3014_s18 }
 0x954   : > { %v1334_v63 = vpop.xlane.xlu0 %1333 }
 0x955   : > { %2690 = vrcp.f32 %v1334_v63 }
 0x958   : > { %v1339_v1 = vpop.permute.xlu0 %1338 }
 0x959   : > { %v1344_v2 = vsel %vm1113_vm2, %v1339_v1, 0 }
 0x95a   : > { %2433 = vmatpush3.bf16.msra.mxu1 %v1344_v2  ;;  %v2649_v2 = vld [vmem:[#allocation16 + $0x34] ss:$8 sps:$4 sm:$0xff]  }
 0x95b   : > { %2438 = vmatprep.subr.bf16.mxu1 %v3011_v3 }
 0x95f   : > { %v2691_v56 = vpop.eup %2690 }
 0x960   : > { %v1336_v4 = vmul.f32 %v2691_v56, %v2689_v61  ;;  %v2644_v61 = vld [vmem:[#allocation16 + $0x20] ss:$8 sps:$4 sm:$0xff]   ;;  %v2647_v56 = vld [vmem:[#allocation16 + $0x30] ss:$8 sps:$4 sm:$0xff]  }
 0x962   : > { %v1337_v6 = vpack.c.bf16 %v1336_v4, %v1336_v4  ;;  %v2652_v4 = vld [vmem:[#allocation16 + $0x44] ss:$8 sps:$4 sm:$0xff]  }
 0x964   : > { %2435 = vmatmul.mubr.msk.bf16.vlgmr.msra.gmra.mrb[24].mxu1 %vm1097_vm3, %v1337_v6  ;;  %v2655_v6 = vld [vmem:[#allocation16 + $0x54] ss:$8 sps:$4 sm:$0xff]  }
 0x965   : > { %2439 = vmatpush3.bf16.xpose.msra.mxu1 %v1394_v7  ;;  %2440 = vmatprep.mubr.msk.bf16.mxu1 %vm3012_vm0, %v3011_v3  ;;  %v2653_v7 = vld [vmem:[#allocation16 + $0x50] ss:$8 sps:$4 sm:$0xff]  }
 0x966   : > { %2444 = vmatprep.subr.bf16.mxu1 %v3011_v3 }
 0x96c   : > { %2441 = vmatmul.mubr.msk.bf16.vlgmr.msra.gmra.mrb[28].mxu1 %vm1050_vm1, %v1387_v8  ;;  %v2658_v8 = vld [vmem:[#allocation16 + $0x64] ss:$8 sps:$4 sm:$0xff]  }
 0x96d   : > { %2446 = vmatprep.mubr.msk.bf16.mxu1 %vm3012_vm0, %v3011_v3 }
 0xa37   : > { %v1380_v9 = vpop.f32.mrb[24].mxu1 }
 0xa38   : > { %v2436_v10 = vpop.f32.mrb[25].mxu1 }
 0xa39   : > { %v1383_v11 = vpop.f32.mrb[26].mxu1  ;;  %v2661_v10 = vld [vmem:[#allocation16 + $0x74] ss:$8 sps:$4 sm:$0xff]  }
 0xa3a   : > { %v2437_v12 = vpop.f32.mrb[27].mxu1  ;;  %v2659_v11 = vld [vmem:[#allocation16 + $0x70] ss:$8 sps:$4 sm:$0xff]  }
 0xa3b   : > { %v3016_v12 = vmov 0  }
 0xa3f   : > { %v1430_v13 = vpop.f32.mrb[28].mxu1 }
 0xa40   : > { %v2442_v14 = vpop.f32.mrb[29].mxu1  ;;  %v1436_v15 = vsel %vm1097_vm3, %v1430_v13, -inf }
 0xa41   : > { %1437 = vmax.xlane.f32.xlu0 %v1436_v15  ;;  %v1433_v16 = vpop.f32.mrb[30].mxu1 }
 0xa42   : > { %v2443_v17 = vpop.f32.mrb[31].mxu1 }
 0xa43   : > { %v2227_v17 = vld [vmem:[%s3685_s14] ss:$0 sm:$0xff]  ;;  %s2017_s14 = sshll.u32 %s664_s4, 4  ;;  %s3574_s14 = int_to_ptr.vmem [resolvable:$true] %s2017_s14 }
 0xa57   : > { %1448 = vrot.lane.b32.xlu0 %v3495_v38, %s3015_s0 }
 0xa5b   : > { %1501 = vrot.lane.b32.xlu0 %v1380_v9, %s3014_s18  ;;  %v2656_v9 = vld [vmem:[#allocation16 + $0x60] ss:$8 sps:$4 sm:$0xff]   ;;  %s3687_s18 = sld [smem:[#allocation35_spill]] }
 0xace   : > { %v1438_v18 = vpop.xlane.xlu0 %1437 }
 0xacf   : > { %v1439_v19 = vsub.f32 %v1430_v13, %v1438_v18 }
 0xad1   : > { %v1440_v20 = vmul.f32 1.442695, %v1439_v19  ;;  %v2228_v19 = vld [vmem:[%s3686_s11] ss:$0 sm:$0xff]  ;;  %s3690_s11 = sld [smem:[#allocation37_spill]] }
 0xad2   : > { %v1449_v21 = vpop.permute.xlu0 %1448 }
 0xad3   : > { %2692 = vpow2.f32 %v1440_v20  ;;  %v1454_v22 = vsel %vm1113_vm2, %v1449_v21, 0 }
 0xad4   : > { %2445 = vmatpush3.bf16.msra.mxu1 %v1454_v22 }
 0xad5   : > { %1765 = vmatprep.subr.bf16.mxu1 %v2640_v57 }
 0xad6   : > { %v1502_v44 = vpop.permute.xlu0 %1501 }
 0xadd   : > { %v2693_v23 = vpop.eup %2692 }
 0xade   : > { %v1442_v25 = vsel %vm1097_vm3, %v2693_v23, 0.0 }
 0xadf   : > { %1443 = vadd.xlane.f32.xlu1 %v1442_v25  ;;  %v2663_v25 = vld [vmem:[#allocation18] sm:$0xff]  }
 0xaf0   : > { %1497 = vrot.lane.b32.xlu1 %v1270_v48, %s3015_s0  ;;  %s3688_s0 = sld [smem:[#allocation25_spill]] }
 0xaf6   : > { %s2265_s17 = sshll.u32 %s3688_s0, 7  ;;  %s2908_s0 = sshll.u32 %s3017_s1, 4  ;;  %s2909_s0 = int_to_ptr.vmem [resolvable:$false] %s2908_s0 }
 0xaf7   : > { %s3572_s19 = scalar_lea.hbm %s3690_s11, %s2265_s17  ;;  %s2910_s23 = scalar_lea.vmem %s2909_s0, 256 }
 0xaf8   : > { %p2911_p0 = scmp.lt.s32.totalorder %s3574_s14, %s2909_s0 }
 0xb6c   : > { %v1444_v26 = vpop.xlane.xlu1 %1443 }
 0xb6d   : > { %2694 = vrcp.f32 %v1444_v26  ;;  %v2664_v26 = vld [vmem:[#allocation18 + $0x48] sm:$0xff]  }
 0xb70   : > { %v1498_v42 = vpop.permute.xlu1 %1497 }
 0xb71   : > { %v1508_v43 = vsel %vm1050_vm1, %v3487_v24, %v1498_v42 }
 0xb72   : > { %v1510_v45 = vsel %vm1509_vm4, %v1508_v43, %v1502_v44  ;;  %v1673_v43 = vld [vmem:[%s3687_s18] sm:$0x3]  ;;  %s2904_s18 = scalar_lea.vmem %s3574_s14, 128 }
 0xb73   : > { %p2905_p2 = scmp.ne.s32.totalorder %s3574_s14, %s2904_s18  ;;  %p2912_p7 = scmp.lt.s32.totalorder %s2910_s23, %s2904_s18 }
 0xb75   : > { %p2906_p10 = pnand %p2905_p2, %p3691_p9  ;;  %p2913_p5 = por %p2912_p7, %p2911_p0 }
 0xb77   : > { %v2695_v27 = vpop.eup %2694  ;;  %p2907_p1 = pneg %p2906_p10 }
 0xb78   : > { %v1446_v28 = vmul.f32 %v2695_v27, %v2693_v23  ;;  %v2662_v23 = vld [vmem:[#allocation18 + $0x40] sm:$0xff]   ;;  %v2665_v27 = vld [vmem:[#allocation18 + $0x8] sm:$0xff]  }
 0xb79   : > { %2320 = vmatprep.subr.bf16.mxu0 %v2662_v23  ;;  %p2914_p8 = pnand %p2913_p5, %p2907_p1 }
 0xb7a   : > { %v1447_v29 = vpack.c.bf16 %v1446_v28, %v1446_v28  ;;  %v2666_v28 = vld [vmem:[#allocation18 + $0x50] sm:$0xff]  }
 0xb7c   : > { %2447 = vmatmul.mubr.msk.bf16.vlgmr.msra.gmra.mrb[32].mxu1 %vm1097_vm3, %v1447_v29  ;;  %v2667_v29 = vld [vmem:[#allocation18 + $0x10] sm:$0xff]  }
 0xb7d   : > { %1766 = vmatpush1.bf16.msra.mxu1 %v2638_v55  ;;  %1797 = vmatprep.mubr.bf16.mxu1 %v3016_v12 }
 0xb7e   : > { %1767 = vmatprep.subr.bf16.mxu1 %v2643_v58 }
 0xb81   : > { %1768 = vmatpush1.bf16.msra.mxu1 %v2641_v59 }
 0xb82   : > { %1769 = vmatprep.subr.bf16.mxu1 %v2646_v60 }
 0xb85   : > { %1770 = vmatpush1.bf16.msra.mxu1 %v2644_v61 }
 0xb86   : > { %1771 = vmatprep.subr.bf16.mxu1 %v2649_v2 }
 0xb89   : > { %1772 = vmatpush1.bf16.msra.mxu1 %v2647_v56 }
 0xb8a   : > { %1773 = vmatprep.subr.bf16.mxu1 %v2652_v4 }
 0xb8d   : > { %1774 = vmatpush1.bf16.msra.mxu1 %v2650_v5 }
 0xb8e   : > { %1775 = vmatprep.subr.bf16.mxu1 %v2655_v6 }
 0xb91   : > { %1776 = vmatpush1.bf16.msra.mxu1 %v2653_v7  ;;  %v2263_v7 = vld [vmem:[%s3689_s27] ss:$0 sm:$0xff] }
 0xb92   : > { %1777 = vmatprep.subr.bf16.mxu1 %v2658_v8 }
 0xb95   : > { %1778 = vmatpush1.bf16.msra.mxu1 %v2656_v9 }
 0xb96   : > { %1779 = vmatprep.subr.bf16.mxu1 %v2661_v10 }
 0xb99   : > { %1780 = vmatpush1.bf16.msra.mxu1 %v2659_v11 }
 0xc4f   : > { %v1490_v38 = vpop.f32.mrb[32].mxu1 }
 0xc50   : > { %1505 = vrot.lane.b32.xlu1 %v1490_v38, %s3013_s10  ;;  %v2448_v39 = vpop.f32.mrb[33].mxu1  ;;  %v2676_v38 = vld [vmem:[#allocation18 + $0x78] sm:$0xff]  }
 0xc51   : > { %v1493_v40 = vpop.f32.mrb[34].mxu1  ;;  %v2677_v39 = vld [vmem:[#allocation18 + $0x38] sm:$0xff]  }
 0xc52   : > { %v2449_v41 = vpop.f32.mrb[35].mxu1  ;;  %v1675_v40 = vlaneseq }
 0xc54   : > { %v1676_v41 = vshrl.u32 %v1675_v40, 7 }
 0xc56   : > { %v1677_v42 = vsub.s32 0, %v1676_v41  ;;  %v1681_v44 = vsub.s32 1, %v1676_v41 }
 0xcc2   : > { %v1506_v46 = vpop.permute.xlu1 %1505 }
 0xcc3   : > { %v1512_v47 = vsel %vm1511_vm5, %v1510_v45, %v1506_v46  ;;  %v1678_v45 = vrot.slane %v1673_v43, %v1677_v42  ;;  %v1682_v46 = vrot.slane %v1673_v43, %v1681_v44 }
 0xcc4   : > { %v1513_v48 = vpack.c.bf16 %v1512_v47, %v1512_v47 }
 0xcc6   : > { %1514 = vst [vmem:[#allocation6] sm:$0xf] %v1513_v48 }
 0xccd   : > { %v1515_v3 = vld [vmem:[#allocation6] sm:$0xf] }
 0xcce   : > { %2467 = vmatmul.mubr.bf16.vlgmr.msra.gmra.mrb[8].mxu0 %v1515_v3 }
 0xccf   : > { %2321 = vmatpush3.bf16.msra.mxu0 %v2663_v25 }
 0xcd0   : > { %2322 = vmatprep.subr.bf16.mxu0 %v2664_v26 }
 0xcd3   : > { %2323 = vmatpush3.bf16.msra.mxu0 %v2665_v27 }
 0xcd4   : > { %2324 = vmatprep.subr.bf16.mxu0 %v2666_v28 }
 0xcd7   : > { %2325 = vmatpush3.bf16.msra.mxu0 %v2667_v29 }
 0xcd8   : > { %2326 = vmatprep.subr.bf16.mxu0 %v2668_v30 }
 0xcdb   : > { %2327 = vmatpush3.bf16.msra.mxu0 %v2669_v31 }
 0xcdc   : > { %2328 = vmatprep.subr.bf16.mxu0 %v2670_v32 }
 0xcdf   : > { %2329 = vmatpush3.bf16.msra.mxu0 %v2671_v33 }
 0xce0   : > { %2330 = vmatprep.subr.bf16.mxu0 %v2672_v34 }
 0xce3   : > { %2331 = vmatpush3.bf16.msra.mxu0 %v2673_v35 }
 0xce4   : > { %2332 = vmatprep.subr.bf16.mxu0 %v2674_v36 }
 0xce7   : > { %2333 = vmatpush3.bf16.msra.mxu0 %v2675_v37 }
 0xce8   : > { %2334 = vmatprep.subr.bf16.mxu0 %v2676_v38 }
 0xceb   : > { %2335 = vmatpush3.bf16.msra.mxu0 %v2677_v39 }
 0xda1   : > { %v1621_v50 = vpop.f32.mrb[8].mxu0 }
 0xda2   : > { %v1622_v51 = vadd.f32 %v2218_v49, %v1621_v50  ;;  %v2468_v52 = vpop.f32.mrb[9].mxu0 }
 0xda3   : > { %v1624_v53 = vpop.f32.mrb[10].mxu0 }
 0xda4   : > { %v3549_v24 = vadd.f32 %v1622_v51, %v3407_v0  ;;  %v2469_v54 = vpop.f32.mrb[11].mxu0 }
 0xda6   : > { %1630 = vadd.xlane.f32.xlu0 %v3549_v24 }
 0xe33   : > { %v1631_v62 = vpop.xlane.xlu0 %1630 }
 0xe34   : > { %v1633_v63 = vmul.f32 0.0078125, %v1631_v62 }
 0xe36   : > { %v1634_v0 = vsub.f32 %v3549_v24, %v1633_v63 }
 0xe38   : > { %v1635_v1 = vmul.f32 %v1634_v0, %v1634_v0 }
 0xe3a   : > { %1636 = vadd.xlane.f32.xlu1 %v1635_v1 }
 0xec7   : > { %v1637_v13 = vpop.xlane.xlu1 %1636 }
 0xec8   : > { %v1638_v14 = vmul.f32 0.0078125, %v1637_v13 }
 0xeca   : > { %v1639_v15 = vadd.f32 1e-05, %v1638_v14 }
 0xecc   : > { %2696 = vrsqrt.f32 %v1639_v15 }
 0xed6   : > { %v2697_v16 = vpop.eup %2696 }
 0xed7   : > { %v1641_v18 = vmul.f32 %v2697_v16, %v1634_v0 }
 0xed9   : > { %v1648_v20 = vmul.f32 %v2227_v17, %v1641_v18 }
 0xedb   : > { %v1655_v21 = vadd.f32 %v2228_v19, %v1648_v20 }
 0xedd   : > { %v1656_v22 = vpack.c.bf16 %v1655_v21, %v1655_v21 }
 0xedf   : > { %1798 = vmatmul.mubr.bf16.vlgmr.msra.gmra.mrb[36].mxu1 %v1656_v22 }
 0xfb2   : > { %v1799_v47 = vpop.f32.mrb[36].mxu1 }
 0xfb3   : > { %v1800_v48 = vadd.f32 %v1799_v47, %v1678_v45  ;;  %v1801_v3 = vpop.f32.mrb[37].mxu1 }
 0xfb4   : > { %v1802_v49 = vadd.f32 %v1801_v3, %v1682_v46  ;;  %v1803_v50 = vpop.f32.mrb[38].mxu1 }
 0xfb5   : > { %v2245_v51 = vmul.f32 -1.702, %v1800_v48  ;;  %v1804_v52 = vpop.f32.mrb[39].mxu1 }
 0xfb6   : > { %v2246_v53 = vmul.f32 -1.702, %v1802_v49 }
 0xfb7   : > { %v1810_v54 = vmul.f32 1.442695, %v2245_v51 }
 0xfb8   : > { %v1812_v55 = vmul.f32 1.442695, %v2246_v53 }
 0xfb9   : > { %2698 = vpow2.f32 %v1810_v54 }
 0xfba   : > { %2700 = vpow2.f32 %v1812_v55 }
 0xfc3   : > { %v2699_v57 = vpop.eup %2698 }
 0xfc4   : > { %v2701_v58 = vpop.eup %2700  ;;  %v1814_v59 = vadd.f32 1.0, %v2699_v57 }
 0xfc5   : > { %v1815_v60 = vadd.f32 1.0, %v2701_v58 }
 0xfc6   : > { %2702 = vrcp.f32 %v1814_v59 }
 0xfc7   : > { %2704 = vrcp.f32 %v1815_v60 }
 0xfd0   : > { %v2703_v61 = vpop.eup %2702 }
 0xfd1   : > { %v2705_v62 = vpop.eup %2704  ;;  %v1820_v63 = vmul.f32 %v2703_v61, %v1800_v48 }
 0xfd2   : > { %v1821_v0 = vmul.f32 %v2705_v62, %v1802_v49 }
 0xfd3   : > { %v1822_v2 = vpack.c.bf16 %v1820_v63, %v1820_v63 }
 0xfd4   : > { %v1823_v1 = vpack.c.bf16 %v1821_v0, %v1821_v0 }
 0xfd6   : > { %1984 = vmatprep.mubr.bf16.mxu0 %v1823_v1 }
 0xfd7   : > { %1985 = vmatmul.mubr.bf16.vlgmr.msra.gmra.mrb[12].mxu0 %v1822_v2 }
0x10aa   : > { %v2336_v56 = vpop.f32.mrb[12].mxu0 }
0x10ab   : > { %v2337_v4 = vpop.f32.mrb[13].mxu0 }
0x10ac   : > { %v2338_v5 = vadd.f32 %v2337_v4, %v2336_v56  ;;  %v2339_v6 = vpop.f32.mrb[14].mxu0 }
0x10ad   : > { %v2340_v8 = vpop.f32.mrb[15].mxu0 }
0x10ae   : > { %v1992_v9 = vadd.f32 %v2338_v5, %v3549_v24 }
0x10b0   : > { %v2000_v10 = vadd.f32 %v2263_v7, %v1992_v9 }
0x10b2   : > { %2001 = vst [vmem:[%s664_s4] sm:$0xff] %v2000_v10 }
0x10b3   : > { %2917 = shalt.err (!%p2914_p8)
}
0x10b4   : > { %s2918_s16 = scalar_lea.hbm %s3572_s19, 128  ;;  %s2922_s17 = scalar_lea.hbm %s3690_s11, 256 }
0x10b5   : > { %p2919_p3 = scmp.ne.s32.totalorder %s3572_s19, %s2918_s16  ;;  %p2923_p13 = scmp.lt.u32.totalorder %s3572_s19, %s3690_s11 }
0x10b6   : > { %p2924_p12 = scmp.lt.u32.totalorder %s2922_s17, %s2918_s16  ;;  %p2926_p2 = scmp.lt.u32.totalorder %s2918_s16, %s3572_s19 }
0x10b7   : > { %p2920_p11 = pnand %p2919_p3, %p3691_p9 }
0x10b8   : > { %p2925_p4 = por %p2924_p12, %p2923_p13 }
0x10b9   : > { %p2921_p6 = pneg %p2920_p11 }
0x10ba   : > { %p2927_p10 = por %p2926_p2, %p2925_p4 }
0x10bc   : > { %p2928_p1 = pnand %p2927_p10, %p2921_p6 }
0x10be   : > { %2931 = shalt.err (!%p2928_p1)
}
0x10bf   : > { %2496 = dma.vmem_to_hbm [thread:$0]  (%p3691_p9), %s3574_s14, 128, %s3572_s19, %s2003_s30  }
0x10c0 PF: > { %s2029_s10 = sand.u32 1, %s2978_s24   ;;  %p3692_p0 = scmp.ne.s32.totalorder %s3676_s22, 0 }
0x10c1   : > { %p3693_p7 = scmp.ge.s32.totalorder %s2998_s29, 2  ;;  %s2030_s18 = scalar_lea.sflag [#allocation9], %s2029_s10 }
0x10c3   : > { %p2522_p5 = pnand %p3693_p7, %p3692_p0 }
0x10c5   : > { %2973 = dma.done.wait (!%p2522_p5), %s2030_s18, 128  }
0x10c6   : > { %2975 = vsyncadd (!%p2522_p5), %s2030_s18, 4294967168  ;;  %s36_s29 = sadd.s32 1, %s2998_s29   ;;  %s3694_s24 = smov %s2982_s25 }
0x10c7   : > { %p33_p8 = scmp.ge.s32.totalorder %s36_s29, 4   ;;  %s3695_s25 = smov %s2986_s26 }
0x10c8   : > { %s3696_s26 = smov %s3335_s7  ;;  %s3697_s27 = smov %s2994_s28 }
0x10c9   : > { %s3698_s28 = smov %s3700_s20  ;;  %35 = sbr.rel (!%p33_p8) target bundleno = 22 (0x16), region = 163 }
0x10d0   :  { %2035 = vsyncpa [#allocation8], 1 }
0x10d1   :  { %2037 = vsyncpa [#allocation8 + $0x1], 1 }
0x10d2   :  { %2038 = vsyncpa [#allocation11], 1 }
0x10d3   :  { %2039 = vsyncpa [#allocation14], 1 }
0x10d4   :  { %2040 = vsyncpa [#allocation17], 1 }
0x10d5   :  { %2041 = vsyncpa [#allocation9], 1 }
0x10d6   :  { %2043 = vsyncpa [#allocation9 + $0x1], 1 }

</bundles_post_ra>
